<compile_context>
chip_gen: v7x
topology: tpu7x:2x2x1
jax: 0.10.0
libtpu: 0.0.40
codegen_flags: <defaults>
</compile_context>

<pallas_src>
import functools

import jax
import jax.numpy as jnp
from jax import lax
from jax.experimental import pallas as pl
from jax.experimental.pallas import tpu as pltpu


def _upsample_conv3x3_kernel(x_ref, w_ref, b_ref, o_ref, *, H, W, C_in, C_out, s):
    """Fused nearest-sx upsample + 3x3 pad-1 conv for one batch element.

    x_ref: (1, C_in, H, W)         input block (VMEM), original resolution
    w_ref: (C_out*C_in*3*3,)       conv weight, OIHW flattened (SMEM scalars)
    b_ref: (C_out,)                conv bias (SMEM scalars)
    o_ref: (1, C_out, H*s, W*s)    output block (VMEM)
    """
    f32 = jnp.float32
    Hu, Wu = H * s, W * s

    # 0/1 gather matrices implementing "nearest-upsample by s, shift by (tap-1), zero
    # outside the image" as matmuls:
    #   col_g[kw][j, q] = 1  iff  q + kw - 1 in [j*s, j*s + s)      shape (W,  Wu)
    #   row_g[kh][p, i] = 1  iff  p + kh - 1 in [i*s, i*s + s)      shape (Hu, H)
    # The interval condition also encodes the zero padding at both edges, so no pads,
    # shifted slices or rolls are needed anywhere.
    j_idx = lax.broadcasted_iota(jnp.int32, (W, Wu), 0)
    q_idx = lax.broadcasted_iota(jnp.int32, (W, Wu), 1)
    p_idx = lax.broadcasted_iota(jnp.int32, (Hu, H), 0)
    i_idx = lax.broadcasted_iota(jnp.int32, (Hu, H), 1)
    col_g, row_g = [], []
    for tap in range(3):
        off = tap - 1
        q_src = q_idx + off
        col_g.append(((q_src >= j_idx * s) & (q_src < j_idx * s + s)).astype(f32))
        p_src = p_idx + off
        row_g.append(((p_src >= i_idx * s) & (p_src < i_idx * s + s)).astype(f32))

    # Column-upsampled & column-shifted copies of every input channel (H, Wu):
    #   p_tiles[ci][kw][i, q] = x[ci, i, (q + kw - 1) // s]   (0 outside the image)
    p_tiles = []
    for ci in range(C_in):
        xc = x_ref[0, ci].astype(f32)                           # (H, W)
        p_tiles.append([
            jnp.dot(xc, col_g[kw],
                    precision=lax.Precision.HIGHEST,
                    preferred_element_type=f32)                 # (H, Wu), exact gather
            for kw in range(3)
        ])

    # Per output channel: accumulate the 9 taps with scalar weights on the VPU, then
    # apply the row upsample/shift with one small matmul per kh, add bias, store.
    for co in range(C_out):
        acc = jnp.full((Hu, Wu), b_ref[co], dtype=f32)          # bias folded into init
        for kh in range(3):
            m = jnp.zeros((H, Wu), dtype=f32)
            for ci in range(C_in):
                for kw in range(3):
                    wk = w_ref[((co * C_in + ci) * 3 + kh) * 3 + kw]   # SMEM scalar
                    m = m + wk * p_tiles[ci][kw]                 # VPU FMA on (H, Wu)
            acc = acc + jnp.dot(row_g[kh], m,
                                precision=lax.Precision.HIGHEST,
                                preferred_element_type=f32)      # (Hu, Wu), exact gather
        o_ref[0, co] = acc.astype(o_ref.dtype)                   # lane-dense store (W on lanes)


def upsample_forward(x_nchw, weight_oihw, bias, *, scale_factor=2, mode="nearest"):
    """Equivalent of: x = F.interpolate(x, scale_factor, mode); x = Conv2d(ch, ch, 3, 1, 1)(x)."""
    if mode != "nearest":
        raise NotImplementedError("only mode='nearest'")  # TODO(synk): other interpolation modes
    N, C, H, W = x_nchw.shape
    s = int(scale_factor)
    Hu, Wu = H * s, W * s
    C_out, C_in = weight_oihw.shape[0], weight_oihw.shape[1]
    assert C_in == C

    w_flat = weight_oihw.reshape(-1).astype(jnp.float32)   # (C_out*C_in*9,), OIHW order
    b_vec = bias.reshape(-1).astype(jnp.float32)           # (C_out,)

    kernel = functools.partial(_upsample_conv3x3_kernel,
                               H=H, W=W, C_in=C, C_out=C_out, s=s)
    return pl.pallas_call(
        kernel,
        out_shape=jax.ShapeDtypeStruct((N, C_out, Hu, Wu), x_nchw.dtype),
        grid_spec=pltpu.PrefetchScalarGridSpec(
            num_scalar_prefetch=0,
            grid=(N,),
            in_specs=[
                pl.BlockSpec((1, C, H, W), lambda n: (n, 0, 0, 0)),
                pl.BlockSpec(memory_space=pltpu.MemorySpace.SMEM),   # conv weights (scalars)
                pl.BlockSpec(memory_space=pltpu.MemorySpace.SMEM),   # conv bias (scalars)
            ],
            out_specs=pl.BlockSpec((1, C_out, Hu, Wu), lambda n: (n, 0, 0, 0)),
        ),
        compiler_params=pltpu.CompilerParams(
            dimension_semantics=("parallel",),
            vmem_limit_bytes=32 * 1024 * 1024,
        ),
    )(x_nchw, w_flat, b_vec)


def _reference(x_nchw, weight_oihw, bias, scale_factor=2):
    """Pure-JAX reference (nearest upsample + SAME 3x3 conv), NCHW / OIHW like PyTorch."""
    s = scale_factor
    x_up = jnp.repeat(jnp.repeat(x_nchw, s, axis=2), s, axis=3)
    w_hwio = jnp.transpose(weight_oihw, (2, 3, 1, 0))
    y = lax.conv_general_dilated(
        x_up, w_hwio, window_strides=(1, 1), padding="SAME",
        dimension_numbers=("NCHW", "HWIO", "NCHW"),
        precision=lax.Precision.HIGHEST,
    )
    return y + bias[None, :, None, None]


if __name__ == "__main__":
    # Small shapes consistent with the module: batch=2, channels=4, spatial=16.
    N, C, H, W = 2, 4, 16, 16
    key = jax.random.PRNGKey(0)
    kx, kw, kb = jax.random.split(key, 3)

    x = jax.random.normal(kx, (N, C, H, W), dtype=jnp.float32)

    # Conv2d(ch, ch, kernel_size=3): weight (C_out, C_in, 3, 3) in torch (OIHW).
    fan_in = C * 3 * 3
    bound = 1.0 / (fan_in ** 0.5)
    weight = jax.random.uniform(kw, (C, C, 3, 3), jnp.float32, -bound, bound)
    bias = jax.random.uniform(kb, (C,), jnp.float32, -bound, bound)

    out = upsample_forward(x, weight, bias, scale_factor=2, mode="nearest")
    out = jax.block_until_ready(out)

    ref = _reference(x, weight, bias, scale_factor=2)
    assert out.shape == (N, C, 2 * H, 2 * W), out.shape
    max_err = float(jnp.max(jnp.abs(out - ref)))
    assert jnp.allclose(out, ref, atol=1e-4, rtol=1e-4), f"mismatch vs reference, max abs err={max_err}"

    print("KERNEL_OK")
</pallas_src>

<mosaic_0001>
module attributes {stable_mosaic.version = 11 : i64} {
  func.func @_upsample_conv3x3_kernel(%arg0: i32, %arg1: memref<1x4x16x16xf32, #tpu.memory_space<vmem>>, %arg2: memref<144xf32, #tpu.memory_space<smem>>, %arg3: memref<4xf32, #tpu.memory_space<smem>>, %arg4: memref<1x4x32x32xf32, #tpu.memory_space<vmem>>) attributes {dimension_semantics = [#tpu.dimension_semantics<parallel>], iteration_bounds = array<i64: 2>, scalar_prefetch = 0 : i64, scratch_operands = 0 : i64, tpu.core_type = #tpu.core_type<tc>, window_params = [{transform_indices = @transform_0, window_bounds = array<i64: 1, 4, 16, 16>}, {transform_indices = @transform_1, window_bounds = array<i64: 144>}, {transform_indices = @transform_2, window_bounds = array<i64: 4>}, {transform_indices = @transform_3, window_bounds = array<i64: 1, 4, 32, 32>}]} {
    %0 = tpu.iota {dimensions = array<i32: 0>} : vector<16x32xi32>
    %1 = tpu.iota {dimensions = array<i32: 1>} : vector<16x32xi32>
    %2 = tpu.iota {dimensions = array<i32: 0>} : vector<32x16xi32>
    %3 = tpu.iota {dimensions = array<i32: 1>} : vector<32x16xi32>
    %c-1_i32 = arith.constant -1 : i32
    %4 = vector.broadcast %c-1_i32 : i32 to vector<16x32xi32>
    %5 = arith.addi %1, %4 : vector<16x32xi32>
    %c2_i32 = arith.constant 2 : i32
    %6 = vector.broadcast %c2_i32 : i32 to vector<16x32xi32>
    %7 = arith.muli %0, %6 : vector<16x32xi32>
    %8 = arith.cmpi sge, %5, %7 : vector<16x32xi32>
    %c2_i32_0 = arith.constant 2 : i32
    %9 = vector.broadcast %c2_i32_0 : i32 to vector<16x32xi32>
    %10 = arith.muli %0, %9 : vector<16x32xi32>
    %c2_i32_1 = arith.constant 2 : i32
    %11 = vector.broadcast %c2_i32_1 : i32 to vector<16x32xi32>
    %12 = arith.addi %10, %11 : vector<16x32xi32>
    %13 = arith.cmpi slt, %5, %12 : vector<16x32xi32>
    %14 = arith.andi %8, %13 : vector<16x32xi1>
    %15 = arith.extui %14 : vector<16x32xi1> to vector<16x32xi32>
    %16 = arith.sitofp %15 : vector<16x32xi32> to vector<16x32xf32>
    %c-1_i32_2 = arith.constant -1 : i32
    %17 = vector.broadcast %c-1_i32_2 : i32 to vector<32x16xi32>
    %18 = arith.addi %2, %17 : vector<32x16xi32>
    %c2_i32_3 = arith.constant 2 : i32
    %19 = vector.broadcast %c2_i32_3 : i32 to vector<32x16xi32>
    %20 = arith.muli %3, %19 : vector<32x16xi32>
    %21 = arith.cmpi sge, %18, %20 : vector<32x16xi32>
    %c2_i32_4 = arith.constant 2 : i32
    %22 = vector.broadcast %c2_i32_4 : i32 to vector<32x16xi32>
    %23 = arith.muli %3, %22 : vector<32x16xi32>
    %c2_i32_5 = arith.constant 2 : i32
    %24 = vector.broadcast %c2_i32_5 : i32 to vector<32x16xi32>
    %25 = arith.addi %23, %24 : vector<32x16xi32>
    %26 = arith.cmpi slt, %18, %25 : vector<32x16xi32>
    %27 = arith.andi %21, %26 : vector<32x16xi1>
    %28 = arith.extui %27 : vector<32x16xi1> to vector<32x16xi32>
    %29 = arith.sitofp %28 : vector<32x16xi32> to vector<32x16xf32>
    %c0_i32 = arith.constant 0 : i32
    %30 = vector.broadcast %c0_i32 : i32 to vector<16x32xi32>
    %31 = arith.addi %1, %30 : vector<16x32xi32>
    %c2_i32_6 = arith.constant 2 : i32
    %32 = vector.broadcast %c2_i32_6 : i32 to vector<16x32xi32>
    %33 = arith.muli %0, %32 : vector<16x32xi32>
    %34 = arith.cmpi sge, %31, %33 : vector<16x32xi32>
    %c2_i32_7 = arith.constant 2 : i32
    %35 = vector.broadcast %c2_i32_7 : i32 to vector<16x32xi32>
    %36 = arith.muli %0, %35 : vector<16x32xi32>
    %c2_i32_8 = arith.constant 2 : i32
    %37 = vector.broadcast %c2_i32_8 : i32 to vector<16x32xi32>
    %38 = arith.addi %36, %37 : vector<16x32xi32>
    %39 = arith.cmpi slt, %31, %38 : vector<16x32xi32>
    %40 = arith.andi %34, %39 : vector<16x32xi1>
    %41 = arith.extui %40 : vector<16x32xi1> to vector<16x32xi32>
    %42 = arith.sitofp %41 : vector<16x32xi32> to vector<16x32xf32>
    %c0_i32_9 = arith.constant 0 : i32
    %43 = vector.broadcast %c0_i32_9 : i32 to vector<32x16xi32>
    %44 = arith.addi %2, %43 : vector<32x16xi32>
    %c2_i32_10 = arith.constant 2 : i32
    %45 = vector.broadcast %c2_i32_10 : i32 to vector<32x16xi32>
    %46 = arith.muli %3, %45 : vector<32x16xi32>
    %47 = arith.cmpi sge, %44, %46 : vector<32x16xi32>
    %c2_i32_11 = arith.constant 2 : i32
    %48 = vector.broadcast %c2_i32_11 : i32 to vector<32x16xi32>
    %49 = arith.muli %3, %48 : vector<32x16xi32>
    %c2_i32_12 = arith.constant 2 : i32
    %50 = vector.broadcast %c2_i32_12 : i32 to vector<32x16xi32>
    %51 = arith.addi %49, %50 : vector<32x16xi32>
    %52 = arith.cmpi slt, %44, %51 : vector<32x16xi32>
    %53 = arith.andi %47, %52 : vector<32x16xi1>
    %54 = arith.extui %53 : vector<32x16xi1> to vector<32x16xi32>
    %55 = arith.sitofp %54 : vector<32x16xi32> to vector<32x16xf32>
    %c1_i32 = arith.constant 1 : i32
    %56 = vector.broadcast %c1_i32 : i32 to vector<16x32xi32>
    %57 = arith.addi %1, %56 : vector<16x32xi32>
    %c2_i32_13 = arith.constant 2 : i32
    %58 = vector.broadcast %c2_i32_13 : i32 to vector<16x32xi32>
    %59 = arith.muli %0, %58 : vector<16x32xi32>
    %60 = arith.cmpi sge, %57, %59 : vector<16x32xi32>
    %c2_i32_14 = arith.constant 2 : i32
    %61 = vector.broadcast %c2_i32_14 : i32 to vector<16x32xi32>
    %62 = arith.muli %0, %61 : vector<16x32xi32>
    %c2_i32_15 = arith.constant 2 : i32
    %63 = vector.broadcast %c2_i32_15 : i32 to vector<16x32xi32>
    %64 = arith.addi %62, %63 : vector<16x32xi32>
    %65 = arith.cmpi slt, %57, %64 : vector<16x32xi32>
    %66 = arith.andi %60, %65 : vector<16x32xi1>
    %67 = arith.extui %66 : vector<16x32xi1> to vector<16x32xi32>
    %68 = arith.sitofp %67 : vector<16x32xi32> to vector<16x32xf32>
    %c1_i32_16 = arith.constant 1 : i32
    %69 = vector.broadcast %c1_i32_16 : i32 to vector<32x16xi32>
    %70 = arith.addi %2, %69 : vector<32x16xi32>
    %c2_i32_17 = arith.constant 2 : i32
    %71 = vector.broadcast %c2_i32_17 : i32 to vector<32x16xi32>
    %72 = arith.muli %3, %71 : vector<32x16xi32>
    %73 = arith.cmpi sge, %70, %72 : vector<32x16xi32>
    %c2_i32_18 = arith.constant 2 : i32
    %74 = vector.broadcast %c2_i32_18 : i32 to vector<32x16xi32>
    %75 = arith.muli %3, %74 : vector<32x16xi32>
    %c2_i32_19 = arith.constant 2 : i32
    %76 = vector.broadcast %c2_i32_19 : i32 to vector<32x16xi32>
    %77 = arith.addi %75, %76 : vector<32x16xi32>
    %78 = arith.cmpi slt, %70, %77 : vector<32x16xi32>
    %79 = arith.andi %73, %78 : vector<32x16xi1>
    %80 = arith.extui %79 : vector<32x16xi1> to vector<32x16xi32>
    %81 = arith.sitofp %80 : vector<32x16xi32> to vector<32x16xf32>
    %c0 = arith.constant 0 : index
    %c0_20 = arith.constant 0 : index
    %c0_21 = arith.constant 0 : index
    %c0_22 = arith.constant 0 : index
    %82 = vector.load %arg1[%c0, %c0_20, %c0_21, %c0_22] : memref<1x4x16x16xf32, #tpu.memory_space<vmem>>, vector<1x1x16x16xf32>
    %83 = vector.shape_cast %82 : vector<1x1x16x16xf32> to vector<16x16xf32>
    %cst = arith.constant dense<0.000000e+00> : vector<16x32xf32>
    %84 = tpu.matmul %83, %16, %cst {dimension_numbers = #tpu.dot_dimension_numbers<[1], [0], [0], [1], [0, 0, 1, 1], [], []>, precision = #tpu.contract_precision<fp32>} : vector<16x16xf32>, vector<16x32xf32>, vector<16x32xf32> -> vector<16x32xf32>
    %cst_23 = arith.constant dense<0.000000e+00> : vector<16x32xf32>
    %85 = tpu.matmul %83, %42, %cst_23 {dimension_numbers = #tpu.dot_dimension_numbers<[1], [0], [0], [1], [0, 0, 1, 1], [], []>, precision = #tpu.contract_precision<fp32>} : vector<16x16xf32>, vector<16x32xf32>, vector<16x32xf32> -> vector<16x32xf32>
    %cst_24 = arith.constant dense<0.000000e+00> : vector<16x32xf32>
    %86 = tpu.matmul %83, %68, %cst_24 {dimension_numbers = #tpu.dot_dimension_numbers<[1], [0], [0], [1], [0, 0, 1, 1], [], []>, precision = #tpu.contract_precision<fp32>} : vector<16x16xf32>, vector<16x32xf32>, vector<16x32xf32> -> vector<16x32xf32>
    %c0_25 = arith.constant 0 : index
    %c1 = arith.constant 1 : index
    %c0_26 = arith.constant 0 : index
    %c0_27 = arith.constant 0 : index
    %87 = vector.load %arg1[%c0_25, %c1, %c0_26, %c0_27] : memref<1x4x16x16xf32, #tpu.memory_space<vmem>>, vector<1x1x16x16xf32>
    %88 = vector.shape_cast %87 : vector<1x1x16x16xf32> to vector<16x16xf32>
    %cst_28 = arith.constant dense<0.000000e+00> : vector<16x32xf32>
    %89 = tpu.matmul %88, %16, %cst_28 {dimension_numbers = #tpu.dot_dimension_numbers<[1], [0], [0], [1], [0, 0, 1, 1], [], []>, precision = #tpu.contract_precision<fp32>} : vector<16x16xf32>, vector<16x32xf32>, vector<16x32xf32> -> vector<16x32xf32>
    %cst_29 = arith.constant dense<0.000000e+00> : vector<16x32xf32>
    %90 = tpu.matmul %88, %42, %cst_29 {dimension_numbers = #tpu.dot_dimension_numbers<[1], [0], [0], [1], [0, 0, 1, 1], [], []>, precision = #tpu.contract_precision<fp32>} : vector<16x16xf32>, vector<16x32xf32>, vector<16x32xf32> -> vector<16x32xf32>
    %cst_30 = arith.constant dense<0.000000e+00> : vector<16x32xf32>
    %91 = tpu.matmul %88, %68, %cst_30 {dimension_numbers = #tpu.dot_dimension_numbers<[1], [0], [0], [1], [0, 0, 1, 1], [], []>, precision = #tpu.contract_precision<fp32>} : vector<16x16xf32>, vector<16x32xf32>, vector<16x32xf32> -> vector<16x32xf32>
    %c0_31 = arith.constant 0 : index
    %c2 = arith.constant 2 : index
    %c0_32 = arith.constant 0 : index
    %c0_33 = arith.constant 0 : index
    %92 = vector.load %arg1[%c0_31, %c2, %c0_32, %c0_33] : memref<1x4x16x16xf32, #tpu.memory_space<vmem>>, vector<1x1x16x16xf32>
    %93 = vector.shape_cast %92 : vector<1x1x16x16xf32> to vector<16x16xf32>
    %cst_34 = arith.constant dense<0.000000e+00> : vector<16x32xf32>
    %94 = tpu.matmul %93, %16, %cst_34 {dimension_numbers = #tpu.dot_dimension_numbers<[1], [0], [0], [1], [0, 0, 1, 1], [], []>, precision = #tpu.contract_precision<fp32>} : vector<16x16xf32>, vector<16x32xf32>, vector<16x32xf32> -> vector<16x32xf32>
    %cst_35 = arith.constant dense<0.000000e+00> : vector<16x32xf32>
    %95 = tpu.matmul %93, %42, %cst_35 {dimension_numbers = #tpu.dot_dimension_numbers<[1], [0], [0], [1], [0, 0, 1, 1], [], []>, precision = #tpu.contract_precision<fp32>} : vector<16x16xf32>, vector<16x32xf32>, vector<16x32xf32> -> vector<16x32xf32>
    %cst_36 = arith.constant dense<0.000000e+00> : vector<16x32xf32>
    %96 = tpu.matmul %93, %68, %cst_36 {dimension_numbers = #tpu.dot_dimension_numbers<[1], [0], [0], [1], [0, 0, 1, 1], [], []>, precision = #tpu.contract_precision<fp32>} : vector<16x16xf32>, vector<16x32xf32>, vector<16x32xf32> -> vector<16x32xf32>
    %c0_37 = arith.constant 0 : index
    %c3 = arith.constant 3 : index
    %c0_38 = arith.constant 0 : index
    %c0_39 = arith.constant 0 : index
    %97 = vector.load %arg1[%c0_37, %c3, %c0_38, %c0_39] : memref<1x4x16x16xf32, #tpu.memory_space<vmem>>, vector<1x1x16x16xf32>
    %98 = vector.shape_cast %97 : vector<1x1x16x16xf32> to vector<16x16xf32>
    %cst_40 = arith.constant dense<0.000000e+00> : vector<16x32xf32>
    %99 = tpu.matmul %98, %16, %cst_40 {dimension_numbers = #tpu.dot_dimension_numbers<[1], [0], [0], [1], [0, 0, 1, 1], [], []>, precision = #tpu.contract_precision<fp32>} : vector<16x16xf32>, vector<16x32xf32>, vector<16x32xf32> -> vector<16x32xf32>
    %cst_41 = arith.constant dense<0.000000e+00> : vector<16x32xf32>
    %100 = tpu.matmul %98, %42, %cst_41 {dimension_numbers = #tpu.dot_dimension_numbers<[1], [0], [0], [1], [0, 0, 1, 1], [], []>, precision = #tpu.contract_precision<fp32>} : vector<16x16xf32>, vector<16x32xf32>, vector<16x32xf32> -> vector<16x32xf32>
    %cst_42 = arith.constant dense<0.000000e+00> : vector<16x32xf32>
    %101 = tpu.matmul %98, %68, %cst_42 {dimension_numbers = #tpu.dot_dimension_numbers<[1], [0], [0], [1], [0, 0, 1, 1], [], []>, precision = #tpu.contract_precision<fp32>} : vector<16x16xf32>, vector<16x32xf32>, vector<16x32xf32> -> vector<16x32xf32>
    %c0_43 = arith.constant 0 : index
    %102 = memref.load %arg3[%c0_43] : memref<4xf32, #tpu.memory_space<smem>>
    %103 = vector.broadcast %102 : f32 to vector<32x32xf32>
    %cst_44 = arith.constant 0.000000e+00 : f32
    %104 = vector.broadcast %cst_44 : f32 to vector<16x32xf32>
    %c0_45 = arith.constant 0 : index
    %105 = memref.load %arg2[%c0_45] : memref<144xf32, #tpu.memory_space<smem>>
    %106 = vector.broadcast %105 : f32 to vector<16x32xf32>
    %107 = arith.mulf %106, %84 : vector<16x32xf32>
    %108 = arith.addf %104, %107 : vector<16x32xf32>
    %c1_46 = arith.constant 1 : index
    %109 = memref.load %arg2[%c1_46] : memref<144xf32, #tpu.memory_space<smem>>
    %110 = vector.broadcast %109 : f32 to vector<16x32xf32>
    %111 = arith.mulf %110, %85 : vector<16x32xf32>
    %112 = arith.addf %108, %111 : vector<16x32xf32>
    %c2_47 = arith.constant 2 : index
    %113 = memref.load %arg2[%c2_47] : memref<144xf32, #tpu.memory_space<smem>>
    %114 = vector.broadcast %113 : f32 to vector<16x32xf32>
    %115 = arith.mulf %114, %86 : vector<16x32xf32>
    %116 = arith.addf %112, %115 : vector<16x32xf32>
    %c9 = arith.constant 9 : index
    %117 = memref.load %arg2[%c9] : memref<144xf32, #tpu.memory_space<smem>>
    %118 = vector.broadcast %117 : f32 to vector<16x32xf32>
    %119 = arith.mulf %118, %89 : vector<16x32xf32>
    %120 = arith.addf %116, %119 : vector<16x32xf32>
    %c10 = arith.constant 10 : index
    %121 = memref.load %arg2[%c10] : memref<144xf32, #tpu.memory_space<smem>>
    %122 = vector.broadcast %121 : f32 to vector<16x32xf32>
    %123 = arith.mulf %122, %90 : vector<16x32xf32>
    %124 = arith.addf %120, %123 : vector<16x32xf32>
    %c11 = arith.constant 11 : index
    %125 = memref.load %arg2[%c11] : memref<144xf32, #tpu.memory_space<smem>>
    %126 = vector.broadcast %125 : f32 to vector<16x32xf32>
    %127 = arith.mulf %126, %91 : vector<16x32xf32>
    %128 = arith.addf %124, %127 : vector<16x32xf32>
    %c18 = arith.constant 18 : index
    %129 = memref.load %arg2[%c18] : memref<144xf32, #tpu.memory_space<smem>>
    %130 = vector.broadcast %129 : f32 to vector<16x32xf32>
    %131 = arith.mulf %130, %94 : vector<16x32xf32>
    %132 = arith.addf %128, %131 : vector<16x32xf32>
    %c19 = arith.constant 19 : index
    %133 = memref.load %arg2[%c19] : memref<144xf32, #tpu.memory_space<smem>>
    %134 = vector.broadcast %133 : f32 to vector<16x32xf32>
    %135 = arith.mulf %134, %95 : vector<16x32xf32>
    %136 = arith.addf %132, %135 : vector<16x32xf32>
    %c20 = arith.constant 20 : index
    %137 = memref.load %arg2[%c20] : memref<144xf32, #tpu.memory_space<smem>>
    %138 = vector.broadcast %137 : f32 to vector<16x32xf32>
    %139 = arith.mulf %138, %96 : vector<16x32xf32>
    %140 = arith.addf %136, %139 : vector<16x32xf32>
    %c27 = arith.constant 27 : index
    %141 = memref.load %arg2[%c27] : memref<144xf32, #tpu.memory_space<smem>>
    %142 = vector.broadcast %141 : f32 to vector<16x32xf32>
    %143 = arith.mulf %142, %99 : vector<16x32xf32>
    %144 = arith.addf %140, %143 : vector<16x32xf32>
    %c28 = arith.constant 28 : index
    %145 = memref.load %arg2[%c28] : memref<144xf32, #tpu.memory_space<smem>>
    %146 = vector.broadcast %145 : f32 to vector<16x32xf32>
    %147 = arith.mulf %146, %100 : vector<16x32xf32>
    %148 = arith.addf %144, %147 : vector<16x32xf32>
    %c29 = arith.constant 29 : index
    %149 = memref.load %arg2[%c29] : memref<144xf32, #tpu.memory_space<smem>>
    %150 = vector.broadcast %149 : f32 to vector<16x32xf32>
    %151 = arith.mulf %150, %101 : vector<16x32xf32>
    %152 = arith.addf %148, %151 : vector<16x32xf32>
    %cst_48 = arith.constant dense<0.000000e+00> : vector<32x32xf32>
    %153 = tpu.matmul %29, %152, %cst_48 {dimension_numbers = #tpu.dot_dimension_numbers<[1], [0], [0], [1], [0, 0, 1, 1], [], []>, precision = #tpu.contract_precision<fp32>} : vector<32x16xf32>, vector<16x32xf32>, vector<32x32xf32> -> vector<32x32xf32>
    %154 = arith.addf %103, %153 : vector<32x32xf32>
    %cst_49 = arith.constant 0.000000e+00 : f32
    %155 = vector.broadcast %cst_49 : f32 to vector<16x32xf32>
    %c3_50 = arith.constant 3 : index
    %156 = memref.load %arg2[%c3_50] : memref<144xf32, #tpu.memory_space<smem>>
    %157 = vector.broadcast %156 : f32 to vector<16x32xf32>
    %158 = arith.mulf %157, %84 : vector<16x32xf32>
    %159 = arith.addf %155, %158 : vector<16x32xf32>
    %c4 = arith.constant 4 : index
    %160 = memref.load %arg2[%c4] : memref<144xf32, #tpu.memory_space<smem>>
    %161 = vector.broadcast %160 : f32 to vector<16x32xf32>
    %162 = arith.mulf %161, %85 : vector<16x32xf32>
    %163 = arith.addf %159, %162 : vector<16x32xf32>
    %c5 = arith.constant 5 : index
    %164 = memref.load %arg2[%c5] : memref<144xf32, #tpu.memory_space<smem>>
    %165 = vector.broadcast %164 : f32 to vector<16x32xf32>
    %166 = arith.mulf %165, %86 : vector<16x32xf32>
    %167 = arith.addf %163, %166 : vector<16x32xf32>
    %c12 = arith.constant 12 : index
    %168 = memref.load %arg2[%c12] : memref<144xf32, #tpu.memory_space<smem>>
    %169 = vector.broadcast %168 : f32 to vector<16x32xf32>
    %170 = arith.mulf %169, %89 : vector<16x32xf32>
    %171 = arith.addf %167, %170 : vector<16x32xf32>
    %c13 = arith.constant 13 : index
    %172 = memref.load %arg2[%c13] : memref<144xf32, #tpu.memory_space<smem>>
    %173 = vector.broadcast %172 : f32 to vector<16x32xf32>
    %174 = arith.mulf %173, %90 : vector<16x32xf32>
    %175 = arith.addf %171, %174 : vector<16x32xf32>
    %c14 = arith.constant 14 : index
    %176 = memref.load %arg2[%c14] : memref<144xf32, #tpu.memory_space<smem>>
    %177 = vector.broadcast %176 : f32 to vector<16x32xf32>
    %178 = arith.mulf %177, %91 : vector<16x32xf32>
    %179 = arith.addf %175, %178 : vector<16x32xf32>
    %c21 = arith.constant 21 : index
    %180 = memref.load %arg2[%c21] : memref<144xf32, #tpu.memory_space<smem>>
    %181 = vector.broadcast %180 : f32 to vector<16x32xf32>
    %182 = arith.mulf %181, %94 : vector<16x32xf32>
    %183 = arith.addf %179, %182 : vector<16x32xf32>
    %c22 = arith.constant 22 : index
    %184 = memref.load %arg2[%c22] : memref<144xf32, #tpu.memory_space<smem>>
    %185 = vector.broadcast %184 : f32 to vector<16x32xf32>
    %186 = arith.mulf %185, %95 : vector<16x32xf32>
    %187 = arith.addf %183, %186 : vector<16x32xf32>
    %c23 = arith.constant 23 : index
    %188 = memref.load %arg2[%c23] : memref<144xf32, #tpu.memory_space<smem>>
    %189 = vector.broadcast %188 : f32 to vector<16x32xf32>
    %190 = arith.mulf %189, %96 : vector<16x32xf32>
    %191 = arith.addf %187, %190 : vector<16x32xf32>
    %c30 = arith.constant 30 : index
    %192 = memref.load %arg2[%c30] : memref<144xf32, #tpu.memory_space<smem>>
    %193 = vector.broadcast %192 : f32 to vector<16x32xf32>
    %194 = arith.mulf %193, %99 : vector<16x32xf32>
    %195 = arith.addf %191, %194 : vector<16x32xf32>
    %c31 = arith.constant 31 : index
    %196 = memref.load %arg2[%c31] : memref<144xf32, #tpu.memory_space<smem>>
    %197 = vector.broadcast %196 : f32 to vector<16x32xf32>
    %198 = arith.mulf %197, %100 : vector<16x32xf32>
    %199 = arith.addf %195, %198 : vector<16x32xf32>
    %c32 = arith.constant 32 : index
    %200 = memref.load %arg2[%c32] : memref<144xf32, #tpu.memory_space<smem>>
    %201 = vector.broadcast %200 : f32 to vector<16x32xf32>
    %202 = arith.mulf %201, %101 : vector<16x32xf32>
    %203 = arith.addf %199, %202 : vector<16x32xf32>
    %cst_51 = arith.constant dense<0.000000e+00> : vector<32x32xf32>
    %204 = tpu.matmul %55, %203, %cst_51 {dimension_numbers = #tpu.dot_dimension_numbers<[1], [0], [0], [1], [0, 0, 1, 1], [], []>, precision = #tpu.contract_precision<fp32>} : vector<32x16xf32>, vector<16x32xf32>, vector<32x32xf32> -> vector<32x32xf32>
    %205 = arith.addf %154, %204 : vector<32x32xf32>
    %cst_52 = arith.constant 0.000000e+00 : f32
    %206 = vector.broadcast %cst_52 : f32 to vector<16x32xf32>
    %c6 = arith.constant 6 : index
    %207 = memref.load %arg2[%c6] : memref<144xf32, #tpu.memory_space<smem>>
    %208 = vector.broadcast %207 : f32 to vector<16x32xf32>
    %209 = arith.mulf %208, %84 : vector<16x32xf32>
    %210 = arith.addf %206, %209 : vector<16x32xf32>
    %c7 = arith.constant 7 : index
    %211 = memref.load %arg2[%c7] : memref<144xf32, #tpu.memory_space<smem>>
    %212 = vector.broadcast %211 : f32 to vector<16x32xf32>
    %213 = arith.mulf %212, %85 : vector<16x32xf32>
    %214 = arith.addf %210, %213 : vector<16x32xf32>
    %c8 = arith.constant 8 : index
    %215 = memref.load %arg2[%c8] : memref<144xf32, #tpu.memory_space<smem>>
    %216 = vector.broadcast %215 : f32 to vector<16x32xf32>
    %217 = arith.mulf %216, %86 : vector<16x32xf32>
    %218 = arith.addf %214, %217 : vector<16x32xf32>
    %c15 = arith.constant 15 : index
    %219 = memref.load %arg2[%c15] : memref<144xf32, #tpu.memory_space<smem>>
    %220 = vector.broadcast %219 : f32 to vector<16x32xf32>
    %221 = arith.mulf %220, %89 : vector<16x32xf32>
    %222 = arith.addf %218, %221 : vector<16x32xf32>
    %c16 = arith.constant 16 : index
    %223 = memref.load %arg2[%c16] : memref<144xf32, #tpu.memory_space<smem>>
    %224 = vector.broadcast %223 : f32 to vector<16x32xf32>
    %225 = arith.mulf %224, %90 : vector<16x32xf32>
    %226 = arith.addf %222, %225 : vector<16x32xf32>
    %c17 = arith.constant 17 : index
    %227 = memref.load %arg2[%c17] : memref<144xf32, #tpu.memory_space<smem>>
    %228 = vector.broadcast %227 : f32 to vector<16x32xf32>
    %229 = arith.mulf %228, %91 : vector<16x32xf32>
    %230 = arith.addf %226, %229 : vector<16x32xf32>
    %c24 = arith.constant 24 : index
    %231 = memref.load %arg2[%c24] : memref<144xf32, #tpu.memory_space<smem>>
    %232 = vector.broadcast %231 : f32 to vector<16x32xf32>
    %233 = arith.mulf %232, %94 : vector<16x32xf32>
    %234 = arith.addf %230, %233 : vector<16x32xf32>
    %c25 = arith.constant 25 : index
    %235 = memref.load %arg2[%c25] : memref<144xf32, #tpu.memory_space<smem>>
    %236 = vector.broadcast %235 : f32 to vector<16x32xf32>
    %237 = arith.mulf %236, %95 : vector<16x32xf32>
    %238 = arith.addf %234, %237 : vector<16x32xf32>
    %c26 = arith.constant 26 : index
    %239 = memref.load %arg2[%c26] : memref<144xf32, #tpu.memory_space<smem>>
    %240 = vector.broadcast %239 : f32 to vector<16x32xf32>
    %241 = arith.mulf %240, %96 : vector<16x32xf32>
    %242 = arith.addf %238, %241 : vector<16x32xf32>
    %c33 = arith.constant 33 : index
    %243 = memref.load %arg2[%c33] : memref<144xf32, #tpu.memory_space<smem>>
    %244 = vector.broadcast %243 : f32 to vector<16x32xf32>
    %245 = arith.mulf %244, %99 : vector<16x32xf32>
    %246 = arith.addf %242, %245 : vector<16x32xf32>
    %c34 = arith.constant 34 : index
    %247 = memref.load %arg2[%c34] : memref<144xf32, #tpu.memory_space<smem>>
    %248 = vector.broadcast %247 : f32 to vector<16x32xf32>
    %249 = arith.mulf %248, %100 : vector<16x32xf32>
    %250 = arith.addf %246, %249 : vector<16x32xf32>
    %c35 = arith.constant 35 : index
    %251 = memref.load %arg2[%c35] : memref<144xf32, #tpu.memory_space<smem>>
    %252 = vector.broadcast %251 : f32 to vector<16x32xf32>
    %253 = arith.mulf %252, %101 : vector<16x32xf32>
    %254 = arith.addf %250, %253 : vector<16x32xf32>
    %cst_53 = arith.constant dense<0.000000e+00> : vector<32x32xf32>
    %255 = tpu.matmul %81, %254, %cst_53 {dimension_numbers = #tpu.dot_dimension_numbers<[1], [0], [0], [1], [0, 0, 1, 1], [], []>, precision = #tpu.contract_precision<fp32>} : vector<32x16xf32>, vector<16x32xf32>, vector<32x32xf32> -> vector<32x32xf32>
    %256 = arith.addf %205, %255 : vector<32x32xf32>
    %c0_54 = arith.constant 0 : index
    %c0_55 = arith.constant 0 : index
    %c0_56 = arith.constant 0 : index
    %c0_57 = arith.constant 0 : index
    %257 = vector.load %arg4[%c0_54, %c0_55, %c0_56, %c0_57] : memref<1x4x32x32xf32, #tpu.memory_space<vmem>>, vector<1x1x32x32xf32>
    %258 = vector.shape_cast %257 : vector<1x1x32x32xf32> to vector<32x32xf32>
    %259 = vector.shape_cast %256 : vector<32x32xf32> to vector<1x1x32x32xf32>
    tpu.vector_store %arg4[%c0_54, %c0_55, %c0_56, %c0_57], %259 {strides = array<i32>} : memref<1x4x32x32xf32, #tpu.memory_space<vmem>>, vector<1x1x32x32xf32>,
    %c1_58 = arith.constant 1 : index
    %260 = memref.load %arg3[%c1_58] : memref<4xf32, #tpu.memory_space<smem>>
    %261 = vector.broadcast %260 : f32 to vector<32x32xf32>
    %cst_59 = arith.constant 0.000000e+00 : f32
    %262 = vector.broadcast %cst_59 : f32 to vector<16x32xf32>
    %c36 = arith.constant 36 : index
    %263 = memref.load %arg2[%c36] : memref<144xf32, #tpu.memory_space<smem>>
    %264 = vector.broadcast %263 : f32 to vector<16x32xf32>
    %265 = arith.mulf %264, %84 : vector<16x32xf32>
    %266 = arith.addf %262, %265 : vector<16x32xf32>
    %c37 = arith.constant 37 : index
    %267 = memref.load %arg2[%c37] : memref<144xf32, #tpu.memory_space<smem>>
    %268 = vector.broadcast %267 : f32 to vector<16x32xf32>
    %269 = arith.mulf %268, %85 : vector<16x32xf32>
    %270 = arith.addf %266, %269 : vector<16x32xf32>
    %c38 = arith.constant 38 : index
    %271 = memref.load %arg2[%c38] : memref<144xf32, #tpu.memory_space<smem>>
    %272 = vector.broadcast %271 : f32 to vector<16x32xf32>
    %273 = arith.mulf %272, %86 : vector<16x32xf32>
    %274 = arith.addf %270, %273 : vector<16x32xf32>
    %c45 = arith.constant 45 : index
    %275 = memref.load %arg2[%c45] : memref<144xf32, #tpu.memory_space<smem>>
    %276 = vector.broadcast %275 : f32 to vector<16x32xf32>
    %277 = arith.mulf %276, %89 : vector<16x32xf32>
    %278 = arith.addf %274, %277 : vector<16x32xf32>
    %c46 = arith.constant 46 : index
    %279 = memref.load %arg2[%c46] : memref<144xf32, #tpu.memory_space<smem>>
    %280 = vector.broadcast %279 : f32 to vector<16x32xf32>
    %281 = arith.mulf %280, %90 : vector<16x32xf32>
    %282 = arith.addf %278, %281 : vector<16x32xf32>
    %c47 = arith.constant 47 : index
    %283 = memref.load %arg2[%c47] : memref<144xf32, #tpu.memory_space<smem>>
    %284 = vector.broadcast %283 : f32 to vector<16x32xf32>
    %285 = arith.mulf %284, %91 : vector<16x32xf32>
    %286 = arith.addf %282, %285 : vector<16x32xf32>
    %c54 = arith.constant 54 : index
    %287 = memref.load %arg2[%c54] : memref<144xf32, #tpu.memory_space<smem>>
    %288 = vector.broadcast %287 : f32 to vector<16x32xf32>
    %289 = arith.mulf %288, %94 : vector<16x32xf32>
    %290 = arith.addf %286, %289 : vector<16x32xf32>
    %c55 = arith.constant 55 : index
    %291 = memref.load %arg2[%c55] : memref<144xf32, #tpu.memory_space<smem>>
    %292 = vector.broadcast %291 : f32 to vector<16x32xf32>
    %293 = arith.mulf %292, %95 : vector<16x32xf32>
    %294 = arith.addf %290, %293 : vector<16x32xf32>
    %c56 = arith.constant 56 : index
    %295 = memref.load %arg2[%c56] : memref<144xf32, #tpu.memory_space<smem>>
    %296 = vector.broadcast %295 : f32 to vector<16x32xf32>
    %297 = arith.mulf %296, %96 : vector<16x32xf32>
    %298 = arith.addf %294, %297 : vector<16x32xf32>
    %c63 = arith.constant 63 : index
    %299 = memref.load %arg2[%c63] : memref<144xf32, #tpu.memory_space<smem>>
    %300 = vector.broadcast %299 : f32 to vector<16x32xf32>
    %301 = arith.mulf %300, %99 : vector<16x32xf32>
    %302 = arith.addf %298, %301 : vector<16x32xf32>
    %c64 = arith.constant 64 : index
    %303 = memref.load %arg2[%c64] : memref<144xf32, #tpu.memory_space<smem>>
    %304 = vector.broadcast %303 : f32 to vector<16x32xf32>
    %305 = arith.mulf %304, %100 : vector<16x32xf32>
    %306 = arith.addf %302, %305 : vector<16x32xf32>
    %c65 = arith.constant 65 : index
    %307 = memref.load %arg2[%c65] : memref<144xf32, #tpu.memory_space<smem>>
    %308 = vector.broadcast %307 : f32 to vector<16x32xf32>
    %309 = arith.mulf %308, %101 : vector<16x32xf32>
    %310 = arith.addf %306, %309 : vector<16x32xf32>
    %cst_60 = arith.constant dense<0.000000e+00> : vector<32x32xf32>
    %311 = tpu.matmul %29, %310, %cst_60 {dimension_numbers = #tpu.dot_dimension_numbers<[1], [0], [0], [1], [0, 0, 1, 1], [], []>, precision = #tpu.contract_precision<fp32>} : vector<32x16xf32>, vector<16x32xf32>, vector<32x32xf32> -> vector<32x32xf32>
    %312 = arith.addf %261, %311 : vector<32x32xf32>
    %cst_61 = arith.constant 0.000000e+00 : f32
    %313 = vector.broadcast %cst_61 : f32 to vector<16x32xf32>
    %c39 = arith.constant 39 : index
    %314 = memref.load %arg2[%c39] : memref<144xf32, #tpu.memory_space<smem>>
    %315 = vector.broadcast %314 : f32 to vector<16x32xf32>
    %316 = arith.mulf %315, %84 : vector<16x32xf32>
    %317 = arith.addf %313, %316 : vector<16x32xf32>
    %c40 = arith.constant 40 : index
    %318 = memref.load %arg2[%c40] : memref<144xf32, #tpu.memory_space<smem>>
    %319 = vector.broadcast %318 : f32 to vector<16x32xf32>
    %320 = arith.mulf %319, %85 : vector<16x32xf32>
    %321 = arith.addf %317, %320 : vector<16x32xf32>
    %c41 = arith.constant 41 : index
    %322 = memref.load %arg2[%c41] : memref<144xf32, #tpu.memory_space<smem>>
    %323 = vector.broadcast %322 : f32 to vector<16x32xf32>
    %324 = arith.mulf %323, %86 : vector<16x32xf32>
    %325 = arith.addf %321, %324 : vector<16x32xf32>
    %c48 = arith.constant 48 : index
    %326 = memref.load %arg2[%c48] : memref<144xf32, #tpu.memory_space<smem>>
    %327 = vector.broadcast %326 : f32 to vector<16x32xf32>
    %328 = arith.mulf %327, %89 : vector<16x32xf32>
    %329 = arith.addf %325, %328 : vector<16x32xf32>
    %c49 = arith.constant 49 : index
    %330 = memref.load %arg2[%c49] : memref<144xf32, #tpu.memory_space<smem>>
    %331 = vector.broadcast %330 : f32 to vector<16x32xf32>
    %332 = arith.mulf %331, %90 : vector<16x32xf32>
    %333 = arith.addf %329, %332 : vector<16x32xf32>
    %c50 = arith.constant 50 : index
    %334 = memref.load %arg2[%c50] : memref<144xf32, #tpu.memory_space<smem>>
    %335 = vector.broadcast %334 : f32 to vector<16x32xf32>
    %336 = arith.mulf %335, %91 : vector<16x32xf32>
    %337 = arith.addf %333, %336 : vector<16x32xf32>
    %c57 = arith.constant 57 : index
    %338 = memref.load %arg2[%c57] : memref<144xf32, #tpu.memory_space<smem>>
    %339 = vector.broadcast %338 : f32 to vector<16x32xf32>
    %340 = arith.mulf %339, %94 : vector<16x32xf32>
    %341 = arith.addf %337, %340 : vector<16x32xf32>
    %c58 = arith.constant 58 : index
    %342 = memref.load %arg2[%c58] : memref<144xf32, #tpu.memory_space<smem>>
    %343 = vector.broadcast %342 : f32 to vector<16x32xf32>
    %344 = arith.mulf %343, %95 : vector<16x32xf32>
    %345 = arith.addf %341, %344 : vector<16x32xf32>
    %c59 = arith.constant 59 : index
    %346 = memref.load %arg2[%c59] : memref<144xf32, #tpu.memory_space<smem>>
    %347 = vector.broadcast %346 : f32 to vector<16x32xf32>
    %348 = arith.mulf %347, %96 : vector<16x32xf32>
    %349 = arith.addf %345, %348 : vector<16x32xf32>
    %c66 = arith.constant 66 : index
    %350 = memref.load %arg2[%c66] : memref<144xf32, #tpu.memory_space<smem>>
    %351 = vector.broadcast %350 : f32 to vector<16x32xf32>
    %352 = arith.mulf %351, %99 : vector<16x32xf32>
    %353 = arith.addf %349, %352 : vector<16x32xf32>
    %c67 = arith.constant 67 : index
    %354 = memref.load %arg2[%c67] : memref<144xf32, #tpu.memory_space<smem>>
    %355 = vector.broadcast %354 : f32 to vector<16x32xf32>
    %356 = arith.mulf %355, %100 : vector<16x32xf32>
    %357 = arith.addf %353, %356 : vector<16x32xf32>
    %c68 = arith.constant 68 : index
    %358 = memref.load %arg2[%c68] : memref<144xf32, #tpu.memory_space<smem>>
    %359 = vector.broadcast %358 : f32 to vector<16x32xf32>
    %360 = arith.mulf %359, %101 : vector<16x32xf32>
    %361 = arith.addf %357, %360 : vector<16x32xf32>
    %cst_62 = arith.constant dense<0.000000e+00> : vector<32x32xf32>
    %362 = tpu.matmul %55, %361, %cst_62 {dimension_numbers = #tpu.dot_dimension_numbers<[1], [0], [0], [1], [0, 0, 1, 1], [], []>, precision = #tpu.contract_precision<fp32>} : vector<32x16xf32>, vector<16x32xf32>, vector<32x32xf32> -> vector<32x32xf32>
    %363 = arith.addf %312, %362 : vector<32x32xf32>
    %cst_63 = arith.constant 0.000000e+00 : f32
    %364 = vector.broadcast %cst_63 : f32 to vector<16x32xf32>
    %c42 = arith.constant 42 : index
    %365 = memref.load %arg2[%c42] : memref<144xf32, #tpu.memory_space<smem>>
    %366 = vector.broadcast %365 : f32 to vector<16x32xf32>
    %367 = arith.mulf %366, %84 : vector<16x32xf32>
    %368 = arith.addf %364, %367 : vector<16x32xf32>
    %c43 = arith.constant 43 : index
    %369 = memref.load %arg2[%c43] : memref<144xf32, #tpu.memory_space<smem>>
    %370 = vector.broadcast %369 : f32 to vector<16x32xf32>
    %371 = arith.mulf %370, %85 : vector<16x32xf32>
    %372 = arith.addf %368, %371 : vector<16x32xf32>
    %c44 = arith.constant 44 : index
    %373 = memref.load %arg2[%c44] : memref<144xf32, #tpu.memory_space<smem>>
    %374 = vector.broadcast %373 : f32 to vector<16x32xf32>
    %375 = arith.mulf %374, %86 : vector<16x32xf32>
    %376 = arith.addf %372, %375 : vector<16x32xf32>
    %c51 = arith.constant 51 : index
    %377 = memref.load %arg2[%c51] : memref<144xf32, #tpu.memory_space<smem>>
    %378 = vector.broadcast %377 : f32 to vector<16x32xf32>
    %379 = arith.mulf %378, %89 : vector<16x32xf32>
    %380 = arith.addf %376, %379 : vector<16x32xf32>
    %c52 = arith.constant 52 : index
    %381 = memref.load %arg2[%c52] : memref<144xf32, #tpu.memory_space<smem>>
    %382 = vector.broadcast %381 : f32 to vector<16x32xf32>
    %383 = arith.mulf %382, %90 : vector<16x32xf32>
    %384 = arith.addf %380, %383 : vector<16x32xf32>
    %c53 = arith.constant 53 : index
    %385 = memref.load %arg2[%c53] : memref<144xf32, #tpu.memory_space<smem>>
    %386 = vector.broadcast %385 : f32 to vector<16x32xf32>
    %387 = arith.mulf %386, %91 : vector<16x32xf32>
    %388 = arith.addf %384, %387 : vector<16x32xf32>
    %c60 = arith.constant 60 : index
    %389 = memref.load %arg2[%c60] : memref<144xf32, #tpu.memory_space<smem>>
    %390 = vector.broadcast %389 : f32 to vector<16x32xf32>
    %391 = arith.mulf %390, %94 : vector<16x32xf32>
    %392 = arith.addf %388, %391 : vector<16x32xf32>
    %c61 = arith.constant 61 : index
    %393 = memref.load %arg2[%c61] : memref<144xf32, #tpu.memory_space<smem>>
    %394 = vector.broadcast %393 : f32 to vector<16x32xf32>
    %395 = arith.mulf %394, %95 : vector<16x32xf32>
    %396 = arith.addf %392, %395 : vector<16x32xf32>
    %c62 = arith.constant 62 : index
    %397 = memref.load %arg2[%c62] : memref<144xf32, #tpu.memory_space<smem>>
    %398 = vector.broadcast %397 : f32 to vector<16x32xf32>
    %399 = arith.mulf %398, %96 : vector<16x32xf32>
    %400 = arith.addf %396, %399 : vector<16x32xf32>
    %c69 = arith.constant 69 : index
    %401 = memref.load %arg2[%c69] : memref<144xf32, #tpu.memory_space<smem>>
    %402 = vector.broadcast %401 : f32 to vector<16x32xf32>
    %403 = arith.mulf %402, %99 : vector<16x32xf32>
    %404 = arith.addf %400, %403 : vector<16x32xf32>
    %c70 = arith.constant 70 : index
    %405 = memref.load %arg2[%c70] : memref<144xf32, #tpu.memory_space<smem>>
    %406 = vector.broadcast %405 : f32 to vector<16x32xf32>
    %407 = arith.mulf %406, %100 : vector<16x32xf32>
    %408 = arith.addf %404, %407 : vector<16x32xf32>
    %c71 = arith.constant 71 : index
    %409 = memref.load %arg2[%c71] : memref<144xf32, #tpu.memory_space<smem>>
    %410 = vector.broadcast %409 : f32 to vector<16x32xf32>
    %411 = arith.mulf %410, %101 : vector<16x32xf32>
    %412 = arith.addf %408, %411 : vector<16x32xf32>
    %cst_64 = arith.constant dense<0.000000e+00> : vector<32x32xf32>
    %413 = tpu.matmul %81, %412, %cst_64 {dimension_numbers = #tpu.dot_dimension_numbers<[1], [0], [0], [1], [0, 0, 1, 1], [], []>, precision = #tpu.contract_precision<fp32>} : vector<32x16xf32>, vector<16x32xf32>, vector<32x32xf32> -> vector<32x32xf32>
    %414 = arith.addf %363, %413 : vector<32x32xf32>
    %c0_65 = arith.constant 0 : index
    %c1_66 = arith.constant 1 : index
    %c0_67 = arith.constant 0 : index
    %c0_68 = arith.constant 0 : index
    %415 = vector.load %arg4[%c0_65, %c1_66, %c0_67, %c0_68] : memref<1x4x32x32xf32, #tpu.memory_space<vmem>>, vector<1x1x32x32xf32>
    %416 = vector.shape_cast %415 : vector<1x1x32x32xf32> to vector<32x32xf32>
    %417 = vector.shape_cast %414 : vector<32x32xf32> to vector<1x1x32x32xf32>
    tpu.vector_store %arg4[%c0_65, %c1_66, %c0_67, %c0_68], %417 {strides = array<i32>} : memref<1x4x32x32xf32, #tpu.memory_space<vmem>>, vector<1x1x32x32xf32>,
    %c2_69 = arith.constant 2 : index
    %418 = memref.load %arg3[%c2_69] : memref<4xf32, #tpu.memory_space<smem>>
    %419 = vector.broadcast %418 : f32 to vector<32x32xf32>
    %cst_70 = arith.constant 0.000000e+00 : f32
    %420 = vector.broadcast %cst_70 : f32 to vector<16x32xf32>
    %c72 = arith.constant 72 : index
    %421 = memref.load %arg2[%c72] : memref<144xf32, #tpu.memory_space<smem>>
    %422 = vector.broadcast %421 : f32 to vector<16x32xf32>
    %423 = arith.mulf %422, %84 : vector<16x32xf32>
    %424 = arith.addf %420, %423 : vector<16x32xf32>
    %c73 = arith.constant 73 : index
    %425 = memref.load %arg2[%c73] : memref<144xf32, #tpu.memory_space<smem>>
    %426 = vector.broadcast %425 : f32 to vector<16x32xf32>
    %427 = arith.mulf %426, %85 : vector<16x32xf32>
    %428 = arith.addf %424, %427 : vector<16x32xf32>
    %c74 = arith.constant 74 : index
    %429 = memref.load %arg2[%c74] : memref<144xf32, #tpu.memory_space<smem>>
    %430 = vector.broadcast %429 : f32 to vector<16x32xf32>
    %431 = arith.mulf %430, %86 : vector<16x32xf32>
    %432 = arith.addf %428, %431 : vector<16x32xf32>
    %c81 = arith.constant 81 : index
    %433 = memref.load %arg2[%c81] : memref<144xf32, #tpu.memory_space<smem>>
    %434 = vector.broadcast %433 : f32 to vector<16x32xf32>
    %435 = arith.mulf %434, %89 : vector<16x32xf32>
    %436 = arith.addf %432, %435 : vector<16x32xf32>
    %c82 = arith.constant 82 : index
    %437 = memref.load %arg2[%c82] : memref<144xf32, #tpu.memory_space<smem>>
    %438 = vector.broadcast %437 : f32 to vector<16x32xf32>
    %439 = arith.mulf %438, %90 : vector<16x32xf32>
    %440 = arith.addf %436, %439 : vector<16x32xf32>
    %c83 = arith.constant 83 : index
    %441 = memref.load %arg2[%c83] : memref<144xf32, #tpu.memory_space<smem>>
    %442 = vector.broadcast %441 : f32 to vector<16x32xf32>
    %443 = arith.mulf %442, %91 : vector<16x32xf32>
    %444 = arith.addf %440, %443 : vector<16x32xf32>
    %c90 = arith.constant 90 : index
    %445 = memref.load %arg2[%c90] : memref<144xf32, #tpu.memory_space<smem>>
    %446 = vector.broadcast %445 : f32 to vector<16x32xf32>
    %447 = arith.mulf %446, %94 : vector<16x32xf32>
    %448 = arith.addf %444, %447 : vector<16x32xf32>
    %c91 = arith.constant 91 : index
    %449 = memref.load %arg2[%c91] : memref<144xf32, #tpu.memory_space<smem>>
    %450 = vector.broadcast %449 : f32 to vector<16x32xf32>
    %451 = arith.mulf %450, %95 : vector<16x32xf32>
    %452 = arith.addf %448, %451 : vector<16x32xf32>
    %c92 = arith.constant 92 : index
    %453 = memref.load %arg2[%c92] : memref<144xf32, #tpu.memory_space<smem>>
    %454 = vector.broadcast %453 : f32 to vector<16x32xf32>
    %455 = arith.mulf %454, %96 : vector<16x32xf32>
    %456 = arith.addf %452, %455 : vector<16x32xf32>
    %c99 = arith.constant 99 : index
    %457 = memref.load %arg2[%c99] : memref<144xf32, #tpu.memory_space<smem>>
    %458 = vector.broadcast %457 : f32 to vector<16x32xf32>
    %459 = arith.mulf %458, %99 : vector<16x32xf32>
    %460 = arith.addf %456, %459 : vector<16x32xf32>
    %c100 = arith.constant 100 : index
    %461 = memref.load %arg2[%c100] : memref<144xf32, #tpu.memory_space<smem>>
    %462 = vector.broadcast %461 : f32 to vector<16x32xf32>
    %463 = arith.mulf %462, %100 : vector<16x32xf32>
    %464 = arith.addf %460, %463 : vector<16x32xf32>
    %c101 = arith.constant 101 : index
    %465 = memref.load %arg2[%c101] : memref<144xf32, #tpu.memory_space<smem>>
    %466 = vector.broadcast %465 : f32 to vector<16x32xf32>
    %467 = arith.mulf %466, %101 : vector<16x32xf32>
    %468 = arith.addf %464, %467 : vector<16x32xf32>
    %cst_71 = arith.constant dense<0.000000e+00> : vector<32x32xf32>
    %469 = tpu.matmul %29, %468, %cst_71 {dimension_numbers = #tpu.dot_dimension_numbers<[1], [0], [0], [1], [0, 0, 1, 1], [], []>, precision = #tpu.contract_precision<fp32>} : vector<32x16xf32>, vector<16x32xf32>, vector<32x32xf32> -> vector<32x32xf32>
    %470 = arith.addf %419, %469 : vector<32x32xf32>
    %cst_72 = arith.constant 0.000000e+00 : f32
    %471 = vector.broadcast %cst_72 : f32 to vector<16x32xf32>
    %c75 = arith.constant 75 : index
    %472 = memref.load %arg2[%c75] : memref<144xf32, #tpu.memory_space<smem>>
    %473 = vector.broadcast %472 : f32 to vector<16x32xf32>
    %474 = arith.mulf %473, %84 : vector<16x32xf32>
    %475 = arith.addf %471, %474 : vector<16x32xf32>
    %c76 = arith.constant 76 : index
    %476 = memref.load %arg2[%c76] : memref<144xf32, #tpu.memory_space<smem>>
    %477 = vector.broadcast %476 : f32 to vector<16x32xf32>
    %478 = arith.mulf %477, %85 : vector<16x32xf32>
    %479 = arith.addf %475, %478 : vector<16x32xf32>
    %c77 = arith.constant 77 : index
    %480 = memref.load %arg2[%c77] : memref<144xf32, #tpu.memory_space<smem>>
    %481 = vector.broadcast %480 : f32 to vector<16x32xf32>
    %482 = arith.mulf %481, %86 : vector<16x32xf32>
    %483 = arith.addf %479, %482 : vector<16x32xf32>
    %c84 = arith.constant 84 : index
    %484 = memref.load %arg2[%c84] : memref<144xf32, #tpu.memory_space<smem>>
    %485 = vector.broadcast %484 : f32 to vector<16x32xf32>
    %486 = arith.mulf %485, %89 : vector<16x32xf32>
    %487 = arith.addf %483, %486 : vector<16x32xf32>
    %c85 = arith.constant 85 : index
    %488 = memref.load %arg2[%c85] : memref<144xf32, #tpu.memory_space<smem>>
    %489 = vector.broadcast %488 : f32 to vector<16x32xf32>
    %490 = arith.mulf %489, %90 : vector<16x32xf32>
    %491 = arith.addf %487, %490 : vector<16x32xf32>
    %c86 = arith.constant 86 : index
    %492 = memref.load %arg2[%c86] : memref<144xf32, #tpu.memory_space<smem>>
    %493 = vector.broadcast %492 : f32 to vector<16x32xf32>
    %494 = arith.mulf %493, %91 : vector<16x32xf32>
    %495 = arith.addf %491, %494 : vector<16x32xf32>
    %c93 = arith.constant 93 : index
    %496 = memref.load %arg2[%c93] : memref<144xf32, #tpu.memory_space<smem>>
    %497 = vector.broadcast %496 : f32 to vector<16x32xf32>
    %498 = arith.mulf %497, %94 : vector<16x32xf32>
    %499 = arith.addf %495, %498 : vector<16x32xf32>
    %c94 = arith.constant 94 : index
    %500 = memref.load %arg2[%c94] : memref<144xf32, #tpu.memory_space<smem>>
    %501 = vector.broadcast %500 : f32 to vector<16x32xf32>
    %502 = arith.mulf %501, %95 : vector<16x32xf32>
    %503 = arith.addf %499, %502 : vector<16x32xf32>
    %c95 = arith.constant 95 : index
    %504 = memref.load %arg2[%c95] : memref<144xf32, #tpu.memory_space<smem>>
    %505 = vector.broadcast %504 : f32 to vector<16x32xf32>
    %506 = arith.mulf %505, %96 : vector<16x32xf32>
    %507 = arith.addf %503, %506 : vector<16x32xf32>
    %c102 = arith.constant 102 : index
    %508 = memref.load %arg2[%c102] : memref<144xf32, #tpu.memory_space<smem>>
    %509 = vector.broadcast %508 : f32 to vector<16x32xf32>
    %510 = arith.mulf %509, %99 : vector<16x32xf32>
    %511 = arith.addf %507, %510 : vector<16x32xf32>
    %c103 = arith.constant 103 : index
    %512 = memref.load %arg2[%c103] : memref<144xf32, #tpu.memory_space<smem>>
    %513 = vector.broadcast %512 : f32 to vector<16x32xf32>
    %514 = arith.mulf %513, %100 : vector<16x32xf32>
    %515 = arith.addf %511, %514 : vector<16x32xf32>
    %c104 = arith.constant 104 : index
    %516 = memref.load %arg2[%c104] : memref<144xf32, #tpu.memory_space<smem>>
    %517 = vector.broadcast %516 : f32 to vector<16x32xf32>
    %518 = arith.mulf %517, %101 : vector<16x32xf32>
    %519 = arith.addf %515, %518 : vector<16x32xf32>
    %cst_73 = arith.constant dense<0.000000e+00> : vector<32x32xf32>
    %520 = tpu.matmul %55, %519, %cst_73 {dimension_numbers = #tpu.dot_dimension_numbers<[1], [0], [0], [1], [0, 0, 1, 1], [], []>, precision = #tpu.contract_precision<fp32>} : vector<32x16xf32>, vector<16x32xf32>, vector<32x32xf32> -> vector<32x32xf32>
    %521 = arith.addf %470, %520 : vector<32x32xf32>
    %cst_74 = arith.constant 0.000000e+00 : f32
    %522 = vector.broadcast %cst_74 : f32 to vector<16x32xf32>
    %c78 = arith.constant 78 : index
    %523 = memref.load %arg2[%c78] : memref<144xf32, #tpu.memory_space<smem>>
    %524 = vector.broadcast %523 : f32 to vector<16x32xf32>
    %525 = arith.mulf %524, %84 : vector<16x32xf32>
    %526 = arith.addf %522, %525 : vector<16x32xf32>
    %c79 = arith.constant 79 : index
    %527 = memref.load %arg2[%c79] : memref<144xf32, #tpu.memory_space<smem>>
    %528 = vector.broadcast %527 : f32 to vector<16x32xf32>
    %529 = arith.mulf %528, %85 : vector<16x32xf32>
    %530 = arith.addf %526, %529 : vector<16x32xf32>
    %c80 = arith.constant 80 : index
    %531 = memref.load %arg2[%c80] : memref<144xf32, #tpu.memory_space<smem>>
    %532 = vector.broadcast %531 : f32 to vector<16x32xf32>
    %533 = arith.mulf %532, %86 : vector<16x32xf32>
    %534 = arith.addf %530, %533 : vector<16x32xf32>
    %c87 = arith.constant 87 : index
    %535 = memref.load %arg2[%c87] : memref<144xf32, #tpu.memory_space<smem>>
    %536 = vector.broadcast %535 : f32 to vector<16x32xf32>
    %537 = arith.mulf %536, %89 : vector<16x32xf32>
    %538 = arith.addf %534, %537 : vector<16x32xf32>
    %c88 = arith.constant 88 : index
    %539 = memref.load %arg2[%c88] : memref<144xf32, #tpu.memory_space<smem>>
    %540 = vector.broadcast %539 : f32 to vector<16x32xf32>
    %541 = arith.mulf %540, %90 : vector<16x32xf32>
    %542 = arith.addf %538, %541 : vector<16x32xf32>
    %c89 = arith.constant 89 : index
    %543 = memref.load %arg2[%c89] : memref<144xf32, #tpu.memory_space<smem>>
    %544 = vector.broadcast %543 : f32 to vector<16x32xf32>
    %545 = arith.mulf %544, %91 : vector<16x32xf32>
    %546 = arith.addf %542, %545 : vector<16x32xf32>
    %c96 = arith.constant 96 : index
    %547 = memref.load %arg2[%c96] : memref<144xf32, #tpu.memory_space<smem>>
    %548 = vector.broadcast %547 : f32 to vector<16x32xf32>
    %549 = arith.mulf %548, %94 : vector<16x32xf32>
    %550 = arith.addf %546, %549 : vector<16x32xf32>
    %c97 = arith.constant 97 : index
    %551 = memref.load %arg2[%c97] : memref<144xf32, #tpu.memory_space<smem>>
    %552 = vector.broadcast %551 : f32 to vector<16x32xf32>
    %553 = arith.mulf %552, %95 : vector<16x32xf32>
    %554 = arith.addf %550, %553 : vector<16x32xf32>
    %c98 = arith.constant 98 : index
    %555 = memref.load %arg2[%c98] : memref<144xf32, #tpu.memory_space<smem>>
    %556 = vector.broadcast %555 : f32 to vector<16x32xf32>
    %557 = arith.mulf %556, %96 : vector<16x32xf32>
    %558 = arith.addf %554, %557 : vector<16x32xf32>
    %c105 = arith.constant 105 : index
    %559 = memref.load %arg2[%c105] : memref<144xf32, #tpu.memory_space<smem>>
    %560 = vector.broadcast %559 : f32 to vector<16x32xf32>
    %561 = arith.mulf %560, %99 : vector<16x32xf32>
    %562 = arith.addf %558, %561 : vector<16x32xf32>
    %c106 = arith.constant 106 : index
    %563 = memref.load %arg2[%c106] : memref<144xf32, #tpu.memory_space<smem>>
    %564 = vector.broadcast %563 : f32 to vector<16x32xf32>
    %565 = arith.mulf %564, %100 : vector<16x32xf32>
    %566 = arith.addf %562, %565 : vector<16x32xf32>
    %c107 = arith.constant 107 : index
    %567 = memref.load %arg2[%c107] : memref<144xf32, #tpu.memory_space<smem>>
    %568 = vector.broadcast %567 : f32 to vector<16x32xf32>
    %569 = arith.mulf %568, %101 : vector<16x32xf32>
    %570 = arith.addf %566, %569 : vector<16x32xf32>
    %cst_75 = arith.constant dense<0.000000e+00> : vector<32x32xf32>
    %571 = tpu.matmul %81, %570, %cst_75 {dimension_numbers = #tpu.dot_dimension_numbers<[1], [0], [0], [1], [0, 0, 1, 1], [], []>, precision = #tpu.contract_precision<fp32>} : vector<32x16xf32>, vector<16x32xf32>, vector<32x32xf32> -> vector<32x32xf32>
    %572 = arith.addf %521, %571 : vector<32x32xf32>
    %c0_76 = arith.constant 0 : index
    %c2_77 = arith.constant 2 : index
    %c0_78 = arith.constant 0 : index
    %c0_79 = arith.constant 0 : index
    %573 = vector.load %arg4[%c0_76, %c2_77, %c0_78, %c0_79] : memref<1x4x32x32xf32, #tpu.memory_space<vmem>>, vector<1x1x32x32xf32>
    %574 = vector.shape_cast %573 : vector<1x1x32x32xf32> to vector<32x32xf32>
    %575 = vector.shape_cast %572 : vector<32x32xf32> to vector<1x1x32x32xf32>
    tpu.vector_store %arg4[%c0_76, %c2_77, %c0_78, %c0_79], %575 {strides = array<i32>} : memref<1x4x32x32xf32, #tpu.memory_space<vmem>>, vector<1x1x32x32xf32>,
    %c3_80 = arith.constant 3 : index
    %576 = memref.load %arg3[%c3_80] : memref<4xf32, #tpu.memory_space<smem>>
    %577 = vector.broadcast %576 : f32 to vector<32x32xf32>
    %cst_81 = arith.constant 0.000000e+00 : f32
    %578 = vector.broadcast %cst_81 : f32 to vector<16x32xf32>
    %c108 = arith.constant 108 : index
    %579 = memref.load %arg2[%c108] : memref<144xf32, #tpu.memory_space<smem>>
    %580 = vector.broadcast %579 : f32 to vector<16x32xf32>
    %581 = arith.mulf %580, %84 : vector<16x32xf32>
    %582 = arith.addf %578, %581 : vector<16x32xf32>
    %c109 = arith.constant 109 : index
    %583 = memref.load %arg2[%c109] : memref<144xf32, #tpu.memory_space<smem>>
    %584 = vector.broadcast %583 : f32 to vector<16x32xf32>
    %585 = arith.mulf %584, %85 : vector<16x32xf32>
    %586 = arith.addf %582, %585 : vector<16x32xf32>
    %c110 = arith.constant 110 : index
    %587 = memref.load %arg2[%c110] : memref<144xf32, #tpu.memory_space<smem>>
    %588 = vector.broadcast %587 : f32 to vector<16x32xf32>
    %589 = arith.mulf %588, %86 : vector<16x32xf32>
    %590 = arith.addf %586, %589 : vector<16x32xf32>
    %c117 = arith.constant 117 : index
    %591 = memref.load %arg2[%c117] : memref<144xf32, #tpu.memory_space<smem>>
    %592 = vector.broadcast %591 : f32 to vector<16x32xf32>
    %593 = arith.mulf %592, %89 : vector<16x32xf32>
    %594 = arith.addf %590, %593 : vector<16x32xf32>
    %c118 = arith.constant 118 : index
    %595 = memref.load %arg2[%c118] : memref<144xf32, #tpu.memory_space<smem>>
    %596 = vector.broadcast %595 : f32 to vector<16x32xf32>
    %597 = arith.mulf %596, %90 : vector<16x32xf32>
    %598 = arith.addf %594, %597 : vector<16x32xf32>
    %c119 = arith.constant 119 : index
    %599 = memref.load %arg2[%c119] : memref<144xf32, #tpu.memory_space<smem>>
    %600 = vector.broadcast %599 : f32 to vector<16x32xf32>
    %601 = arith.mulf %600, %91 : vector<16x32xf32>
    %602 = arith.addf %598, %601 : vector<16x32xf32>
    %c126 = arith.constant 126 : index
    %603 = memref.load %arg2[%c126] : memref<144xf32, #tpu.memory_space<smem>>
    %604 = vector.broadcast %603 : f32 to vector<16x32xf32>
    %605 = arith.mulf %604, %94 : vector<16x32xf32>
    %606 = arith.addf %602, %605 : vector<16x32xf32>
    %c127 = arith.constant 127 : index
    %607 = memref.load %arg2[%c127] : memref<144xf32, #tpu.memory_space<smem>>
    %608 = vector.broadcast %607 : f32 to vector<16x32xf32>
    %609 = arith.mulf %608, %95 : vector<16x32xf32>
    %610 = arith.addf %606, %609 : vector<16x32xf32>
    %c128 = arith.constant 128 : index
    %611 = memref.load %arg2[%c128] : memref<144xf32, #tpu.memory_space<smem>>
    %612 = vector.broadcast %611 : f32 to vector<16x32xf32>
    %613 = arith.mulf %612, %96 : vector<16x32xf32>
    %614 = arith.addf %610, %613 : vector<16x32xf32>
    %c135 = arith.constant 135 : index
    %615 = memref.load %arg2[%c135] : memref<144xf32, #tpu.memory_space<smem>>
    %616 = vector.broadcast %615 : f32 to vector<16x32xf32>
    %617 = arith.mulf %616, %99 : vector<16x32xf32>
    %618 = arith.addf %614, %617 : vector<16x32xf32>
    %c136 = arith.constant 136 : index
    %619 = memref.load %arg2[%c136] : memref<144xf32, #tpu.memory_space<smem>>
    %620 = vector.broadcast %619 : f32 to vector<16x32xf32>
    %621 = arith.mulf %620, %100 : vector<16x32xf32>
    %622 = arith.addf %618, %621 : vector<16x32xf32>
    %c137 = arith.constant 137 : index
    %623 = memref.load %arg2[%c137] : memref<144xf32, #tpu.memory_space<smem>>
    %624 = vector.broadcast %623 : f32 to vector<16x32xf32>
    %625 = arith.mulf %624, %101 : vector<16x32xf32>
    %626 = arith.addf %622, %625 : vector<16x32xf32>
    %cst_82 = arith.constant dense<0.000000e+00> : vector<32x32xf32>
    %627 = tpu.matmul %29, %626, %cst_82 {dimension_numbers = #tpu.dot_dimension_numbers<[1], [0], [0], [1], [0, 0, 1, 1], [], []>, precision = #tpu.contract_precision<fp32>} : vector<32x16xf32>, vector<16x32xf32>, vector<32x32xf32> -> vector<32x32xf32>
    %628 = arith.addf %577, %627 : vector<32x32xf32>
    %cst_83 = arith.constant 0.000000e+00 : f32
    %629 = vector.broadcast %cst_83 : f32 to vector<16x32xf32>
    %c111 = arith.constant 111 : index
    %630 = memref.load %arg2[%c111] : memref<144xf32, #tpu.memory_space<smem>>
    %631 = vector.broadcast %630 : f32 to vector<16x32xf32>
    %632 = arith.mulf %631, %84 : vector<16x32xf32>
    %633 = arith.addf %629, %632 : vector<16x32xf32>
    %c112 = arith.constant 112 : index
    %634 = memref.load %arg2[%c112] : memref<144xf32, #tpu.memory_space<smem>>
    %635 = vector.broadcast %634 : f32 to vector<16x32xf32>
    %636 = arith.mulf %635, %85 : vector<16x32xf32>
    %637 = arith.addf %633, %636 : vector<16x32xf32>
    %c113 = arith.constant 113 : index
    %638 = memref.load %arg2[%c113] : memref<144xf32, #tpu.memory_space<smem>>
    %639 = vector.broadcast %638 : f32 to vector<16x32xf32>
    %640 = arith.mulf %639, %86 : vector<16x32xf32>
    %641 = arith.addf %637, %640 : vector<16x32xf32>
    %c120 = arith.constant 120 : index
    %642 = memref.load %arg2[%c120] : memref<144xf32, #tpu.memory_space<smem>>
    %643 = vector.broadcast %642 : f32 to vector<16x32xf32>
    %644 = arith.mulf %643, %89 : vector<16x32xf32>
    %645 = arith.addf %641, %644 : vector<16x32xf32>
    %c121 = arith.constant 121 : index
    %646 = memref.load %arg2[%c121] : memref<144xf32, #tpu.memory_space<smem>>
    %647 = vector.broadcast %646 : f32 to vector<16x32xf32>
    %648 = arith.mulf %647, %90 : vector<16x32xf32>
    %649 = arith.addf %645, %648 : vector<16x32xf32>
    %c122 = arith.constant 122 : index
    %650 = memref.load %arg2[%c122] : memref<144xf32, #tpu.memory_space<smem>>
    %651 = vector.broadcast %650 : f32 to vector<16x32xf32>
    %652 = arith.mulf %651, %91 : vector<16x32xf32>
    %653 = arith.addf %649, %652 : vector<16x32xf32>
    %c129 = arith.constant 129 : index
    %654 = memref.load %arg2[%c129] : memref<144xf32, #tpu.memory_space<smem>>
    %655 = vector.broadcast %654 : f32 to vector<16x32xf32>
    %656 = arith.mulf %655, %94 : vector<16x32xf32>
    %657 = arith.addf %653, %656 : vector<16x32xf32>
    %c130 = arith.constant 130 : index
    %658 = memref.load %arg2[%c130] : memref<144xf32, #tpu.memory_space<smem>>
    %659 = vector.broadcast %658 : f32 to vector<16x32xf32>
    %660 = arith.mulf %659, %95 : vector<16x32xf32>
    %661 = arith.addf %657, %660 : vector<16x32xf32>
    %c131 = arith.constant 131 : index
    %662 = memref.load %arg2[%c131] : memref<144xf32, #tpu.memory_space<smem>>
    %663 = vector.broadcast %662 : f32 to vector<16x32xf32>
    %664 = arith.mulf %663, %96 : vector<16x32xf32>
    %665 = arith.addf %661, %664 : vector<16x32xf32>
    %c138 = arith.constant 138 : index
    %666 = memref.load %arg2[%c138] : memref<144xf32, #tpu.memory_space<smem>>
    %667 = vector.broadcast %666 : f32 to vector<16x32xf32>
    %668 = arith.mulf %667, %99 : vector<16x32xf32>
    %669 = arith.addf %665, %668 : vector<16x32xf32>
    %c139 = arith.constant 139 : index
    %670 = memref.load %arg2[%c139] : memref<144xf32, #tpu.memory_space<smem>>
    %671 = vector.broadcast %670 : f32 to vector<16x32xf32>
    %672 = arith.mulf %671, %100 : vector<16x32xf32>
    %673 = arith.addf %669, %672 : vector<16x32xf32>
    %c140 = arith.constant 140 : index
    %674 = memref.load %arg2[%c140] : memref<144xf32, #tpu.memory_space<smem>>
    %675 = vector.broadcast %674 : f32 to vector<16x32xf32>
    %676 = arith.mulf %675, %101 : vector<16x32xf32>
    %677 = arith.addf %673, %676 : vector<16x32xf32>
    %cst_84 = arith.constant dense<0.000000e+00> : vector<32x32xf32>
    %678 = tpu.matmul %55, %677, %cst_84 {dimension_numbers = #tpu.dot_dimension_numbers<[1], [0], [0], [1], [0, 0, 1, 1], [], []>, precision = #tpu.contract_precision<fp32>} : vector<32x16xf32>, vector<16x32xf32>, vector<32x32xf32> -> vector<32x32xf32>
    %679 = arith.addf %628, %678 : vector<32x32xf32>
    %cst_85 = arith.constant 0.000000e+00 : f32
    %680 = vector.broadcast %cst_85 : f32 to vector<16x32xf32>
    %c114 = arith.constant 114 : index
    %681 = memref.load %arg2[%c114] : memref<144xf32, #tpu.memory_space<smem>>
    %682 = vector.broadcast %681 : f32 to vector<16x32xf32>
    %683 = arith.mulf %682, %84 : vector<16x32xf32>
    %684 = arith.addf %680, %683 : vector<16x32xf32>
    %c115 = arith.constant 115 : index
    %685 = memref.load %arg2[%c115] : memref<144xf32, #tpu.memory_space<smem>>
    %686 = vector.broadcast %685 : f32 to vector<16x32xf32>
    %687 = arith.mulf %686, %85 : vector<16x32xf32>
    %688 = arith.addf %684, %687 : vector<16x32xf32>
    %c116 = arith.constant 116 : index
    %689 = memref.load %arg2[%c116] : memref<144xf32, #tpu.memory_space<smem>>
    %690 = vector.broadcast %689 : f32 to vector<16x32xf32>
    %691 = arith.mulf %690, %86 : vector<16x32xf32>
    %692 = arith.addf %688, %691 : vector<16x32xf32>
    %c123 = arith.constant 123 : index
    %693 = memref.load %arg2[%c123] : memref<144xf32, #tpu.memory_space<smem>>
    %694 = vector.broadcast %693 : f32 to vector<16x32xf32>
    %695 = arith.mulf %694, %89 : vector<16x32xf32>
    %696 = arith.addf %692, %695 : vector<16x32xf32>
    %c124 = arith.constant 124 : index
    %697 = memref.load %arg2[%c124] : memref<144xf32, #tpu.memory_space<smem>>
    %698 = vector.broadcast %697 : f32 to vector<16x32xf32>
    %699 = arith.mulf %698, %90 : vector<16x32xf32>
    %700 = arith.addf %696, %699 : vector<16x32xf32>
    %c125 = arith.constant 125 : index
    %701 = memref.load %arg2[%c125] : memref<144xf32, #tpu.memory_space<smem>>
    %702 = vector.broadcast %701 : f32 to vector<16x32xf32>
    %703 = arith.mulf %702, %91 : vector<16x32xf32>
    %704 = arith.addf %700, %703 : vector<16x32xf32>
    %c132 = arith.constant 132 : index
    %705 = memref.load %arg2[%c132] : memref<144xf32, #tpu.memory_space<smem>>
    %706 = vector.broadcast %705 : f32 to vector<16x32xf32>
    %707 = arith.mulf %706, %94 : vector<16x32xf32>
    %708 = arith.addf %704, %707 : vector<16x32xf32>
    %c133 = arith.constant 133 : index
    %709 = memref.load %arg2[%c133] : memref<144xf32, #tpu.memory_space<smem>>
    %710 = vector.broadcast %709 : f32 to vector<16x32xf32>
    %711 = arith.mulf %710, %95 : vector<16x32xf32>
    %712 = arith.addf %708, %711 : vector<16x32xf32>
    %c134 = arith.constant 134 : index
    %713 = memref.load %arg2[%c134] : memref<144xf32, #tpu.memory_space<smem>>
    %714 = vector.broadcast %713 : f32 to vector<16x32xf32>
    %715 = arith.mulf %714, %96 : vector<16x32xf32>
    %716 = arith.addf %712, %715 : vector<16x32xf32>
    %c141 = arith.constant 141 : index
    %717 = memref.load %arg2[%c141] : memref<144xf32, #tpu.memory_space<smem>>
    %718 = vector.broadcast %717 : f32 to vector<16x32xf32>
    %719 = arith.mulf %718, %99 : vector<16x32xf32>
    %720 = arith.addf %716, %719 : vector<16x32xf32>
    %c142 = arith.constant 142 : index
    %721 = memref.load %arg2[%c142] : memref<144xf32, #tpu.memory_space<smem>>
    %722 = vector.broadcast %721 : f32 to vector<16x32xf32>
    %723 = arith.mulf %722, %100 : vector<16x32xf32>
    %724 = arith.addf %720, %723 : vector<16x32xf32>
    %c143 = arith.constant 143 : index
    %725 = memref.load %arg2[%c143] : memref<144xf32, #tpu.memory_space<smem>>
    %726 = vector.broadcast %725 : f32 to vector<16x32xf32>
    %727 = arith.mulf %726, %101 : vector<16x32xf32>
    %728 = arith.addf %724, %727 : vector<16x32xf32>
    %cst_86 = arith.constant dense<0.000000e+00> : vector<32x32xf32>
    %729 = tpu.matmul %81, %728, %cst_86 {dimension_numbers = #tpu.dot_dimension_numbers<[1], [0], [0], [1], [0, 0, 1, 1], [], []>, precision = #tpu.contract_precision<fp32>} : vector<32x16xf32>, vector<16x32xf32>, vector<32x32xf32> -> vector<32x32xf32>
    %730 = arith.addf %679, %729 : vector<32x32xf32>
    %c0_87 = arith.constant 0 : index
    %c3_88 = arith.constant 3 : index
    %c0_89 = arith.constant 0 : index
    %c0_90 = arith.constant 0 : index
    %731 = vector.load %arg4[%c0_87, %c3_88, %c0_89, %c0_90] : memref<1x4x32x32xf32, #tpu.memory_space<vmem>>, vector<1x1x32x32xf32>
    %732 = vector.shape_cast %731 : vector<1x1x32x32xf32> to vector<32x32xf32>
    %733 = vector.shape_cast %730 : vector<32x32xf32> to vector<1x1x32x32xf32>
    tpu.vector_store %arg4[%c0_87, %c3_88, %c0_89, %c0_90], %733 {strides = array<i32>} : memref<1x4x32x32xf32, #tpu.memory_space<vmem>>, vector<1x1x32x32xf32>,
    return
  }
  func.func @transform_0(%arg0: i32) -> (i32, i32, i32, i32) {
    %c0_i32 = arith.constant 0 : i32
    %c0_i32_0 = arith.constant 0 : i32
    %c0_i32_1 = arith.constant 0 : i32
    %c0_i32_2 = arith.constant 0 : i32
    return %arg0, %c0_i32, %c0_i32_0, %c0_i32_1 : i32, i32, i32, i32
  }
  func.func @transform_1(%arg0: i32) -> i32 {
    %c0_i32 = arith.constant 0 : i32
    %c0_i32_0 = arith.constant 0 : i32
    return %c0_i32 : i32
  }
  func.func @transform_2(%arg0: i32) -> i32 {
    %c0_i32 = arith.constant 0 : i32
    %c0_i32_0 = arith.constant 0 : i32
    return %c0_i32 : i32
  }
  func.func @transform_3(%arg0: i32) -> (i32, i32, i32, i32) {
    %c0_i32 = arith.constant 0 : i32
    %c0_i32_0 = arith.constant 0 : i32
    %c0_i32_1 = arith.constant 0 : i32
    %c0_i32_2 = arith.constant 0 : i32
    return %arg0, %c0_i32, %c0_i32_0, %c0_i32_1 : i32, i32, i32, i32
  }
}

</mosaic_0001>

<bundles_post_ra>
// kernel: tpu_custom_call.1
= control target key start
LH: loop header
LB: loop body
LE: loop exit
PB: predicated region body
PF: predicated region fallthrough
CT: control target
= control target key end

     0   :  { %s21230_s0 = inlined_call_operand.hbm [shape: f32[2,4,16,16], index: 0, kind: input, shape index: {}]   ;;  %s21231_s1 = inlined_call_operand.vmem [shape: f32[144], index: 1, kind: input, shape index: {}]   ;;  %s21232_s2 = inlined_call_operand.vmem [shape: f32[4], index: 2, kind: input, shape index: {}]   ;;  %s21233_s3 = inlined_call_operand.hbm [shape: f32[2,4,32,32], index: 3, kind: output, shape index: {}]  }
   0x1   :  { %21304 = sst [smem:[#allocation50_spill]] %s21230_s0 }
   0x2   :  { %21305 = sst [smem:[#allocation51_spill]] %s21231_s1 }
   0x3   :  { %21306 = sst [smem:[#allocation52_spill]] %s21232_s2 }
   0x4   :  { %8 = vsyncpa [#allocation3], 0 }
   0x5   :  { %10 = vsyncpa [#allocation3 + $0x1], 0 }
   0x6   :  { %11 = vsyncpa [#allocation5], 0 }
   0x7   :  { %12 = vsyncpa [#allocation8], 0 }
   0x8   :  { %13 = vsyncpa [#allocation4], 0 }
   0x9   :  { %15 = vsyncpa [#allocation4 + $0x1], 0  ;;  %s18115_s12 = smov 0   ;;  %s18117_s13 = smov 0  }
   0xa   :  { %s18119_s14 = smov 0   ;;  %s18121_s15 = smov 0  }
   0xb LB: > { %21307 = sst [smem:[#allocation14_spill]] %s18075_s13  ;;  %s18136_s16 = sadd.s32 4294967295, %s18083_s15   ;;  %s18083_s15 = sphi %s18121_s15, %s21503_s15   ;;  %s18079_s14 = sphi %s18119_s14, %s21506_s14   ;;  %s18075_s13 = sphi %s18117_s13, %s21505_s13   ;;  %s18071_s12 = sphi %s18115_s12, %s21504_s12  }
   0xc   : > { %21308 = sst [smem:[#allocation15_spill]] %s18079_s14  ;;  %s14530_s17 = sadd.s32 4294967294, %s18083_s15  }
   0xd   : > { %s18140_s18 = sadd.s32 1, %s18083_s15   ;;  %s28_s19 = sadd.s32 1, %s18079_s14 }
   0xe   : > { %21309 = sst [smem:[#allocation16_spill]] %s18140_s18  ;;  %s25_s20 = ssub.s32 %s18083_s15, %s18140_s18 }
   0xf   : > { %p35_p0 = scmp.ne.s32.totalorder %s18079_s14, %s18075_s13  ;;  %p26_p1 = scmp.eq.s32.totalorder %s25_s20, 0 }
  0x10   : > { %p36_p2 = scmp.eq.s32.totalorder %s18083_s15, 0  ;;  %p41_p3 = scmp.ne.s32.totalorder %s18075_s13, %s18071_s12 }
  0x11   : > { %p21234_p4 = scmp.eq.s32.totalorder %s18136_s16, 0  ;;  %p107_p7 = scmp.eq.s32.totalorder %s18136_s16, 1 }
  0x12   : > { %s18152_s21 = scalar_select %p26_p1, %s18079_s14, %s28_s19  }
  0x13   : > { %p18154_p5 = por %p36_p2, %p35_p0  ;;  %p18160_p6 = por %p21234_p4, %p41_p3 }
  0x14   : > { %21310 = sst [smem:[#allocation17_spill]] %s18152_s21  ;;  %p113_p8 = scmp.eq.s32.totalorder %s14530_s17, 1 }
  0x15   : > { %s21312_s23 = scalar_select %p18160_p6, 1, 0 }
  0x16   : > { %p14531_p9 = scmp.ge.s32.totalorder %s18083_s15, 1  ;;  %p120_p10 = scmp.lt.s32.totalorder %s18083_s15, 3 }
  0x17   : > { %p18167_p11 = por %p107_p7, %p35_p0  ;;  %p18171_p12 = por %p113_p8, %p41_p3 }
  0x18   : > { %p18175_p13 = pnand %p14531_p9, %p120_p10  ;;  %s21316_s1 = sld [smem:[#allocation51_spill]] }
  0x19   : > { %s21313_s24 = scalar_select %p18167_p11, 1, 0 }
  0x1a   : > { %s21314_s25 = scalar_select %p18171_p12, 1, 0 }
  0x1b   : > { %s21315_s26 = scalar_select %p18175_p13, 1, 0 }
  0x1c   : > { %p17888_p1 = pneg %p18175_p13  ;;  %p17905_p2 = scmp.lt.s32.totalorder %s18083_s15, 2 }
  0x1d   : > { %s21318_s2 = sld [smem:[#allocation52_spill]] }
  0x1e   : > { %s133_s29 = sshll.u32 %s21316_s1, 4  ;;  %p18188_p7 = pnand %p17888_p1, %p21234_p4  ;;  %s134_s29 = int_to_ptr.vmem [resolvable:$true] %s133_s29 }
  0x1f   : > { %p18197_p3 = pnand %p17905_p2, %p18154_p5  ;;  %s17949_s8 = scalar_lea.vmem %s134_s29, 32 }
  0x20   : > { %p17950_p8 = scmp.ne.s32.totalorder %s134_s29, %s17949_s8  ;;  %p17951_p9 = pneg %p18188_p7 }
  0x21   : > { %s21319_s7 = scalar_select %p18197_p3, 1, 0 }
  0x22   : > { %p17952_p10 = pnand %p17951_p9, %p17950_p8  ;;  %p17957_p0 = scmp.lt.s32.totalorder %s134_s29, %s134_s29 }
  0x23   : > { %s144_s6 = sshll.u32 %s21318_s2, 4  ;;  %p17958_p4 = scmp.lt.s32.totalorder %s17949_s8, %s17949_s8  ;;  %s145_s6 = int_to_ptr.vmem [resolvable:$true] %s144_s6 }
  0x24   : > { %p17953_p1 = pneg %p17952_p10 }
  0x25   : > { %p17959_p12 = por %p17958_p4, %p17957_p0 }
  0x27   : > { %p17960_p11 = pnand %p17959_p12, %p17953_p1 }
  0x29   : > { %17963 = shalt.err (!%p17960_p11)
}
  0x2a   : > { %s18085_s9 = smov [#allocation6]   ;;  %s155_s10 = sand.u32 1, %s18079_s14  }
  0x2b   : > { %17891 = dma.vmem_to_smem (!%p18188_p7), %s134_s29, 32, %s18085_s9, [#allocation5]  }
  0x2c   : > { %s17964_s11 = scalar_lea.vmem %s145_s6, 16  ;;  %p17972_p8 = scmp.lt.s32.totalorder %s145_s6, %s145_s6 }
  0x2d   : > { %p17965_p5 = scmp.ne.s32.totalorder %s145_s6, %s17964_s11  ;;  %p17973_p10 = scmp.lt.s32.totalorder %s17964_s11, %s17964_s11 }
  0x2f   : > { %p17967_p2 = pnand %p17965_p5, %p17951_p9  ;;  %p17974_p13 = por %p17973_p10, %p17972_p8 }
  0x31   : > { %p17968_p6 = pneg %p17967_p2 }
  0x33   : > { %p17975_p3 = pnand %p17974_p13, %p17968_p6 }
  0x35   : > { %17978 = shalt.err (!%p17975_p3)
}
  0x36   : > { %s18086_s17 = smov [#allocation7]   ;;  %s14535_s19 = sshll.u32 %s155_s10, 6 }
  0x37   : > { %17894 = dma.vmem_to_smem (!%p18188_p7), %s145_s6, 16, %s18086_s17, [#allocation8]  }
  0x38   : > { %s14946_s20 = sshll.u32 %s18083_s15, 10  ;;  %s21320_s0 = sld [smem:[#allocation50_spill]] }
  0x39   : > { %s159_s29 = scalar_lea.vmem [#allocation2], %s14535_s19  ;;  %s18222_s30 = scalar_lea.sflag [#allocation3], %s155_s10 }
  0x3a   : > { %s166_s4 = sshll.u32 %s159_s29, 4  ;;  %p21321_p6 = scmp.ne.s32.totalorder %s21319_s7, 0  ;;  %s18220_s4 = int_to_ptr.vmem [resolvable:$true] %s166_s4 }
  0x3c   : > { %p17981_p11 = pneg %p21321_p6 }
  0x3e   : > { %s18218_s28 = scalar_lea.hbm %s21320_s0, %s14946_s20  ;;  %s17984_s9 = scalar_lea.hbm %s21320_s0, 2048 }
  0x3f   : > { %s17979_s5 = scalar_lea.hbm %s18218_s28, 1024  ;;  %p17985_p0 = scmp.lt.u32.totalorder %s18218_s28, %s21320_s0 }
  0x40   : > { %p17980_p4 = scmp.ne.s32.totalorder %s18218_s28, %s17979_s5  ;;  %p17986_p7 = scmp.lt.u32.totalorder %s17984_s9, %s17979_s5 }
  0x41   : > { %p17988_p9 = scmp.lt.u32.totalorder %s17979_s5, %s18218_s28 }
  0x42   : > { %p17982_p12 = pnand %p17981_p11, %p17980_p4  ;;  %p17987_p3 = por %p17986_p7, %p17985_p0 }
  0x44   : > { %p17983_p13 = pneg %p17982_p12  ;;  %p17989_p1 = por %p17988_p9, %p17987_p3 }
  0x46   : > { %p17990_p5 = pnand %p17989_p1, %p17983_p13 }
  0x48   : > { %17993 = shalt.err (!%p17990_p5)
}
  0x49   : > { %s17994_s10 = scalar_lea.vmem %s18220_s4, 1024  ;;  %s18087_s19 = smov [#allocation2]  }
  0x4a   : > { %p17995_p2 = scmp.ne.s32.totalorder %s18220_s4, %s17994_s10  ;;  %s17999_s20 = sshll.u32 %s18087_s19, 4  ;;  %s18000_s20 = int_to_ptr.vmem [resolvable:$false] %s17999_s20 }
  0x4b   : > { %s18001_s22 = scalar_lea.vmem %s18000_s20, 2048  ;;  %p18002_p4 = scmp.lt.s32.totalorder %s18220_s4, %s18000_s20 }
  0x4c   : > { %p17997_p8 = pnand %p17995_p2, %p17981_p11  ;;  %p18003_p12 = scmp.lt.s32.totalorder %s18001_s22, %s17994_s10 }
  0x4e   : > { %p17998_p10 = pneg %p17997_p8  ;;  %p18004_p0 = por %p18003_p12, %p18002_p4 }
  0x50   : > { %p18005_p7 = pnand %p18004_p0, %p17998_p10 }
  0x52   : > { %18008 = shalt.err (!%p18005_p7)
}
  0x53   : > { %s18088_s27 = smov 128   ;;  %s18089_s29 = smov 8  }
  0x54   : > { %17898 = dma.hbm_to_vmem [thread:$0]  (!%p21321_p6), %s18218_s28, 1024, %s18220_s4, %s18222_s30, %s18088_s27, %s18088_s27, %s18089_s29  }
  0x55   : > { %p21322_p11 = scmp.ne.s32.totalorder %s21315_s26, 0 }
  0x57   : > { %178 = sbr.rel (%p21322_p11) target bundleno = 1133 (0x46d), region = 32 }
  0x5e   : > { %s18253_s5 = sand.u32 1, %s18075_s13   ;;  %p21323_p13 = scmp.ne.s32.totalorder %s21312_s23, 0 }
  0x5f   : > { %s14539_s6 = sshll.u32 %s18253_s5, 6  ;;  %s181_s8 = scalar_lea.sflag [#allocation3], %s18253_s5 }
  0x60   : > { %s18257_s9 = scalar_lea.vmem [#allocation2], %s14539_s6 }
  0x61   : > { %18054 = dma.done.wait (%p21323_p13), %s181_s8, 1024  }
  0x62   : > { %18056 = vsyncadd (%p21323_p13), %s181_s8, 4294966272  ;;  %p21324_p6 = scmp.eq.s32.totalorder %s18136_s16, 0 }
  0x64   : > { %18058 = dma.done.wait (%p21324_p6), [#allocation5], 32   ;;  %p21325_p3 = pmov %p21324_p6 }
  0x66   : > { %18060 = vsyncadd (%p21325_p3), [#allocation5], 4294967264  ;;  %p21326_p9 = pmov %p21325_p3 }
  0x67   : > { %p21327_p1 = pmov %p21325_p3 }
  0x68   : > { %18062 = dma.done.wait (%p21326_p9), [#allocation8], 16  }
  0x69   : > { %18064 = vsyncadd (%p21327_p1), [#allocation8], 4294967280 }
  0x6a   : > { %197 = sfence }
  0x6b   : > { %v216_v0 = vlaneseq  ;;  %v329_v1 = vld [vmem:[%s18257_s9] sm:$0xff]  ;;  %vm331_vm0 = vcmask 130048   ;;  %v330_v2 = vld [vmem:[%s18257_s9 + $0x8] sm:$0xff]  ;;  %v21243_v22 = vmov 0.0   ;;  %v18091_v30 = vmov 1.0|1.0  }
  0x6c   : > { %v333_v3 = vsel %vm331_vm0, %v329_v1, 0  ;;  %v336_v4 = vsel %vm331_vm0, %v330_v2, 0  ;;  %v14579_v57 = vld [vmem:[%s18257_s9 + $0x10] sm:$0xff]  ;;  %v14580_v61 = vld [vmem:[%s18257_s9 + $0x18] sm:$0xff]  ;;  %s18861_s23 = sld [smem:[#allocation6]]  ;;  %s18863_s26 = sld [smem:[#allocation6 + $0x3]] }
  0x6d   : > { %v18275_v5 = vshrl.u32 %v216_v0, 7  ;;  %v18277_v6 = vand.u32 127, %v216_v0  ;;  %v18279_v7 = vand.u32 4294901760, %v333_v3  ;;  %v18281_v8 = vand.u32 4294901760, %v336_v4  ;;  %s18866_s7 = sld [smem:[#allocation6 + $0x6]]  ;;  %s18868_s28 = sld [smem:[#allocation6 + $0x24]] }
  0x6e   : > { %v1848_v60 = vsel %vm331_vm0, %v14579_v57, 0  ;;  %v1851_v1 = vsel %vm331_vm0, %v14580_v61, 0  ;;  %s18874_s4 = sld [smem:[#allocation6 + $0x27]]  ;;  %s18876_s30 = sld [smem:[#allocation6 + $0x2a]] }
  0x6f   : > { %21328 = vst [vmem:[#allocation18_spill] sm:$0xff] %v18275_v5  ;;  %v18284_v9 = vadd.s32 8, %v18275_v5  ;;  %v223_v10 = vadd.s32 4294967295, %v18277_v6  ;;  %v18288_v11 = vmul.u32 2, %v18275_v5  ;;  %v18291_v12 = vsub.f32 %v333_v3, %v18279_v7  ;;  %s18880_s11 = sld [smem:[#allocation6 + $0x48]]  ;;  %s18882_s17 = sld [smem:[#allocation6 + $0x4b]] }
  0x70   : > { %v18294_v13 = vsub.f32 %v336_v4, %v18281_v8  ;;  %v294_v52 = vadd.s32 1, %v18277_v6  ;;  %v18435_v0 = vand.u32 4294901760, %v1848_v60  ;;  %v18445_v2 = vand.u32 4294901760, %v1851_v1  ;;  %s18888_s10 = sld [smem:[#allocation6 + $0x4e]]  ;;  %s18890_s19 = sld [smem:[#allocation6 + $0x6c]] }
  0x71   : > { %21329 = vst [vmem:[#allocation19_spill] sm:$0xff] %v18284_v9  ;;  %v18297_v14 = vmul.u32 2, %v18284_v9  ;;  %vm226_vm1 = vcmp.ge.s32.totalorder %v223_v10, %v18288_v11  ;;  %v18301_v15 = vadd.s32 2, %v18288_v11  ;;  %vm264_vm2 = vcmp.ge.s32.totalorder %v18277_v6, %v18288_v11  ;;  %s18893_s20 = sld [smem:[#allocation6 + $0x6f]]  ;;  %s18895_s22 = sld [smem:[#allocation6 + $0x72]] }
  0x72   : > { %v18306_v16 = vand.u32 4294901760, %v18291_v12  ;;  %v18309_v17 = vand.u32 4294901760, %v18294_v13  ;;  %vm295_vm15 = vcmp.ge.s32.totalorder %v294_v52, %v18288_v11  ;;  %v18457_v11 = vsub.f32 %v1851_v1, %v18445_v2  ;;  %s18897_s27 = sld [smem:[#allocation6 + $0x1]]  ;;  %s18899_s29 = sld [smem:[#allocation6 + $0x4]] }
  0x73   : > { %vm227_vm3 = vcmp.ge.s32.totalorder %v223_v10, %v18297_v14  ;;  %v18313_v18 = vadd.s32 2, %v18297_v14  ;;  %vm230_vm4 = vcmp.lt.s32.totalorder %v223_v10, %v18301_v15  ;;  %vm266_vm6 = vcmp.lt.s32.totalorder %v18277_v6, %v18301_v15  ;;  %s18901_s6 = sld [smem:[#allocation6 + $0x7]]  ;;  %s18903_s8 = sld [smem:[#allocation6 + $0x25]] }
  0x74   : > { %vm232_vm5 = vmand %vm226_vm1, %vm230_vm4  ;;  %v408_v19 = vsub.f32 %v18291_v12, %v18306_v16  ;;  %v418_v20 = vsub.f32 %v18294_v13, %v18309_v17  ;;  %vm265_vm8 = vcmp.ge.s32.totalorder %v18277_v6, %v18297_v14  ;;  %vm297_vm1 = vcmp.lt.s32.totalorder %v294_v52, %v18301_v15  ;;  %s18907_s0 = sld [smem:[#allocation6 + $0x2b]]  ;;  %s18910_s1 = sld [smem:[#allocation6 + $0x49]] }
  0x75   : > { %vm231_vm7 = vcmp.lt.s32.totalorder %v223_v10, %v18313_v18  ;;  %vm267_vm9 = vcmp.lt.s32.totalorder %v18277_v6, %v18313_v18  ;;  %vm18327_vm10 = vmand %vm264_vm2, %vm266_vm6  ;;  %v14543_v23 = vsel %vm232_vm5, 1.0, %v21243_v22  ;;  %vm296_vm2 = vcmp.ge.s32.totalorder %v294_v52, %v18297_v14  ;;  %s18912_s2 = sld [smem:[#allocation6 + $0x4c]]  ;;  %s18915_s21 = sld [smem:[#allocation6 + $0x4f]] }
  0x76   : > { %vm233_vm11 = vmand %vm227_vm3, %vm231_vm7  ;;  %v18332_v24 = vand.u32 4294901760, %v408_v19  ;;  %v427_v25 = vsub.f32 %v14543_v23, %v14543_v23  ;;  %v14549_v26 = vsel %vm18327_vm10, 1.0, %v21243_v22  ;;  %v18346_v31 = vand.u32 4294901760, %v418_v20  ;;  %s18917_s14 = sld [smem:[#allocation6 + $0x6d]]  ;;  %s18921_s13 = sld [smem:[#allocation6 + $0x70]] }
  0x77   : > { %vm18337_vm12 = vmpackc.low %vm233_vm11, %vm232_vm5  ;;  %v14544_v28 = vsel %vm233_vm11, 1.0, %v21243_v22  ;;  %v929_v29 = vsub.f32 %v14549_v26, %v14549_v26  ;;  %vm298_vm3 = vcmp.lt.s32.totalorder %v294_v52, %v18313_v18  ;;  %v18451_v10 = vsub.f32 %v1848_v60, %v18435_v0  ;;  %s18923_s18 = sld [smem:[#allocation6 + $0x73]]  ;;  %p21500_p2 = scmp.ne.s32.totalorder %s21313_s24, 0 }
  0x78   : > { %16893 = vmatprep.subr.msk.bf16.mxu0 %vm18337_vm12, %v18091_v30  ;;  %vm269_vm13 = vmand %vm265_vm8, %vm267_vm9  ;;  %15672 = vmatprep.mubr.f32.mxu0 %v18332_v24  ;;  %v428_v32 = vand.u32 4294901760, %v427_v25  ;;  %v434_v33 = vsub.f32 %v14544_v28, %v14544_v28  ;;  %v18481_v20 = vand.u32 4294901760, %v18457_v11  ;;  %v6392_v27 = vstv %s18861_s23  ;;  %s19101_s23 = sld [smem:[#allocation6 + $0x30]] }
  0x79   : > { %vm18350_vm14 = vmpackc.low %vm269_vm13, %vm18327_vm10  ;;  %16895 = vmatpush3.bf16.msk.msra.mxu0 %vm18337_vm12, %v18091_v30  ;;  %15714 = vmatprep.mubr.f32.mxu1 %v18332_v24  ;;  %v14550_v35 = vsel %vm269_vm13, 1.0, %v21243_v22  ;;  %v930_v36 = vand.u32 4294901760, %v929_v29  ;;  %v18469_v19 = vand.u32 4294901760, %v18451_v10 }
  0x7a   : > { %16917 = vmatprep.subr.msk.bf16.mxu1 %vm18350_vm14, %v18091_v30  ;;  %v429_v37 = vsub.f32 %v427_v25, %v428_v32  ;;  %v435_v38 = vand.u32 4294901760, %v434_v33  ;;  %v936_v39 = vsub.f32 %v14550_v35, %v14550_v35  ;;  %v18371_v49 = vpack.c.bf16 %v434_v33, %v427_v25  ;;  %vm18402_vm4 = vmand %vm295_vm15, %vm297_vm1 }
  0x7b   : > { %16919 = vmatpush3.bf16.msk.msra.mxu1 %vm18350_vm14, %v18091_v30  ;;  %v931_v40 = vsub.f32 %v929_v29, %v930_v36  ;;  %vm18409_vm5 = vmand %vm296_vm2, %vm298_vm3  ;;  %v14555_v58 = vsel %vm18402_vm4, 1.0, %v21243_v22  ;;  %v1923_v25 = vsub.f32 %v18451_v10, %v18469_v19  ;;  %v1933_v26 = vsub.f32 %v18457_v11, %v18481_v20 }
  0x7c   : > { %15673 = vmatmul.mubr.f32.vlgmr.msra.gmra.mrb[0].mxu0 %v18346_v31  ;;  %v430_v41 = vand.u32 4294901760, %v429_v37  ;;  %v436_v42 = vsub.f32 %v434_v33, %v435_v38  ;;  %v937_v43 = vand.u32 4294901760, %v936_v39  ;;  %v18376_v51 = vpack.c.bf16 %v936_v39, %v929_v29  ;;  %vm18464_vm6 = vmpackc.low %vm18409_vm5, %vm18402_vm4 }
  0x7d   : > { %15679 = vmatprep.mubr.f32.mxu0 %v18279_v7  ;;  %v932_v45 = vand.u32 4294901760, %v931_v40  ;;  %v18400_v53 = vpack.c.bf16 %v435_v38, %v428_v32  ;;  %v14556_v59 = vsel %vm18409_vm5, 1.0, %v21243_v22  ;;  %v18433_v62 = vsub.f32 %v14555_v58, %v14555_v58 }
  0x7e   : > { %15715 = vmatmul.mubr.f32.vlgmr.msra.gmra.mrb[0].mxu1 %v18346_v31  ;;  %v437_v44 = vand.u32 4294901760, %v436_v42  ;;  %v938_v46 = vsub.f32 %v936_v39, %v937_v43  ;;  %v18407_v55 = vpack.c.bf16 %v937_v43, %v930_v36  ;;  %v1438_v63 = vsub.f32 %v14556_v59, %v14556_v59  ;;  %v14619_v42 = vld [vmem:[%s18257_s9 + $0x30] sm:$0xff] }
  0x7f   : > { %15721 = vmatprep.mubr.f32.mxu1 %v18279_v7  ;;  %v1432_v3 = vand.u32 4294901760, %v18433_v62  ;;  %v1924_v29 = vand.u32 4294901760, %v1923_v25  ;;  %v1934_v32 = vand.u32 4294901760, %v1933_v26  ;;  %v4878_v43 = vsel %vm331_vm0, %v14619_v42, 0 }
  0x80   : > { %v18369_v47 = vpack.c.bf16 %v437_v44, %v430_v41  ;;  %v939_v48 = vand.u32 4294901760, %v938_v46  ;;  %v1439_v4 = vand.u32 4294901760, %v1438_v63  ;;  %v18504_v33 = vpack.c.bf16 %v1438_v63, %v18433_v62  ;;  %v14620_v44 = vld [vmem:[%s18257_s9 + $0x38] sm:$0xff] }
  0x81   : > { %v1433_v14 = vsub.f32 %v18433_v62, %v1432_v3  ;;  %v4881_v46 = vsel %vm331_vm0, %v14620_v44, 0  ;;  %v11090_v62 = vstv %s18882_s17  ;;  %v11096_v25 = vstv %s18912_s2  ;;  %s19091_s2 = sld [smem:[#allocation6 + $0x26]] }
  0x82   : > { %16897 = vmatprep.subr.bf16.mxu0 %v18369_v47  ;;  %v18374_v50 = vpack.c.bf16 %v939_v48, %v932_v45  ;;  %v1440_v15 = vsub.f32 %v1438_v63, %v1439_v4  ;;  %v18714_v45 = vand.u32 4294901760, %v4878_v43  ;;  %v18724_v48 = vand.u32 4294901760, %v4881_v46  ;;  %s19115_s17 = sld [smem:[#allocation6 + $0x6e]] }
  0x83   : > { %16899 = vmatpush3.bf16.msra.mxu0 %v18369_v47  ;;  %v1434_v21 = vand.u32 4294901760, %v1433_v14  ;;  %v11754_v63 = vstv %s18888_s10  ;;  %v8433_v14 = vstv %s18903_s8  ;;  %v11760_v26 = vstv %s18915_s21  ;;  %s19099_s21 = sld [smem:[#allocation6 + $0x29]]  ;;  %s19172_s10 = sld [smem:[#allocation6 + $0x75]] }
  0x84   : > { %16921 = vmatprep.subr.bf16.mxu1 %v18374_v50  ;;  %16901 = vmatprep.subr.bf16.mxu0 %v18371_v49  ;;  %v1441_v23 = vand.u32 4294901760, %v1440_v15  ;;  %v18729_v52 = vsub.f32 %v4878_v43, %v18714_v45  ;;  %v18735_v54 = vsub.f32 %v4881_v46, %v18724_v48  ;;  %s19206_s8 = sld [smem:[#allocation6 + $0x74]] }
  0x85   : > { %16923 = vmatpush3.bf16.msra.mxu1 %v18374_v50 }
  0x86   : > { %15680 = vmatmul.mubr.f32.vlgmr.msra.gmra.mrb[0].mxu0 %v18281_v8  ;;  %16925 = vmatprep.subr.bf16.mxu1 %v18376_v51  ;;  %v18494_v28 = vpack.c.bf16 %v1441_v23, %v1434_v21  ;;  %v18738_v56 = vand.u32 4294901760, %v18729_v52  ;;  %v18750_v57 = vand.u32 4294901760, %v18735_v54  ;;  %v10432_v23 = vstv %s18910_s1  ;;  %s19089_s1 = sld [smem:[#allocation6 + $0x9]] }
  0x87   : > { %16903 = vmatpush3.bf16.msra.mxu0 %v18371_v49  ;;  %15686 = vmatprep.mubr.f32.mxu0 %v18291_v12 }
  0x88   : > { %15722 = vmatmul.mubr.f32.vlgmr.msra.gmra.mrb[0].mxu1 %v18281_v8  ;;  %16905 = vmatprep.subr.msk.bf16.mxu0 %vm18337_vm12, %v18091_v30  ;;  %v4953_v58 = vsub.f32 %v18729_v52, %v18738_v56  ;;  %v4963_v59 = vsub.f32 %v18735_v54, %v18750_v57 }
  0x89   : > { %16927 = vmatpush3.bf16.msra.mxu1 %v18376_v51  ;;  %15728 = vmatprep.mubr.f32.mxu1 %v18291_v12 }
  0x8a   : > { %16929 = vmatprep.subr.msk.bf16.mxu1 %vm18350_vm14, %v18091_v30  ;;  %v4954_v60 = vand.u32 4294901760, %v4953_v58  ;;  %v4964_v61 = vand.u32 4294901760, %v4963_v59 }
  0x8e   : > { %15687 = vmatmul.mubr.f32.vlgmr.msra.gmra.mrb[0].mxu0 %v18294_v13 }
  0x8f   : > { %16907 = vmatpush3.bf16.msk.msra.mxu0 %vm18337_vm12, %v18091_v30  ;;  %15693 = vmatprep.mubr.f32.mxu0 %v18306_v16 }
  0x90   : > { %15729 = vmatmul.mubr.f32.vlgmr.msra.gmra.mrb[0].mxu1 %v18294_v13  ;;  %16909 = vmatprep.subr.bf16.mxu0 %v18400_v53 }
  0x91   : > { %16931 = vmatpush3.bf16.msk.msra.mxu1 %vm18350_vm14, %v18091_v30  ;;  %15735 = vmatprep.mubr.f32.mxu1 %v18306_v16 }
  0x92   : > { %16933 = vmatprep.subr.bf16.mxu1 %v18407_v55 }
  0x96   : > { %15694 = vmatmul.mubr.f32.vlgmr.msra.gmra.mrb[0].mxu0 %v18309_v17 }
  0x97   : > { %16911 = vmatpush3.bf16.msra.mxu0 %v18400_v53  ;;  %15700 = vmatprep.mubr.f32.mxu0 %v18279_v7 }
  0x98   : > { %15736 = vmatmul.mubr.f32.vlgmr.msra.gmra.mrb[0].mxu1 %v18309_v17  ;;  %16913 = vmatprep.subr.msk.bf16.mxu0 %vm18337_vm12, %v18091_v30 }
  0x99   : > { %16935 = vmatpush3.bf16.msra.mxu1 %v18407_v55  ;;  %15742 = vmatprep.mubr.f32.mxu1 %v18279_v7 }
  0x9a   : > { %16937 = vmatprep.subr.msk.bf16.mxu1 %vm18350_vm14, %v18091_v30 }
  0x9e   : > { %15701 = vmatmul.mubr.f32.vlgmr.msra.gmra.mrb[0].mxu0 %v18281_v8 }
  0x9f   : > { %16915 = vmatpush3.bf16.msk.msra.mxu0 %vm18337_vm12, %v18091_v30  ;;  %15707 = vmatprep.mubr.f32.mxu0 %v18279_v7 }
  0xa0   : > { %15743 = vmatmul.mubr.f32.vlgmr.msra.gmra.mrb[0].mxu1 %v18281_v8  ;;  %16941 = vmatprep.subr.msk.bf16.mxu0 %vm18464_vm6, %v18091_v30 }
  0xa1   : > { %16939 = vmatpush3.bf16.msk.msra.mxu1 %vm18350_vm14, %v18091_v30  ;;  %15749 = vmatprep.mubr.f32.mxu1 %v18279_v7 }
  0xa2   : > { %16965 = vmatprep.subr.msk.bf16.mxu1 %vm18337_vm12, %v18091_v30 }
  0xa6   : > { %15708 = vmatmul.mubr.f32.vlgmr.msra.gmra.mrb[0].mxu0 %v18281_v8 }
  0xa7   : > { %16943 = vmatpush3.bf16.msk.msra.mxu0 %vm18464_vm6, %v18091_v30  ;;  %15756 = vmatprep.mubr.f32.mxu0 %v18332_v24  ;;  %v18529_v24 = vpack.c.bf16 %v1439_v4, %v1432_v3  ;;  %v13753_v3 = vstv %s18895_s22  ;;  %v6398_v4 = vstv %s18897_s27  ;;  %s19184_s22 = sld [smem:[#allocation6 + $0x71]]  ;;  %s19192_s27 = sld [smem:[#allocation6 + $0x78]] }
  0xa8   : > { %15750 = vmatmul.mubr.f32.vlgmr.msra.gmra.mrb[0].mxu1 %v18281_v8  ;;  %16945 = vmatprep.subr.bf16.mxu0 %v18494_v28 }
  0xa9   : > { %16967 = vmatpush3.bf16.msk.msra.mxu1 %vm18337_vm12, %v18091_v30  ;;  %15798 = vmatprep.mubr.f32.mxu1 %v1924_v29 }
  0xaa   : > { %15757 = vmatmul.mubr.f32.vlgmr.msra.gmra.mrb[2].mxu0 %v18346_v31  ;;  %16969 = vmatprep.subr.bf16.mxu1 %v18369_v47 }
  0xab   : > { %16947 = vmatpush3.bf16.msra.mxu0 %v18494_v28  ;;  %15763 = vmatprep.mubr.f32.mxu0 %v18279_v7 }
  0xac   : > { %15799 = vmatmul.mubr.f32.vlgmr.msra.gmra.mrb[2].mxu1 %v1934_v32  ;;  %16949 = vmatprep.subr.bf16.mxu0 %v18504_v33 }
  0xad   : > { %16971 = vmatpush3.bf16.msra.mxu1 %v18369_v47  ;;  %15805 = vmatprep.mubr.f32.mxu1 %v18435_v0 }
  0xae   : > { %16973 = vmatprep.subr.bf16.mxu1 %v18371_v49 }
  0xb2   : > { %15764 = vmatmul.mubr.f32.vlgmr.msra.gmra.mrb[2].mxu0 %v18281_v8 }
  0xb3   : > { %16951 = vmatpush3.bf16.msra.mxu0 %v18504_v33  ;;  %15770 = vmatprep.mubr.f32.mxu0 %v18291_v12  ;;  %v14600_v12 = vld [vmem:[%s18257_s9 + $0x28] sm:$0xff] }
  0xb4   : > { %15806 = vmatmul.mubr.f32.vlgmr.msra.gmra.mrb[2].mxu1 %v18445_v2  ;;  %16953 = vmatprep.subr.msk.bf16.mxu0 %vm18464_vm6, %v18091_v30 }
  0xb5   : > { %16975 = vmatpush3.bf16.msra.mxu1 %v18371_v49  ;;  %15812 = vmatprep.mubr.f32.mxu1 %v18451_v10 }
  0xb6   : > { %16977 = vmatprep.subr.msk.bf16.mxu1 %vm18337_vm12, %v18091_v30 }
  0xba   : > { %15771 = vmatmul.mubr.f32.vlgmr.msra.gmra.mrb[2].mxu0 %v18294_v13 }
  0xbb   : > { %16955 = vmatpush3.bf16.msk.msra.mxu0 %vm18464_vm6, %v18091_v30  ;;  %15777 = vmatprep.mubr.f32.mxu0 %v18306_v16  ;;  %v3366_v16 = vsel %vm331_vm0, %v14600_v12, 0 }
  0xbc   : > { %15813 = vmatmul.mubr.f32.vlgmr.msra.gmra.mrb[2].mxu1 %v18457_v11  ;;  %16957 = vmatprep.subr.bf16.mxu0 %v18529_v24 }
  0xbd   : > { %16979 = vmatpush3.bf16.msk.msra.mxu1 %vm18337_vm12, %v18091_v30  ;;  %15819 = vmatprep.mubr.f32.mxu1 %v18469_v19 }
  0xbe   : > { %16981 = vmatprep.subr.bf16.mxu1 %v18400_v53 }
  0xc2   : > { %15778 = vmatmul.mubr.f32.vlgmr.msra.gmra.mrb[2].mxu0 %v18309_v17  ;;  %v18618_v17 = vand.u32 4294901760, %v3366_v16 }
  0xc3   : > { %16959 = vmatpush3.bf16.msra.mxu0 %v18529_v24  ;;  %15784 = vmatprep.mubr.f32.mxu0 %v18279_v7 }
  0xc4   : > { %15820 = vmatmul.mubr.f32.vlgmr.msra.gmra.mrb[2].mxu1 %v18481_v20  ;;  %16961 = vmatprep.subr.msk.bf16.mxu0 %vm18464_vm6, %v18091_v30  ;;  %v18635_v35 = vsub.f32 %v3366_v16, %v18618_v17 }
  0xc5   : > { %16983 = vmatpush3.bf16.msra.mxu1 %v18400_v53  ;;  %15826 = vmatprep.mubr.f32.mxu1 %v18435_v0 }
  0xc6   : > { %16985 = vmatprep.subr.msk.bf16.mxu1 %vm18337_vm12, %v18091_v30  ;;  %v18642_v37 = vand.u32 4294901760, %v18635_v35 }
  0xc8   : > { %v3448_v39 = vsub.f32 %v18635_v35, %v18642_v37 }
  0xca   : > { %15785 = vmatmul.mubr.f32.vlgmr.msra.gmra.mrb[2].mxu0 %v18281_v8  ;;  %v18666_v41 = vand.u32 4294901760, %v3448_v39 }
  0xcb   : > { %16963 = vmatpush3.bf16.msk.msra.mxu0 %vm18464_vm6, %v18091_v30  ;;  %15791 = vmatprep.mubr.f32.mxu0 %v18279_v7  ;;  %v14599_v7 = vld [vmem:[%s18257_s9 + $0x20] sm:$0xff]  ;;  %s18905_s9 = sld [smem:[#allocation6 + $0x28]] }
  0xcc   : > { %15827 = vmatmul.mubr.f32.vlgmr.msra.gmra.mrb[2].mxu1 %v18445_v2  ;;  %16989 = vmatprep.subr.msk.bf16.mxu0 %vm18350_vm14, %v18091_v30 }
  0xcd   : > { %16987 = vmatpush3.bf16.msk.msra.mxu1 %vm18337_vm12, %v18091_v30  ;;  %15833 = vmatprep.mubr.f32.mxu1 %v18435_v0 }
  0xce   : > { %17013 = vmatprep.subr.msk.bf16.mxu1 %vm18464_vm6, %v18091_v30 }
  0xd1   : > { %v9097_v15 = vstv %s18905_s9  ;;  %s19238_s9 = sld [smem:[#allocation6 + $0x7b]] }
  0xd2   : > { %15792 = vmatmul.mubr.f32.vlgmr.msra.gmra.mrb[2].mxu0 %v18281_v8  ;;  %v3363_v8 = vsel %vm331_vm0, %v14599_v7, 0 }
  0xd3   : > { %16991 = vmatpush3.bf16.msk.msra.mxu0 %vm18350_vm14, %v18091_v30  ;;  %15840 = vmatprep.mubr.f32.mxu0 %v1924_v29  ;;  %v18614_v13 = vand.u32 4294901760, %v3363_v8 }
  0xd4   : > { %15834 = vmatmul.mubr.f32.vlgmr.msra.gmra.mrb[2].mxu1 %v18445_v2  ;;  %16993 = vmatprep.subr.bf16.mxu0 %v18374_v50 }
  0xd5   : > { %17015 = vmatpush3.bf16.msk.msra.mxu1 %vm18464_vm6, %v18091_v30  ;;  %15882 = vmatprep.mubr.f32.mxu1 %v1924_v29  ;;  %v18623_v31 = vsub.f32 %v3363_v8, %v18614_v13 }
  0xd6   : > { %15841 = vmatmul.mubr.f32.vlgmr.msra.gmra.mrb[4].mxu0 %v1934_v32  ;;  %17017 = vmatprep.subr.bf16.mxu1 %v18494_v28 }
  0xd7   : > { %16995 = vmatpush3.bf16.msra.mxu0 %v18374_v50  ;;  %15847 = vmatprep.mubr.f32.mxu0 %v18435_v0  ;;  %v18638_v36 = vand.u32 4294901760, %v18623_v31 }
  0xd8   : > { %15883 = vmatmul.mubr.f32.vlgmr.msra.gmra.mrb[4].mxu1 %v1934_v32  ;;  %16997 = vmatprep.subr.bf16.mxu0 %v18376_v51 }
  0xd9   : > { %17019 = vmatpush3.bf16.msra.mxu1 %v18494_v28  ;;  %15889 = vmatprep.mubr.f32.mxu1 %v18435_v0  ;;  %v3438_v38 = vsub.f32 %v18623_v31, %v18638_v36 }
  0xda   : > { %17021 = vmatprep.subr.bf16.mxu1 %v18504_v33 }
  0xdb   : > { %v18663_v40 = vand.u32 4294901760, %v3438_v38 }
  0xde   : > { %15848 = vmatmul.mubr.f32.vlgmr.msra.gmra.mrb[4].mxu0 %v18445_v2 }
  0xdf   : > { %16999 = vmatpush3.bf16.msra.mxu0 %v18376_v51  ;;  %15854 = vmatprep.mubr.f32.mxu0 %v18451_v10 }
  0xe0   : > { %15890 = vmatmul.mubr.f32.vlgmr.msra.gmra.mrb[4].mxu1 %v18445_v2  ;;  %17001 = vmatprep.subr.msk.bf16.mxu0 %vm18350_vm14, %v18091_v30 }
  0xe1   : > { %17023 = vmatpush3.bf16.msra.mxu1 %v18504_v33  ;;  %15896 = vmatprep.mubr.f32.mxu1 %v18451_v10  ;;  %v7074_v10 = vstv %s18899_s29  ;;  %s19194_s29 = sld [smem:[#allocation6 + $0x50]] }
  0xe2   : > { %17025 = vmatprep.subr.msk.bf16.mxu1 %vm18464_vm6, %v18091_v30 }
  0xe6   : > { %15855 = vmatmul.mubr.f32.vlgmr.msra.gmra.mrb[4].mxu0 %v18457_v11 }
  0xe7   : > { %17003 = vmatpush3.bf16.msk.msra.mxu0 %vm18350_vm14, %v18091_v30  ;;  %15861 = vmatprep.mubr.f32.mxu0 %v18469_v19 }
  0xe8   : > { %15897 = vmatmul.mubr.f32.vlgmr.msra.gmra.mrb[4].mxu1 %v18457_v11  ;;  %17005 = vmatprep.subr.bf16.mxu0 %v18407_v55  ;;  %v7750_v11 = vstv %s18901_s6  ;;  %s19204_s6 = sld [smem:[#allocation6 + $0x57]] }
  0xe9   : > { %17027 = vmatpush3.bf16.msk.msra.mxu1 %vm18464_vm6, %v18091_v30  ;;  %15903 = vmatprep.mubr.f32.mxu1 %v18469_v19  ;;  %v9761_v19 = vstv %s18907_s0  ;;  %s19087_s0 = sld [smem:[#allocation6 + $0x2]] }
  0xea   : > { %17029 = vmatprep.subr.bf16.mxu1 %v18529_v24 }
  0xee   : > { %15862 = vmatmul.mubr.f32.vlgmr.msra.gmra.mrb[4].mxu0 %v18481_v20 }
  0xef   : > { %17007 = vmatpush3.bf16.msra.mxu0 %v18407_v55  ;;  %15868 = vmatprep.mubr.f32.mxu0 %v18435_v0 }
  0xf0   : > { %15904 = vmatmul.mubr.f32.vlgmr.msra.gmra.mrb[4].mxu1 %v18481_v20  ;;  %17009 = vmatprep.subr.msk.bf16.mxu0 %vm18350_vm14, %v18091_v30 }
  0xf1   : > { %17031 = vmatpush3.bf16.msra.mxu1 %v18529_v24  ;;  %15910 = vmatprep.mubr.f32.mxu1 %v18435_v0 }
  0xf2   : > { %17033 = vmatprep.subr.msk.bf16.mxu1 %vm18464_vm6, %v18091_v30 }
  0xf6   : > { %15869 = vmatmul.mubr.f32.vlgmr.msra.gmra.mrb[4].mxu0 %v18445_v2 }
  0xf7   : > { %17011 = vmatpush3.bf16.msk.msra.mxu0 %vm18350_vm14, %v18091_v30  ;;  %15875 = vmatprep.mubr.f32.mxu0 %v18435_v0 }
  0xf8   : > { %15911 = vmatmul.mubr.f32.vlgmr.msra.gmra.mrb[4].mxu1 %v18445_v2  ;;  %17037 = vmatprep.subr.msk.bf16.mxu0 %vm18337_vm12, %v18091_v30 }
  0xf9   : > { %17035 = vmatpush3.bf16.msk.msra.mxu1 %vm18464_vm6, %v18091_v30  ;;  %15917 = vmatprep.mubr.f32.mxu1 %v18435_v0  ;;  %v12425_v0 = vstv %s18890_s19  ;;  %s19174_s19 = sld [smem:[#allocation6 + $0x4d]] }
  0xfa   : > { %17061 = vmatprep.subr.msk.bf16.mxu1 %vm18350_vm14, %v18091_v30 }
  0xfe   : > { %15876 = vmatmul.mubr.f32.vlgmr.msra.gmra.mrb[4].mxu0 %v18445_v2 }
  0xff   : > { %17039 = vmatpush3.bf16.msk.msra.mxu0 %vm18337_vm12, %v18091_v30  ;;  %15924 = vmatprep.mubr.f32.mxu0 %v18663_v40 }
 0x100   : > { %15918 = vmatmul.mubr.f32.vlgmr.msra.gmra.mrb[4].mxu1 %v18445_v2  ;;  %17041 = vmatprep.subr.bf16.mxu0 %v18369_v47  ;;  %v13089_v2 = vstv %s18893_s20  ;;  %s19182_s20 = sld [smem:[#allocation6 + $0x54]] }
 0x101   : > { %17063 = vmatpush3.bf16.msk.msra.mxu1 %vm18350_vm14, %v18091_v30  ;;  %15966 = vmatprep.mubr.f32.mxu1 %v18663_v40 }
 0x102   : > { %15925 = vmatmul.mubr.f32.vlgmr.msra.gmra.mrb[6].mxu0 %v18666_v41  ;;  %17065 = vmatprep.subr.bf16.mxu1 %v18374_v50 }
 0x103   : > { %17043 = vmatpush3.bf16.msra.mxu0 %v18369_v47  ;;  %15931 = vmatprep.mubr.f32.mxu0 %v18614_v13 }
 0x104   : > { %15967 = vmatmul.mubr.f32.vlgmr.msra.gmra.mrb[6].mxu1 %v18666_v41  ;;  %17045 = vmatprep.subr.bf16.mxu0 %v18371_v49 }
 0x105   : > { %17067 = vmatpush3.bf16.msra.mxu1 %v18374_v50  ;;  %15973 = vmatprep.mubr.f32.mxu1 %v18614_v13 }
 0x106   : > { %17069 = vmatprep.subr.bf16.mxu1 %v18376_v51 }
 0x10a   : > { %15932 = vmatmul.mubr.f32.vlgmr.msra.gmra.mrb[6].mxu0 %v18618_v17 }
 0x10b   : > { %17047 = vmatpush3.bf16.msra.mxu0 %v18371_v49  ;;  %15938 = vmatprep.mubr.f32.mxu0 %v18623_v31 }
 0x10c   : > { %15974 = vmatmul.mubr.f32.vlgmr.msra.gmra.mrb[6].mxu1 %v18618_v17  ;;  %17049 = vmatprep.subr.msk.bf16.mxu0 %vm18337_vm12, %v18091_v30 }
 0x10d   : > { %17071 = vmatpush3.bf16.msra.mxu1 %v18376_v51  ;;  %15980 = vmatprep.mubr.f32.mxu1 %v18623_v31 }
 0x10e   : > { %17073 = vmatprep.subr.msk.bf16.mxu1 %vm18350_vm14, %v18091_v30 }
 0x112   : > { %15939 = vmatmul.mubr.f32.vlgmr.msra.gmra.mrb[6].mxu0 %v18635_v35 }
 0x113   : > { %17051 = vmatpush3.bf16.msk.msra.mxu0 %vm18337_vm12, %v18091_v30  ;;  %15945 = vmatprep.mubr.f32.mxu0 %v18638_v36 }
 0x114   : > { %15981 = vmatmul.mubr.f32.vlgmr.msra.gmra.mrb[6].mxu1 %v18635_v35  ;;  %17053 = vmatprep.subr.bf16.mxu0 %v18400_v53 }
 0x115   : > { %17075 = vmatpush3.bf16.msk.msra.mxu1 %vm18350_vm14, %v18091_v30  ;;  %15987 = vmatprep.mubr.f32.mxu1 %v18638_v36 }
 0x116   : > { %17077 = vmatprep.subr.bf16.mxu1 %v18407_v55 }
 0x11a   : > { %15946 = vmatmul.mubr.f32.vlgmr.msra.gmra.mrb[6].mxu0 %v18642_v37 }
 0x11b   : > { %17055 = vmatpush3.bf16.msra.mxu0 %v18400_v53  ;;  %15952 = vmatprep.mubr.f32.mxu0 %v18614_v13 }
 0x11c   : > { %15988 = vmatmul.mubr.f32.vlgmr.msra.gmra.mrb[6].mxu1 %v18642_v37  ;;  %17057 = vmatprep.subr.msk.bf16.mxu0 %vm18337_vm12, %v18091_v30 }
 0x11d   : > { %17079 = vmatpush3.bf16.msra.mxu1 %v18407_v55  ;;  %15994 = vmatprep.mubr.f32.mxu1 %v18614_v13 }
 0x11e   : > { %17081 = vmatprep.subr.msk.bf16.mxu1 %vm18350_vm14, %v18091_v30 }
 0x122   : > { %15953 = vmatmul.mubr.f32.vlgmr.msra.gmra.mrb[6].mxu0 %v18618_v17 }
 0x123   : > { %17059 = vmatpush3.bf16.msk.msra.mxu0 %vm18337_vm12, %v18091_v30  ;;  %15959 = vmatprep.mubr.f32.mxu0 %v18614_v13 }
 0x124   : > { %15995 = vmatmul.mubr.f32.vlgmr.msra.gmra.mrb[6].mxu1 %v18618_v17  ;;  %17085 = vmatprep.subr.msk.bf16.mxu0 %vm18464_vm6, %v18091_v30 }
 0x125   : > { %17083 = vmatpush3.bf16.msk.msra.mxu1 %vm18350_vm14, %v18091_v30  ;;  %16001 = vmatprep.mubr.f32.mxu1 %v18614_v13 }
 0x126   : > { %17109 = vmatprep.subr.msk.bf16.mxu1 %vm18337_vm12, %v18091_v30 }
 0x12a   : > { %15960 = vmatmul.mubr.f32.vlgmr.msra.gmra.mrb[6].mxu0 %v18618_v17 }
 0x12b   : > { %17087 = vmatpush3.bf16.msk.msra.mxu0 %vm18464_vm6, %v18091_v30  ;;  %16008 = vmatprep.mubr.f32.mxu0 %v18663_v40 }
 0x12c   : > { %16002 = vmatmul.mubr.f32.vlgmr.msra.gmra.mrb[6].mxu1 %v18618_v17  ;;  %17089 = vmatprep.subr.bf16.mxu0 %v18494_v28 }
 0x12d   : > { %17111 = vmatpush3.bf16.msk.msra.mxu1 %vm18337_vm12, %v18091_v30  ;;  %16050 = vmatprep.mubr.f32.mxu1 %v4954_v60 }
 0x12e   : > { %16009 = vmatmul.mubr.f32.vlgmr.msra.gmra.mrb[8].mxu0 %v18666_v41  ;;  %17113 = vmatprep.subr.bf16.mxu1 %v18369_v47 }
 0x12f   : > { %17091 = vmatpush3.bf16.msra.mxu0 %v18494_v28  ;;  %16015 = vmatprep.mubr.f32.mxu0 %v18614_v13 }
 0x130   : > { %16051 = vmatmul.mubr.f32.vlgmr.msra.gmra.mrb[8].mxu1 %v4964_v61  ;;  %17093 = vmatprep.subr.bf16.mxu0 %v18504_v33 }
 0x131   : > { %17115 = vmatpush3.bf16.msra.mxu1 %v18369_v47  ;;  %16057 = vmatprep.mubr.f32.mxu1 %v18714_v45  ;;  %v7068_v47 = vstv %s18863_s26  ;;  %s19103_s26 = sld [smem:[#allocation6 + $0x8]] }
 0x132   : > { %17117 = vmatprep.subr.bf16.mxu1 %v18371_v49 }
 0x136   : > { %16016 = vmatmul.mubr.f32.vlgmr.msra.gmra.mrb[8].mxu0 %v18618_v17 }
 0x137   : > { %17095 = vmatpush3.bf16.msra.mxu0 %v18504_v33  ;;  %16022 = vmatprep.mubr.f32.mxu0 %v18623_v31 }
 0x138   : > { %16058 = vmatmul.mubr.f32.vlgmr.msra.gmra.mrb[8].mxu1 %v18724_v48  ;;  %17097 = vmatprep.subr.msk.bf16.mxu0 %vm18464_vm6, %v18091_v30 }
 0x139   : > { %17119 = vmatpush3.bf16.msra.mxu1 %v18371_v49  ;;  %16064 = vmatprep.mubr.f32.mxu1 %v18729_v52  ;;  %v7744_v49 = vstv %s18866_s7  ;;  %s19105_s7 = sld [smem:[#allocation6 + $0xf]] }
 0x13a   : > { %17121 = vmatprep.subr.msk.bf16.mxu1 %vm18337_vm12, %v18091_v30 }
 0x13e   : > { %16023 = vmatmul.mubr.f32.vlgmr.msra.gmra.mrb[8].mxu0 %v18635_v35 }
 0x13f   : > { %17099 = vmatpush3.bf16.msk.msra.mxu0 %vm18464_vm6, %v18091_v30  ;;  %16029 = vmatprep.mubr.f32.mxu0 %v18638_v36 }
 0x140   : > { %16065 = vmatmul.mubr.f32.vlgmr.msra.gmra.mrb[8].mxu1 %v18735_v54  ;;  %17101 = vmatprep.subr.bf16.mxu0 %v18529_v24 }
 0x141   : > { %17123 = vmatpush3.bf16.msk.msra.mxu1 %vm18337_vm12, %v18091_v30  ;;  %16071 = vmatprep.mubr.f32.mxu1 %v18738_v56 }
 0x142   : > { %17125 = vmatprep.subr.bf16.mxu1 %v18400_v53 }
 0x146   : > { %16030 = vmatmul.mubr.f32.vlgmr.msra.gmra.mrb[8].mxu0 %v18642_v37 }
 0x147   : > { %17103 = vmatpush3.bf16.msra.mxu0 %v18529_v24  ;;  %16036 = vmatprep.mubr.f32.mxu0 %v18614_v13 }
 0x148   : > { %16072 = vmatmul.mubr.f32.vlgmr.msra.gmra.mrb[8].mxu1 %v18750_v57  ;;  %17105 = vmatprep.subr.msk.bf16.mxu0 %vm18464_vm6, %v18091_v30 }
 0x149   : > { %17127 = vmatpush3.bf16.msra.mxu1 %v18400_v53  ;;  %16078 = vmatprep.mubr.f32.mxu1 %v18714_v45  ;;  %v9755_v53 = vstv %s18876_s30  ;;  %s19111_s30 = sld [smem:[#allocation6 + $0x4a]] }
 0x14a   : > { %17129 = vmatprep.subr.msk.bf16.mxu1 %vm18337_vm12, %v18091_v30 }
 0x14e   : > { %16037 = vmatmul.mubr.f32.vlgmr.msra.gmra.mrb[8].mxu0 %v18618_v17 }
 0x14f   : > { %17107 = vmatpush3.bf16.msk.msra.mxu0 %vm18464_vm6, %v18091_v30  ;;  %16043 = vmatprep.mubr.f32.mxu0 %v18614_v13 }
 0x150   : > { %16079 = vmatmul.mubr.f32.vlgmr.msra.gmra.mrb[8].mxu1 %v18724_v48  ;;  %17133 = vmatprep.subr.msk.bf16.mxu0 %vm18350_vm14, %v18091_v30 }
 0x151   : > { %17131 = vmatpush3.bf16.msk.msra.mxu1 %vm18337_vm12, %v18091_v30  ;;  %16085 = vmatprep.mubr.f32.mxu1 %v18714_v45 }
 0x152   : > { %17157 = vmatprep.subr.msk.bf16.mxu1 %vm18464_vm6, %v18091_v30 }
 0x156   : > { %16044 = vmatmul.mubr.f32.vlgmr.msra.gmra.mrb[8].mxu0 %v18618_v17 }
 0x157   : > { %17135 = vmatpush3.bf16.msk.msra.mxu0 %vm18350_vm14, %v18091_v30  ;;  %16092 = vmatprep.mubr.f32.mxu0 %v4954_v60 }
 0x158   : > { %16086 = vmatmul.mubr.f32.vlgmr.msra.gmra.mrb[8].mxu1 %v18724_v48  ;;  %17137 = vmatprep.subr.bf16.mxu0 %v18374_v50 }
 0x159   : > { %17159 = vmatpush3.bf16.msk.msra.mxu1 %vm18464_vm6, %v18091_v30  ;;  %16134 = vmatprep.mubr.f32.mxu1 %v4954_v60 }
 0x15a   : > { %16093 = vmatmul.mubr.f32.vlgmr.msra.gmra.mrb[10].mxu0 %v4964_v61  ;;  %17161 = vmatprep.subr.bf16.mxu1 %v18494_v28 }
 0x15b   : > { %17139 = vmatpush3.bf16.msra.mxu0 %v18374_v50  ;;  %16099 = vmatprep.mubr.f32.mxu0 %v18714_v45  ;;  %v8427_v50 = vstv %s18868_s28  ;;  %s19107_s28 = sld [smem:[#allocation6 + $0x2c]] }
 0x15c   : > { %16135 = vmatmul.mubr.f32.vlgmr.msra.gmra.mrb[10].mxu1 %v4964_v61  ;;  %17141 = vmatprep.subr.bf16.mxu0 %v18376_v51 }
 0x15d   : > { %17163 = vmatpush3.bf16.msra.mxu1 %v18494_v28  ;;  %16141 = vmatprep.mubr.f32.mxu1 %v18714_v45  ;;  %v12431_v28 = vstv %s18917_s14  ;;  %s19095_s14 = sld [smem:[#allocation6 + $0x5]] }
 0x15e   : > { %17165 = vmatprep.subr.bf16.mxu1 %v18504_v33 }
 0x162   : > { %16100 = vmatmul.mubr.f32.vlgmr.msra.gmra.mrb[10].mxu0 %v18724_v48 }
 0x163   : > { %17143 = vmatpush3.bf16.msra.mxu0 %v18376_v51  ;;  %16106 = vmatprep.mubr.f32.mxu0 %v18729_v52  ;;  %v9091_v51 = vstv %s18874_s4  ;;  %s19109_s4 = sld [smem:[#allocation6 + $0x33]] }
 0x164   : > { %16142 = vmatmul.mubr.f32.vlgmr.msra.gmra.mrb[10].mxu1 %v18724_v48  ;;  %17145 = vmatprep.subr.msk.bf16.mxu0 %vm18350_vm14, %v18091_v30 }
 0x165   : > { %17167 = vmatpush3.bf16.msra.mxu1 %v18504_v33  ;;  %16148 = vmatprep.mubr.f32.mxu1 %v18729_v52  ;;  %v13095_v33 = vstv %s18921_s13  ;;  %s19093_s13 = sld [smem:[#allocation6 + $0x2d]] }
 0x166   : > { %17169 = vmatprep.subr.msk.bf16.mxu1 %vm18464_vm6, %v18091_v30 }
 0x16a   : > { %16107 = vmatmul.mubr.f32.vlgmr.msra.gmra.mrb[10].mxu0 %v18735_v54 }
 0x16b   : > { %17147 = vmatpush3.bf16.msk.msra.mxu0 %vm18350_vm14, %v18091_v30  ;;  %16113 = vmatprep.mubr.f32.mxu0 %v18738_v56 }
 0x16c   : > { %16149 = vmatmul.mubr.f32.vlgmr.msra.gmra.mrb[10].mxu1 %v18735_v54  ;;  %17149 = vmatprep.subr.bf16.mxu0 %v18407_v55 }
 0x16d   : > { %17171 = vmatpush3.bf16.msk.msra.mxu1 %vm18464_vm6, %v18091_v30  ;;  %16155 = vmatprep.mubr.f32.mxu1 %v18738_v56 }
 0x16e   : > { %17173 = vmatprep.subr.bf16.mxu1 %v18529_v24 }
 0x172   : > { %16114 = vmatmul.mubr.f32.vlgmr.msra.gmra.mrb[10].mxu0 %v18750_v57 }
 0x173   : > { %17151 = vmatpush3.bf16.msra.mxu0 %v18407_v55  ;;  %16120 = vmatprep.mubr.f32.mxu0 %v18714_v45  ;;  %v10426_v55 = vstv %s18880_s11  ;;  %s19113_s11 = sld [smem:[#allocation6 + $0x51]] }
 0x174   : > { %16156 = vmatmul.mubr.f32.vlgmr.msra.gmra.mrb[10].mxu1 %v18750_v57  ;;  %17153 = vmatprep.subr.msk.bf16.mxu0 %vm18350_vm14, %v18091_v30 }
 0x175   : > { %17175 = vmatpush3.bf16.msra.mxu1 %v18529_v24  ;;  %16162 = vmatprep.mubr.f32.mxu1 %v18714_v45  ;;  %v13759_v24 = vstv %s18923_s18  ;;  %s19097_s18 = sld [smem:[#allocation6 + $0xc]] }
 0x176   : > { %17177 = vmatprep.subr.msk.bf16.mxu1 %vm18464_vm6, %v18091_v30 }
 0x179   : > { %v15709_v1 = vpop.f32.mrb[0].mxu0 }
 0x17a   : > { %v18951_v20 = vpop.f32.mrb[1].mxu0  ;;  %16121 = vmatmul.mubr.f32.vlgmr.msra.gmra.mrb[10].mxu0 %v18724_v48  ;;  %v6394_v29 = vmul.f32 %v15709_v1, %v6392_v27  ;;  %v7070_v32 = vmul.f32 %v15709_v1, %v7068_v47  ;;  %v7746_v8 = vmul.f32 %v15709_v1, %v7744_v49  ;;  %v8429_v12 = vmul.f32 %v15709_v1, %v8427_v50 }
 0x17b   : > { %v15751_v21 = vpop.f32.mrb[0].mxu1  ;;  %17155 = vmatpush3.bf16.msk.msra.mxu0 %vm18350_vm14, %v18091_v30  ;;  %v9093_v13 = vmul.f32 %v15709_v1, %v9091_v51  ;;  %v9757_v16 = vmul.f32 %v15709_v1, %v9755_v53  ;;  %v10428_v34 = vmul.f32 %v15709_v1, %v10426_v55  ;;  %v11092_v17 = vmul.f32 %v15709_v1, %v11090_v62 }
 0x17c   : > { %v18963_v7 = vpop.f32.mrb[1].mxu1  ;;  %16163 = vmatmul.mubr.f32.vlgmr.msra.gmra.mrb[10].mxu1 %v18724_v48  ;;  %v18977_v31 = vmul.f32 %v15709_v1, %v11754_v63  ;;  %v12427_v35 = vmul.f32 %v15709_v1, %v12425_v0  ;;  %16127 = vmatprep.mubr.f32.mxu0 %v18714_v45  ;;  %v13091_v36 = vmul.f32 %v15709_v1, %v13089_v2 }
 0x17d   : > { %17179 = vmatpush3.bf16.msk.msra.mxu1 %vm18464_vm6, %v18091_v30  ;;  %v18986_v37 = vmul.f32 %v15709_v1, %v13753_v3  ;;  %v6400_v18 = vmul.f32 %v15751_v21, %v6398_v4  ;;  %v7076_v30 = vmul.f32 %v15751_v21, %v7074_v10  ;;  %16169 = vmatprep.mubr.f32.mxu1 %v18714_v45 }
 0x17e   : > { %v7752_v38 = vmul.f32 %v15751_v21, %v7750_v11  ;;  %v8435_v39 = vmul.f32 %v15751_v21, %v8433_v14  ;;  %v9099_v40 = vmul.f32 %v15751_v21, %v9097_v15  ;;  %v9763_v41 = vmul.f32 %v15751_v21, %v9761_v19 }
 0x17f   : > { %v10434_v42 = vmul.f32 %v15751_v21, %v10432_v23  ;;  %v11098_v43 = vmul.f32 %v15751_v21, %v11096_v25  ;;  %v11762_v44 = vmul.f32 %v15751_v21, %v11760_v26  ;;  %v12433_v46 = vmul.f32 %v15751_v21, %v12431_v28 }
 0x180   : > { %v13097_v52 = vmul.f32 %v15751_v21, %v13095_v33  ;;  %v13761_v54 = vmul.f32 %v15751_v21, %v13759_v24  ;;  %v6393_v56 = vmul.f32 %v6392_v27, %v18951_v20  ;;  %v8428_v57 = vmul.f32 %v8427_v50, %v18951_v20 }
 0x181   : > { %v7069_v45 = vmul.f32 %v7068_v47, %v18951_v20  ;;  %v6399_v58 = vmul.f32 %v6398_v4, %v18963_v7  ;;  %v7075_v59 = vmul.f32 %v7074_v10, %v18963_v7  ;;  %v8434_v60 = vmul.f32 %v8433_v14, %v18963_v7 }
 0x182   : > { %16128 = vmatmul.mubr.f32.vlgmr.msra.gmra.mrb[10].mxu0 %v18724_v48  ;;  %v7745_v61 = vmul.f32 %v7744_v49, %v18951_v20  ;;  %v9092_v1 = vmul.f32 %v9091_v51, %v18951_v20  ;;  %v9756_v27 = vmul.f32 %v9755_v53, %v18951_v20  ;;  %v9098_v50 = vmul.f32 %v9097_v15, %v18963_v7 }
 0x183   : > { %v10427_v47 = vmul.f32 %v10426_v55, %v18951_v20  ;;  %v11091_v4 = vmul.f32 %v11090_v62, %v18951_v20  ;;  %v7751_v10 = vmul.f32 %v7750_v11, %v18963_v7  ;;  %v9762_v14 = vmul.f32 %v9761_v19, %v18963_v7 }
 0x184   : > { %16170 = vmatmul.mubr.f32.vlgmr.msra.gmra.mrb[10].mxu1 %v18724_v48  ;;  %v19015_v49 = vadd.f32 %v6399_v58, %v6393_v56  ;;  %v19017_v51 = vadd.f32 %v6400_v18, %v6394_v29  ;;  %v19019_v53 = vadd.f32 %v8434_v60, %v8428_v57  ;;  %v19021_v48 = vadd.f32 %v8435_v39, %v8429_v12 }
 0x185   : > { %v12426_v55 = vmul.f32 %v12425_v0, %v18951_v20  ;;  %v10433_v62 = vmul.f32 %v10432_v23, %v18963_v7  ;;  %v19027_v11 = vadd.f32 %v7075_v59, %v7069_v45  ;;  %v19029_v15 = vadd.f32 %v7076_v30, %v7070_v32 }
 0x186   : > { %v11097_v19 = vmul.f32 %v11096_v25, %v18963_v7  ;;  %v12432_v21 = vmul.f32 %v12431_v28, %v18963_v7  ;;  %v19033_v29 = vadd.f32 %v9098_v50, %v9092_v1  ;;  %v19035_v18 = vadd.f32 %v9099_v40, %v9093_v13 }
 0x187   : > { %v13090_v12 = vmul.f32 %v13089_v2, %v18951_v20  ;;  %v13096_v0 = vmul.f32 %v13095_v33, %v18963_v7  ;;  %v19041_v39 = vadd.f32 %v7751_v10, %v7745_v61  ;;  %v19043_v23 = vadd.f32 %v7752_v38, %v7746_v8 }
 0x188   : > { %v11755_v32 = vmul.f32 %v11754_v63, %v18951_v20  ;;  %v11761_v25 = vmul.f32 %v11760_v26, %v18963_v7  ;;  %v19051_v28 = vadd.f32 %v9762_v14, %v9756_v27  ;;  %v19053_v30 = vadd.f32 %v9763_v41, %v9757_v16 }
 0x189   : > { %v13754_v13 = vmul.f32 %v13753_v3, %v18951_v20  ;;  %v13760_v2 = vmul.f32 %v13759_v24, %v18963_v7  ;;  %v19061_v33 = vadd.f32 %v10433_v62, %v10427_v47  ;;  %v19063_v8 = vadd.f32 %v10434_v42, %v10428_v34 }
 0x18a   : > { %v19065_v38 = vadd.f32 %v12432_v21, %v12426_v55  ;;  %v19067_v63 = vadd.f32 %v12433_v46, %v12427_v35  ;;  %v19069_v40 = vadd.f32 %v11097_v19, %v11091_v4  ;;  %v19071_v26 = vadd.f32 %v11098_v43, %v11092_v17 }
 0x18b   : > { %v19073_v16 = vadd.f32 %v13096_v0, %v13090_v12  ;;  %v19075_v41 = vadd.f32 %v13097_v52, %v13091_v36  ;;  %v19077_v3 = vadd.f32 %v11761_v25, %v11755_v32  ;;  %v19080_v20 = vadd.f32 %v11762_v44, %v18977_v31 }
 0x18c   : > { %v19082_v24 = vadd.f32 %v13760_v2, %v13754_v13  ;;  %v19085_v7 = vadd.f32 %v13761_v54, %v18986_v37  ;;  %v6404_v34 = vstv %s19087_s0  ;;  %v6410_v17 = vstv %s19089_s1  ;;  %s19291_s0 = sld [smem:[#allocation6 + $0xa]]  ;;  %s19297_s1 = sld [smem:[#allocation6 + $0xb]] }
 0x18d   : > { %v8439_v31 = vstv %s19091_s2  ;;  %v8445_v35 = vstv %s19093_s13  ;;  %v7080_v36 = vstv %s19095_s14  ;;  %v7086_v37 = vstv %s19097_s18  ;;  %s19299_s2 = sld [smem:[#allocation6 + $0x2e]]  ;;  %s19301_s13 = sld [smem:[#allocation6 + $0x2f]] }
 0x18e   : > { %v9103_v42 = vstv %s19099_s21  ;;  %v9109_v43 = vstv %s19101_s23  ;;  %v7756_v44 = vstv %s19103_s26  ;;  %v7762_v46 = vstv %s19105_s7  ;;  %s19303_s14 = sld [smem:[#allocation6 + $0xd]]  ;;  %s19305_s18 = sld [smem:[#allocation6 + $0xe]] }
 0x18f   : > { %v9767_v52 = vstv %s19107_s28  ;;  %v9773_v56 = vstv %s19109_s4  ;;  %v10438_v57 = vstv %s19111_s30  ;;  %v10444_v45 = vstv %s19113_s11  ;;  %s14739_s21 = sld [smem:[#allocation6 + $0x31]]  ;;  %s19307_s23 = sld [smem:[#allocation6 + $0x32]] }
 0x190   : > { %v12437_v58 = vstv %s19115_s17  ;;  %s19309_s26 = sld [smem:[#allocation6 + $0x10]]  ;;  %s19311_s7 = sld [smem:[#allocation6 + $0x11]] }
 0x191   : > { %s19313_s28 = sld [smem:[#allocation6 + $0x34]]  ;;  %s19315_s4 = sld [smem:[#allocation6 + $0x35]] }
 0x192   : > { %s19317_s30 = sld [smem:[#allocation6 + $0x52]]  ;;  %s19367_s11 = sld [smem:[#allocation6 + $0x53]] }
 0x193   : > { %s19385_s17 = sld [smem:[#allocation6 + $0x76]] }
 0x1a5   : > { %v19128_v54 = vpop.f32.mrb[2].mxu0 }
 0x1a6   : > { %v19134_v59 = vpop.f32.mrb[3].mxu0  ;;  %v6406_v60 = vmul.f32 %v19128_v54, %v6404_v34  ;;  %v8441_v61 = vmul.f32 %v19128_v54, %v8439_v31  ;;  %v7082_v1 = vmul.f32 %v19128_v54, %v7080_v36  ;;  %v9105_v27 = vmul.f32 %v19128_v54, %v9103_v42 }
 0x1a7   : > { %v19140_v50 = vpop.f32.mrb[2].mxu1  ;;  %v6405_v47 = vmul.f32 %v6404_v34, %v19134_v59  ;;  %v8440_v4 = vmul.f32 %v8439_v31, %v19134_v59  ;;  %v7081_v10 = vmul.f32 %v7080_v36, %v19134_v59  ;;  %v9104_v14 = vmul.f32 %v9103_v42, %v19134_v59 }
 0x1a8   : > { %v19146_v55 = vpop.f32.mrb[3].mxu1  ;;  %v6408_v62 = vadd.f32 %v6406_v60, %v19017_v51  ;;  %v6412_v19 = vmul.f32 %v19140_v50, %v6410_v17  ;;  %v8443_v21 = vadd.f32 %v8441_v61, %v19021_v48  ;;  %v8447_v12 = vmul.f32 %v19140_v50, %v8445_v35 }
 0x1a9   : > { %v6407_v0 = vadd.f32 %v6405_v47, %v19015_v49  ;;  %v6411_v32 = vmul.f32 %v6410_v17, %v19146_v55  ;;  %v8442_v25 = vadd.f32 %v8440_v4, %v19019_v53  ;;  %v8446_v13 = vmul.f32 %v8445_v35, %v19146_v55 }
 0x1aa   : > { %v19156_v2 = vadd.f32 %v6412_v19, %v6408_v62  ;;  %v19158_v34 = vadd.f32 %v8447_v12, %v8443_v21  ;;  %v7083_v51 = vadd.f32 %v7081_v10, %v19027_v11  ;;  %v7084_v31 = vadd.f32 %v7082_v1, %v19029_v15 }
 0x1ab   : > { %v19162_v36 = vadd.f32 %v6411_v32, %v6407_v0  ;;  %v19164_v48 = vadd.f32 %v8446_v13, %v8442_v25  ;;  %v7087_v49 = vmul.f32 %v7086_v37, %v19146_v55  ;;  %v7088_v17 = vmul.f32 %v19140_v50, %v7086_v37 }
 0x1ac   : > { %v9106_v53 = vadd.f32 %v9104_v14, %v19033_v29  ;;  %v9107_v35 = vadd.f32 %v9105_v27, %v19035_v18  ;;  %v9110_v42 = vmul.f32 %v9109_v43, %v19146_v55  ;;  %v9111_v60 = vmul.f32 %v19140_v50, %v9109_v43 }
 0x1ad   : > { %v19176_v11 = vadd.f32 %v7087_v49, %v7083_v51  ;;  %v19178_v15 = vadd.f32 %v7088_v17, %v7084_v31  ;;  %v7757_v61 = vmul.f32 %v7756_v44, %v19134_v59  ;;  %v7758_v37 = vmul.f32 %v19128_v54, %v7756_v44 }
 0x1ae   : > { %v19186_v29 = vadd.f32 %v9110_v42, %v9106_v53  ;;  %v19188_v18 = vadd.f32 %v9111_v60, %v9107_v35  ;;  %v7763_v43 = vmul.f32 %v7762_v46, %v19146_v55  ;;  %v7764_v1 = vmul.f32 %v19140_v50, %v7762_v46 }
 0x1af   : > { %v7759_v27 = vadd.f32 %v7757_v61, %v19041_v39  ;;  %v7760_v44 = vadd.f32 %v7758_v37, %v19043_v23  ;;  %v9768_v47 = vmul.f32 %v9767_v52, %v19134_v59  ;;  %v9769_v4 = vmul.f32 %v19128_v54, %v9767_v52 }
 0x1b0   : > { %v9774_v10 = vmul.f32 %v9773_v56, %v19146_v55  ;;  %v9775_v14 = vmul.f32 %v19140_v50, %v9773_v56  ;;  %v10439_v46 = vmul.f32 %v10438_v57, %v19134_v59  ;;  %v10440_v62 = vmul.f32 %v19128_v54, %v10438_v57 }
 0x1b1   : > { %v19208_v39 = vadd.f32 %v7763_v43, %v7759_v27  ;;  %v19210_v23 = vadd.f32 %v7764_v1, %v7760_v44  ;;  %v9770_v52 = vadd.f32 %v9768_v47, %v19051_v28  ;;  %v9771_v56 = vadd.f32 %v9769_v4, %v19053_v30 }
 0x1b2   : > { %v10441_v57 = vadd.f32 %v10439_v46, %v19061_v33  ;;  %v10442_v19 = vadd.f32 %v10440_v62, %v19063_v8  ;;  %v10445_v21 = vmul.f32 %v10444_v45, %v19146_v55  ;;  %v10446_v12 = vmul.f32 %v19140_v50, %v10444_v45 }
 0x1b3   : > { %v19222_v0 = vadd.f32 %v9774_v10, %v9770_v52  ;;  %v19224_v32 = vadd.f32 %v9775_v14, %v9771_v56  ;;  %v12443_v30 = vstv %s19172_s10  ;;  %v12438_v33 = vmul.f32 %v12437_v58, %v19134_v59  ;;  %s19415_s10 = sld [smem:[#allocation6 + $0x77]] }
 0x1b4   : > { %v19226_v28 = vadd.f32 %v10445_v21, %v10441_v57  ;;  %v19228_v25 = vadd.f32 %v10446_v12, %v10442_v19  ;;  %v12439_v8 = vmul.f32 %v19128_v54, %v12437_v58  ;;  %v11102_v13 = vstv %s19174_s19  ;;  %s19417_s19 = sld [smem:[#allocation6 + $0x55]] }
 0x1b5   : > { %v11108_v45 = vstv %s19182_s20  ;;  %v13101_v51 = vstv %s19184_s22  ;;  %v13107_v31 = vstv %s19192_s27  ;;  %v11766_v49 = vstv %s19194_s29  ;;  %s19428_s20 = sld [smem:[#allocation6 + $0x56]]  ;;  %s19434_s22 = sld [smem:[#allocation6 + $0x79]] }
 0x1b6   : > { %v12440_v17 = vadd.f32 %v12438_v33, %v19065_v38  ;;  %v12441_v53 = vadd.f32 %v12439_v8, %v19067_v63  ;;  %v12444_v35 = vmul.f32 %v12443_v30, %v19146_v55  ;;  %v12445_v42 = vmul.f32 %v19140_v50, %v12443_v30  ;;  %s19438_s27 = sld [smem:[#allocation6 + $0x7a]]  ;;  %s19442_s29 = sld [smem:[#allocation6 + $0x58]] }
 0x1b7   : > { %v11103_v60 = vmul.f32 %v11102_v13, %v19134_v59  ;;  %v11104_v61 = vmul.f32 %v19128_v54, %v11102_v13  ;;  %v11772_v58 = vstv %s19204_s6  ;;  %v13765_v37 = vstv %s19206_s8  ;;  %s19451_s6 = sld [smem:[#allocation6 + $0x59]]  ;;  %s19453_s8 = sld [smem:[#allocation6 + $0x12]] }
 0x1b8   : > { %v19252_v43 = vadd.f32 %v12444_v35, %v12440_v17  ;;  %v19254_v1 = vadd.f32 %v12445_v42, %v12441_v53  ;;  %v13102_v27 = vmul.f32 %v13101_v51, %v19134_v59  ;;  %v13103_v38 = vmul.f32 %v19128_v54, %v13101_v51 }
 0x1b9   : > { %v11105_v63 = vadd.f32 %v11103_v60, %v19069_v40  ;;  %v11106_v44 = vadd.f32 %v11104_v61, %v19071_v26  ;;  %v11109_v47 = vmul.f32 %v11108_v45, %v19146_v55  ;;  %v11110_v4 = vmul.f32 %v19140_v50, %v11108_v45 }
 0x1ba   : > { %v13104_v10 = vadd.f32 %v13102_v27, %v19073_v16  ;;  %v13105_v14 = vadd.f32 %v13103_v38, %v19075_v41  ;;  %v13108_v46 = vmul.f32 %v13107_v31, %v19146_v55  ;;  %v13109_v62 = vmul.f32 %v19140_v50, %v13107_v31 }
 0x1bb   : > { %v19266_v52 = vadd.f32 %v11109_v47, %v11105_v63  ;;  %v19268_v56 = vadd.f32 %v11110_v4, %v11106_v44  ;;  %v11767_v40 = vmul.f32 %v11766_v49, %v19134_v59  ;;  %v11768_v26 = vmul.f32 %v19128_v54, %v11766_v49 }
 0x1bc   : > { %v19272_v57 = vadd.f32 %v13108_v46, %v13104_v10  ;;  %v19274_v19 = vadd.f32 %v13109_v62, %v13105_v14  ;;  %v13771_v21 = vstv %s19238_s9  ;;  %v11773_v12 = vmul.f32 %v11772_v58, %v19146_v55  ;;  %s19458_s9 = sld [smem:[#allocation6 + $0x13]] }
 0x1bd   : > { %v11769_v16 = vadd.f32 %v11767_v40, %v19077_v3  ;;  %v11770_v41 = vadd.f32 %v11768_v26, %v19080_v20  ;;  %v11774_v30 = vmul.f32 %v19140_v50, %v11772_v58  ;;  %v13766_v33 = vmul.f32 %v13765_v37, %v19134_v59 }
 0x1be   : > { %v13767_v8 = vmul.f32 %v19128_v54, %v13765_v37  ;;  %v13772_v3 = vmul.f32 %v13771_v21, %v19146_v55  ;;  %v13773_v20 = vmul.f32 %v19140_v50, %v13771_v21  ;;  %v8451_v54 = vstv %s19299_s2  ;;  %s19470_s2 = sld [smem:[#allocation6 + $0x7d]] }
 0x1bf   : > { %v19283_v13 = vadd.f32 %v11773_v12, %v11769_v16  ;;  %v19285_v45 = vadd.f32 %v11774_v30, %v11770_v41  ;;  %v13768_v51 = vadd.f32 %v13766_v33, %v19082_v24  ;;  %v6416_v24 = vstv %s19291_s0  ;;  %s19461_s0 = sld [smem:[#allocation6 + $0x7c]] }
 0x1c0   : > { %v13769_v31 = vadd.f32 %v13767_v8, %v19085_v7  ;;  %v6422_v7 = vstv %s19297_s1  ;;  %v7092_v50 = vstv %s19303_s14  ;;  %v9115_v55 = vstv %s14739_s21  ;;  %s19463_s1 = sld [smem:[#allocation6 + $0x36]]  ;;  %s19474_s14 = sld [smem:[#allocation6 + $0x15]] }
 0x1c1   : > { %v19293_v49 = vadd.f32 %v13772_v3, %v13768_v51  ;;  %v8457_v17 = vstv %s19301_s13  ;;  %v7098_v53 = vstv %s19305_s18  ;;  %v9121_v35 = vstv %s19307_s23  ;;  %s19472_s13 = sld [smem:[#allocation6 + $0x37]]  ;;  %s19481_s18 = sld [smem:[#allocation6 + $0x16]] }
 0x1c2   : > { %v19295_v59 = vadd.f32 %v13773_v20, %v13769_v31  ;;  %v7768_v42 = vstv %s19309_s26  ;;  %v7774_v61 = vstv %s19311_s7  ;;  %v9779_v58 = vstv %s19313_s28  ;;  %s19483_s21 = sld [smem:[#allocation6 + $0x39]]  ;;  %s19489_s23 = sld [smem:[#allocation6 + $0x3a]] }
 0x1c3   : > { %v9785_v37 = vstv %s19315_s4  ;;  %v10450_v27 = vstv %s19317_s30  ;;  %s19491_s26 = sld [smem:[#allocation6 + $0x18]]  ;;  %s19496_s7 = sld [smem:[#allocation6 + $0x19]] }
 0x1c4   : > { %s19498_s28 = sld [smem:[#allocation6 + $0x3c]]  ;;  %s19504_s4 = sld [smem:[#allocation6 + $0x3d]] }
 0x1c5   : > { %s19506_s30 = sld [smem:[#allocation6 + $0x5a]] }
 0x1d1   : > { %v19327_v60 = vpop.f32.mrb[4].mxu0 }
 0x1d2   : > { %v19333_v38 = vpop.f32.mrb[5].mxu0  ;;  %v6418_v63 = vmul.f32 %v19327_v60, %v6416_v24  ;;  %v8453_v44 = vmul.f32 %v19327_v60, %v8451_v54  ;;  %v7094_v47 = vmul.f32 %v19327_v60, %v7092_v50  ;;  %v9117_v4 = vmul.f32 %v19327_v60, %v9115_v55 }
 0x1d3   : > { %v19339_v10 = vpop.f32.mrb[4].mxu1  ;;  %v6417_v14 = vmul.f32 %v6416_v24, %v19333_v38  ;;  %v8452_v46 = vmul.f32 %v8451_v54, %v19333_v38  ;;  %v7093_v62 = vmul.f32 %v7092_v50, %v19333_v38  ;;  %v9116_v40 = vmul.f32 %v9115_v55, %v19333_v38 }
 0x1d4   : > { %v19345_v26 = vpop.f32.mrb[5].mxu1  ;;  %v6420_v21 = vadd.f32 %v6418_v63, %v19156_v2  ;;  %v6424_v16 = vmul.f32 %v19339_v10, %v6422_v7  ;;  %v8455_v41 = vadd.f32 %v8453_v44, %v19158_v34  ;;  %v8459_v12 = vmul.f32 %v19339_v10, %v8457_v17 }
 0x1d5   : > { %v6419_v30 = vadd.f32 %v6417_v14, %v19162_v36  ;;  %v6423_v33 = vmul.f32 %v6422_v7, %v19345_v26  ;;  %v8454_v8 = vadd.f32 %v8452_v46, %v19164_v48  ;;  %v8458_v51 = vmul.f32 %v8457_v17, %v19345_v26 }
 0x1d6   : > { %v19355_v31 = vadd.f32 %v6424_v16, %v6420_v21  ;;  %v19357_v3 = vadd.f32 %v8459_v12, %v8455_v41  ;;  %v7095_v2 = vadd.f32 %v7093_v62, %v19176_v11  ;;  %v7096_v20 = vadd.f32 %v7094_v47, %v19178_v15 }
 0x1d7   : > { %v19361_v24 = vadd.f32 %v6423_v33, %v6419_v30  ;;  %v19363_v34 = vadd.f32 %v8458_v51, %v8454_v8  ;;  %v7099_v36 = vmul.f32 %v7098_v53, %v19345_v26  ;;  %v7100_v7 = vmul.f32 %v19339_v10, %v7098_v53 }
 0x1d8   : > { %v9118_v48 = vadd.f32 %v9116_v40, %v19186_v29  ;;  %v9119_v54 = vadd.f32 %v9117_v4, %v19188_v18  ;;  %v9122_v50 = vmul.f32 %v9121_v35, %v19345_v26  ;;  %v9123_v11 = vmul.f32 %v19339_v10, %v9121_v35 }
 0x1d9   : > { %v19373_v55 = vadd.f32 %v7099_v36, %v7095_v2  ;;  %v19375_v15 = vadd.f32 %v7100_v7, %v7096_v20  ;;  %v7769_v17 = vmul.f32 %v7768_v42, %v19333_v38  ;;  %v7770_v63 = vmul.f32 %v19327_v60, %v7768_v42 }
 0x1da   : > { %v19379_v44 = vadd.f32 %v9122_v50, %v9118_v48  ;;  %v19381_v53 = vadd.f32 %v9123_v11, %v9119_v54  ;;  %v7775_v29 = vmul.f32 %v7774_v61, %v19345_v26  ;;  %v7776_v18 = vmul.f32 %v19339_v10, %v7774_v61 }
 0x1db   : > { %v7771_v35 = vadd.f32 %v7769_v17, %v19208_v39  ;;  %v7772_v47 = vadd.f32 %v7770_v63, %v19210_v23  ;;  %v9780_v4 = vmul.f32 %v9779_v58, %v19333_v38  ;;  %v9781_v14 = vmul.f32 %v19327_v60, %v9779_v58 }
 0x1dc   : > { %v9786_v42 = vmul.f32 %v9785_v37, %v19345_v26  ;;  %v9787_v46 = vmul.f32 %v19339_v10, %v9785_v37  ;;  %v10451_v62 = vmul.f32 %v10450_v27, %v19333_v38  ;;  %v10452_v40 = vmul.f32 %v19327_v60, %v10450_v27 }
 0x1dd   : > { %v19395_v61 = vadd.f32 %v7775_v29, %v7771_v35  ;;  %v19397_v21 = vadd.f32 %v7776_v18, %v7772_v47  ;;  %v9782_v39 = vadd.f32 %v9780_v4, %v19222_v0  ;;  %v9783_v23 = vadd.f32 %v9781_v14, %v19224_v32 }
 0x1de   : > { %v19402_v16 = vmul.u32 2, %v18277_v6  ;;  %v10453_v58 = vadd.f32 %v10451_v62, %v19226_v28  ;;  %v10454_v37 = vadd.f32 %v10452_v40, %v19228_v25  ;;  %v10456_v27 = vstv %s19367_s11  ;;  %s19512_s11 = sld [smem:[#allocation6 + $0x5b]] }
 0x1df   : > { %v19406_v41 = vadd.f32 %v9786_v42, %v9782_v39  ;;  %v19408_v12 = vadd.f32 %v9787_v46, %v9783_v23  ;;  %v238_v30 = vadd.s32 4294967295, %v18275_v5  ;;  %v10457_v6 = vmul.f32 %v10456_v27, %v19345_v26 }
 0x1e0   : > { %21342 = vst [vmem:[#allocation20_spill] sm:$0xff] %v19402_v16  ;;  %v19413_v33 = vadd.s32 2, %v19402_v16  ;;  %v12449_v0 = vstv %s19385_s17  ;;  %v10458_v8 = vmul.f32 %v19339_v10, %v10456_v27  ;;  %v12455_v48 = vstv %s19415_s10  ;;  %s19514_s17 = sld [smem:[#allocation6 + $0x7e]]  ;;  %s19521_s10 = sld [smem:[#allocation6 + $0x7f]] }
 0x1e1   : > { %vm243_vm7 = vcmp.ge.s32.totalorder %v238_v30, %v19402_v16  ;;  %v19426_v28 = vadd.f32 %v10457_v6, %v10453_v58  ;;  %v12450_v51 = vmul.f32 %v12449_v0, %v19333_v38  ;;  %v12451_v7 = vmul.f32 %v19327_v60, %v12449_v0 }
 0x1e2   : > { %21343 = vst [vmem:[#allocation21_spill] sm:$0xff] %v19413_v33  ;;  %vm248_vm8 = vcmp.lt.s32.totalorder %v238_v30, %v19413_v33  ;;  %v19440_v20 = vadd.f32 %v10458_v8, %v10454_v37  ;;  %v11114_v50 = vstv %s19417_s19  ;;  %v12456_v63 = vmul.f32 %v12455_v48, %v19345_v26  ;;  %s19523_s19 = sld [smem:[#allocation6 + $0x5d]] }
 0x1e3   : > { %vm252_vm9 = vmand %vm243_vm7, %vm248_vm8  ;;  %v12452_v54 = vadd.f32 %v12450_v51, %v19252_v43  ;;  %v12453_v17 = vadd.f32 %v12451_v7, %v19254_v1  ;;  %v12457_v29 = vmul.f32 %v19339_v10, %v12455_v48  ;;  %v11115_v18 = vmul.f32 %v11114_v50, %v19333_v38 }
 0x1e4   : > { %v19424_v32 = vsel %vm252_vm9, 1.0, %v21243_v22  ;;  %v11120_v35 = vstv %s19428_s20  ;;  %v13113_v47 = vstv %s19434_s22  ;;  %v11116_v14 = vmul.f32 %v19327_v60, %v11114_v50  ;;  %s19527_s20 = sld [smem:[#allocation6 + $0x5e]]  ;;  %s19533_s22 = sld [smem:[#allocation6 + $0x81]] }
 0x1e5   : > { %21344 = vst [vmem:[#allocation22_spill] sm:$0xff] %v19424_v32  ;;  %v6464_v25 = vsel %vm331_vm0, %v19424_v32, 0  ;;  %v19476_v1 = vadd.f32 %v12456_v63, %v12452_v54  ;;  %v19485_v4 = vadd.f32 %v12457_v29, %v12453_v17  ;;  %v13119_v42 = vstv %s19438_s27  ;;  %s19538_s27 = sld [smem:[#allocation6 + $0x82]] }
 0x1e6   : > { %v19436_v2 = vsub.f32 %v6464_v25, %v6464_v25  ;;  %v11117_v46 = vadd.f32 %v11115_v18, %v19266_v52  ;;  %v11121_v62 = vmul.f32 %v11120_v35, %v19345_v26  ;;  %v11778_v40 = vstv %s19442_s29  ;;  %s19542_s29 = sld [smem:[#allocation6 + $0x60]] }
 0x1e7   : > { %v11118_v39 = vadd.f32 %v11116_v14, %v19268_v56  ;;  %v11122_v23 = vmul.f32 %v19339_v10, %v11120_v35  ;;  %v13114_v58 = vmul.f32 %v13113_v47, %v19333_v38  ;;  %v13115_v37 = vmul.f32 %v19327_v60, %v13113_v47 }
 0x1e8   : > { %21345 = vst [vmem:[#allocation23_spill] sm:$0xff] %v19436_v2  ;;  %v19445_v36 = vand.u32 4294901760, %v19436_v2  ;;  %v19508_v52 = vadd.f32 %v11121_v62, %v11117_v46  ;;  %v13120_v27 = vmul.f32 %v13119_v42, %v19345_v26  ;;  %v11784_v30 = vstv %s19451_s6  ;;  %s19654_s6 = sld [smem:[#allocation6 + $0x61]] }
 0x1e9   : > { %v19516_v56 = vadd.f32 %v11122_v23, %v11118_v39  ;;  %v13116_v6 = vadd.f32 %v13114_v58, %v19272_v57  ;;  %v13117_v0 = vadd.f32 %v13115_v37, %v19274_v19  ;;  %v13121_v25 = vmul.f32 %v19339_v10, %v13119_v42 }
 0x1ea   : > { %21346 = vst [vmem:[#allocation24_spill] sm:$0xff] %v19445_v36  ;;  %v6545_v11 = vsub.f32 %v19436_v2, %v19445_v36  ;;  %v11779_v8 = vmul.f32 %v11778_v40, %v19333_v38  ;;  %v13777_v51 = vstv %s19461_s0  ;;  %v11780_v57 = vmul.f32 %v19327_v60, %v11778_v40  ;;  %s19734_s0 = sld [smem:[#allocation6 + $0x14]] }
 0x1eb   : > { %v19529_v7 = vadd.f32 %v13120_v27, %v13116_v6  ;;  %v19531_v48 = vadd.f32 %v13121_v25, %v13117_v0  ;;  %v13783_v19 = vstv %s19470_s2  ;;  %v6428_v54 = vstv %s19453_s8  ;;  %s19666_s8 = sld [smem:[#allocation6 + $0x84]]  ;;  %s19739_s2 = sld [smem:[#allocation6 + $0x38]] }
 0x1ec   : > { %v19465_v43 = vand.u32 4294901760, %v6545_v11  ;;  %v11781_v50 = vadd.f32 %v11779_v8, %v19283_v13  ;;  %v11785_v11 = vmul.f32 %v11784_v30, %v19345_v26  ;;  %v11782_v17 = vadd.f32 %v11780_v57, %v19285_v45 }
 0x1ed   : > { %v11786_v63 = vmul.f32 %v19339_v10, %v11784_v30  ;;  %v13778_v29 = vmul.f32 %v13777_v51, %v19333_v38  ;;  %v13779_v18 = vmul.f32 %v19327_v60, %v13777_v51  ;;  %v6434_v35 = vstv %s19458_s9  ;;  %s19704_s9 = sld [smem:[#allocation6 + $0x85]] }
 0x1ee   : > { %21347 = vst [vmem:[#allocation25_spill] sm:$0xff] %v19465_v43  ;;  %16176 = vmatprep.mubr.f32.mxu0 %v19465_v43  ;;  %16356 = vmatprep.mubr.f32.mxu1 %v19465_v43  ;;  %v8463_v13 = vstv %s19463_s1  ;;  %v19550_v47 = vadd.f32 %v11785_v11, %v11781_v50  ;;  %v13784_v14 = vmul.f32 %v13783_v19, %v19345_v26  ;;  %v8469_v46 = vstv %s19472_s13  ;;  %s19736_s1 = sld [smem:[#allocation6 + $0x1b]]  ;;  %s19741_s13 = sld [smem:[#allocation6 + $0x3f]] }
 0x1ef   : > { %v19553_v42 = vadd.f32 %v11786_v63, %v11782_v17  ;;  %v13780_v45 = vadd.f32 %v13778_v29, %v19293_v49  ;;  %v13781_v38 = vadd.f32 %v13779_v18, %v19295_v59  ;;  %v13785_v60 = vmul.f32 %v19339_v10, %v13783_v19 }
 0x1f0   : > { %v7104_v62 = vstv %s19474_s14  ;;  %v7110_v40 = vstv %s19481_s18  ;;  %v9127_v39 = vstv %s19483_s21  ;;  %v9133_v26 = vstv %s19489_s23  ;;  %s19749_s14 = sld [smem:[#allocation6 + $0x17]]  ;;  %s19751_s18 = sld [smem:[#allocation6 + $0x1e]] }
 0x1f1   : > { %v7780_v23 = vstv %s19491_s26  ;;  %v19564_v58 = vadd.f32 %v13784_v14, %v13780_v45  ;;  %v19566_v49 = vadd.f32 %v13785_v60, %v13781_v38  ;;  %v7786_v37 = vstv %s19496_s7  ;;  %s19754_s21 = sld [smem:[#allocation6 + $0x3b]]  ;;  %s19756_s23 = sld [smem:[#allocation6 + $0x42]] }
 0x1f2   : > { %v9791_v59 = vstv %s19498_s28  ;;  %v9797_v27 = vstv %s19504_s4  ;;  %v10462_v30 = vstv %s19506_s30  ;;  %s19759_s26 = sld [smem:[#allocation6 + $0x1a]]  ;;  %s19761_s7 = sld [smem:[#allocation6 + $0x21]]  ;;  %vm274_vm2 = vcmp.ge.s32.totalorder %v18275_v5, %v19402_v16 }
 0x1f3   : > { %s19764_s28 = sld [smem:[#allocation6 + $0x3e]]  ;;  %s19766_s4 = sld [smem:[#allocation6 + $0x45]]  ;;  %vm278_vm3 = vcmp.lt.s32.totalorder %v18275_v5, %v19413_v33  ;;  %vm275_vm4 = vcmp.ge.s32.totalorder %v18284_v9, %v19402_v16  ;;  %vm279_vm5 = vcmp.lt.s32.totalorder %v18284_v9, %v19413_v33 }
 0x1f4   : > { %s19769_s30 = sld [smem:[#allocation6 + $0x5c]] }
 0x1fd   : > { %v19576_v8 = vpop.f32.mrb[6].mxu0 }
 0x1fe   : > { %v19582_v11 = vpop.f32.mrb[7].mxu0  ;;  %v6430_v17 = vmul.f32 %v19576_v8, %v6428_v54  ;;  %v8465_v63 = vmul.f32 %v19576_v8, %v8463_v13  ;;  %v7106_v29 = vmul.f32 %v19576_v8, %v7104_v62  ;;  %v9129_v18 = vmul.f32 %v19576_v8, %v9127_v39 }
 0x1ff   : > { %v19588_v14 = vpop.f32.mrb[6].mxu1  ;;  %v6429_v45 = vmul.f32 %v6428_v54, %v19582_v11  ;;  %v8464_v38 = vmul.f32 %v8463_v13, %v19582_v11  ;;  %v7105_v60 = vmul.f32 %v7104_v62, %v19582_v11  ;;  %v9128_v22 = vmul.f32 %v9127_v39, %v19582_v11 }
 0x200   : > { %v19594_v50 = vpop.f32.mrb[7].mxu1  ;;  %v6432_v19 = vadd.f32 %v6430_v17, %v19355_v31  ;;  %v6436_v57 = vmul.f32 %v19588_v14, %v6434_v35  ;;  %v8467_v51 = vadd.f32 %v8465_v63, %v19357_v3  ;;  %v8471_v25 = vmul.f32 %v19588_v14, %v8469_v46 }
 0x201   : > { %v6431_v0 = vadd.f32 %v6429_v45, %v19361_v24  ;;  %v6435_v54 = vmul.f32 %v6434_v35, %v19594_v50  ;;  %v8466_v13 = vadd.f32 %v8464_v38, %v19363_v34  ;;  %v8470_v62 = vmul.f32 %v8469_v46, %v19594_v50 }
 0x202   : > { %v19604_v6 = vadd.f32 %v6436_v57, %v6432_v19  ;;  %v19606_v39 = vadd.f32 %v8471_v25, %v8467_v51  ;;  %v7107_v31 = vadd.f32 %v7105_v60, %v19373_v55  ;;  %v7108_v17 = vadd.f32 %v7106_v29, %v19375_v15 }
 0x203   : > { %v19610_v10 = vadd.f32 %v6435_v54, %v6431_v0  ;;  %v19612_v3 = vadd.f32 %v8470_v62, %v8466_v13  ;;  %v7111_v24 = vmul.f32 %v7110_v40, %v19594_v50  ;;  %v7112_v35 = vmul.f32 %v19588_v14, %v7110_v40 }
 0x204   : > { %v9130_v34 = vadd.f32 %v9128_v22, %v19379_v44  ;;  %v9131_v46 = vadd.f32 %v9129_v18, %v19381_v53  ;;  %v9134_v57 = vmul.f32 %v9133_v26, %v19594_v50  ;;  %v9135_v25 = vmul.f32 %v19588_v14, %v9133_v26 }
 0x205   : > { %v19620_v51 = vadd.f32 %v7111_v24, %v7107_v31  ;;  %v19622_v55 = vadd.f32 %v7112_v35, %v7108_v17  ;;  %v7781_v15 = vmul.f32 %v7780_v23, %v19582_v11  ;;  %v7782_v0 = vmul.f32 %v19576_v8, %v7780_v23 }
 0x206   : > { %v19626_v19 = vadd.f32 %v9134_v57, %v9130_v34  ;;  %v19628_v63 = vadd.f32 %v9135_v25, %v9131_v46  ;;  %v7787_v22 = vmul.f32 %v7786_v37, %v19594_v50  ;;  %v7788_v44 = vmul.f32 %v19588_v14, %v7786_v37 }
 0x207   : > { %v7783_v53 = vadd.f32 %v7781_v15, %v19395_v61  ;;  %v7784_v40 = vadd.f32 %v7782_v0, %v19397_v21  ;;  %v9792_v26 = vmul.f32 %v9791_v59, %v19582_v11  ;;  %v9793_v29 = vmul.f32 %v19576_v8, %v9791_v59 }
 0x208   : > { %v9798_v23 = vmul.f32 %v9797_v27, %v19594_v50  ;;  %v9799_v18 = vmul.f32 %v19588_v14, %v9797_v27  ;;  %v10463_v45 = vmul.f32 %v10462_v30, %v19582_v11  ;;  %v10464_v38 = vmul.f32 %v19576_v8, %v10462_v30 }
 0x209   : > { %v19640_v37 = vadd.f32 %v7787_v22, %v7783_v53  ;;  %v19642_v61 = vadd.f32 %v7788_v44, %v7784_v40  ;;  %v9794_v21 = vadd.f32 %v9792_v26, %v19406_v41  ;;  %v9795_v59 = vadd.f32 %v9793_v29, %v19408_v12 }
 0x20a   : > { %v10465_v60 = vadd.f32 %v10463_v45, %v19426_v28  ;;  %v10466_v54 = vadd.f32 %v10464_v38, %v19440_v20  ;;  %v21348_v27 = vstv %s19512_s11  ;;  %v21350_v28 = vstv %s19514_s17  ;;  %s19771_s11 = sld [smem:[#allocation6 + $0x63]]  ;;  %s19775_s17 = sld [smem:[#allocation6 + $0x80]] }
 0x20b   : > { %v10469_v13 = vmul.f32 %v21348_v27, %v19594_v50  ;;  %v21349_v30 = vmov %v21348_v27  ;;  %v19656_v41 = vadd.f32 %v9798_v23, %v9794_v21  ;;  %v19658_v12 = vadd.f32 %v9799_v18, %v9795_v59 }
 0x20c   : > { %v10470_v62 = vmul.f32 %v19588_v14, %v21349_v30  ;;  %v12462_v20 = vmul.f32 %v21350_v28, %v19582_v11  ;;  %v21351_v31 = vmov %v21350_v28  ;;  %v21352_v34 = vstv %s19521_s10  ;;  %s19777_s10 = sld [smem:[#allocation6 + $0x87]] }
 0x20d   : > { %v12463_v17 = vmul.f32 %v19576_v8, %v21351_v31  ;;  %v19668_v24 = vadd.f32 %v10469_v13, %v10465_v60  ;;  %v12468_v46 = vmul.f32 %v21352_v34, %v19594_v50  ;;  %v21353_v57 = vmov %v21352_v34 }
 0x20e   : > { %v19670_v35 = vadd.f32 %v10470_v62, %v10466_v54  ;;  %v12469_v25 = vmul.f32 %v19588_v14, %v21353_v57  ;;  %v12464_v15 = vadd.f32 %v12462_v20, %v19476_v1  ;;  %v21354_v22 = vstv %s19523_s19  ;;  %s19782_s19 = sld [smem:[#allocation6 + $0x5f]] }
 0x20f   : > { %v12465_v0 = vadd.f32 %v12463_v17, %v19485_v4  ;;  %v11127_v44 = vmul.f32 %v21354_v22, %v19582_v11  ;;  %v21355_v53 = vmov %v21354_v22  ;;  %v21356_v26 = vstv %s19527_s20  ;;  %s19784_s20 = sld [smem:[#allocation6 + $0x66]] }
 0x210   : > { %v11128_v40 = vmul.f32 %v19576_v8, %v21355_v53  ;;  %v11133_v29 = vmul.f32 %v21356_v26, %v19594_v50  ;;  %v21357_v23 = vmov %v21356_v26  ;;  %v21358_v45 = vstv %s19533_s22  ;;  %s19786_s22 = sld [smem:[#allocation6 + $0x83]] }
 0x211   : > { %v11134_v18 = vmul.f32 %v19588_v14, %v21357_v23  ;;  %v13126_v38 = vmul.f32 %v21358_v45, %v19582_v11  ;;  %v21359_v1 = vmov %v21358_v45  ;;  %v19698_v21 = vadd.f32 %v12468_v46, %v12464_v15 }
 0x212   : > { %v13127_v4 = vmul.f32 %v19576_v8, %v21359_v1  ;;  %v19700_v59 = vadd.f32 %v12469_v25, %v12465_v0  ;;  %v11129_v60 = vadd.f32 %v11127_v44, %v19508_v52  ;;  %v11130_v54 = vadd.f32 %v11128_v40, %v19516_v56 }
 0x213   : > { %v13128_v27 = vadd.f32 %v13126_v38, %v19529_v7  ;;  %v21360_v30 = vstv %s19538_s27  ;;  %v11796_v56 = vstv %s19654_s6  ;;  %v21362_v46 = vstv %s19542_s29  ;;  %s19788_s27 = sld [smem:[#allocation6 + $0x8a]]  ;;  %s19792_s6 = sld [smem:[#allocation6 + $0x69]] }
 0x214   : > { %v13129_v13 = vadd.f32 %v13127_v4, %v19531_v48  ;;  %v13132_v62 = vmul.f32 %v21360_v30, %v19594_v50  ;;  %v21361_v28 = vmov %v21360_v30  ;;  %v19714_v31 = vadd.f32 %v11133_v29, %v11129_v60  ;;  %s19790_s29 = sld [smem:[#allocation6 + $0x62]] }
 0x215   : > { %v13133_v20 = vmul.f32 %v19588_v14, %v21361_v28  ;;  %v19716_v17 = vadd.f32 %v11134_v18, %v11130_v54  ;;  %v11791_v7 = vmul.f32 %v21362_v46, %v19582_v11  ;;  %v21363_v48 = vmov %v21362_v46 }
 0x216   : > { %v19718_v34 = vadd.f32 %v13132_v62, %v13128_v27  ;;  %v11792_v57 = vmul.f32 %v19576_v8, %v21363_v48  ;;  %v13789_v25 = vstv %s19666_s8  ;;  %v11797_v22 = vmul.f32 %v11796_v56, %v19594_v50  ;;  %s19794_s8 = sld [smem:[#allocation6 + $0x86]] }
 0x217   : > { %v19720_v52 = vadd.f32 %v13133_v20, %v13129_v13  ;;  %v11793_v15 = vadd.f32 %v11791_v7, %v19550_v47  ;;  %v11798_v44 = vmul.f32 %v19588_v14, %v11796_v56  ;;  %v13790_v53 = vmul.f32 %v13789_v25, %v19582_v11 }
 0x218   : > { %v11794_v0 = vadd.f32 %v11792_v57, %v19553_v42  ;;  %v13791_v47 = vmul.f32 %v19576_v8, %v13789_v25  ;;  %v13795_v42 = vstv %s19704_s9  ;;  %s19796_s9 = sld [smem:[#allocation6 + $0x8d]]  ;;  %v6446_v18 = vstv %s19736_s1 }
 0x219   : > { %v19743_v40 = vadd.f32 %v11797_v22, %v11793_v15  ;;  %v13792_v29 = vadd.f32 %v13790_v53, %v19564_v58  ;;  %v13796_v23 = vmul.f32 %v13795_v42, %v19594_v50  ;;  %v13797_v8 = vmul.f32 %v19588_v14, %v13795_v42  ;;  %s20099_s1 = sld [smem:[#allocation6 + $0x1d]] }
 0x21a   : > { %v19745_v26 = vadd.f32 %v11798_v44, %v11794_v0  ;;  %v13793_v11 = vadd.f32 %v13791_v47, %v19566_v49  ;;  %v239_v50 = vadd.s32 4294967295, %v18284_v9  ;;  %v6440_v14 = vstv %s19734_s0  ;;  %s20097_s0 = sld [smem:[#allocation6 + $0x1c]] }
 0x21b   : > { %v19773_v58 = vadd.f32 %v13796_v23, %v13792_v29  ;;  %v8475_v45 = vstv %s19739_s2  ;;  %v8481_v38 = vstv %s19741_s13  ;;  %v19805_v1 = vadd.s32 16, %v18275_v5  ;;  %s20105_s2 = sld [smem:[#allocation6 + $0x40]]  ;;  %s20107_s13 = sld [smem:[#allocation6 + $0x41]] }
 0x21c   : > { %v19779_v49 = vadd.f32 %v13797_v8, %v13793_v11  ;;  %vm244_vm10 = vcmp.ge.s32.totalorder %v239_v50, %v19402_v16  ;;  %vm249_vm11 = vcmp.lt.s32.totalorder %v239_v50, %v19413_v33  ;;  %v19808_v4 = vadd.s32 24, %v18275_v5 }
 0x21d   : > { %21364 = vst [vmem:[#allocation26_spill] sm:$0xff] %v19805_v1  ;;  %v7116_v60 = vstv %s19749_s14  ;;  %v7122_v54 = vstv %s19751_s18  ;;  %v9139_v27 = vstv %s19754_s21  ;;  %vm253_vm12 = vmand %vm244_vm10, %vm249_vm11  ;;  %v9145_v13 = vstv %s19756_s23  ;;  %s20111_s14 = sld [smem:[#allocation6 + $0x1f]]  ;;  %s20131_s18 = sld [smem:[#allocation6 + $0x20]] }
 0x21e   : > { %21365 = vst [vmem:[#allocation27_spill] sm:$0xff] %v19808_v4  ;;  %v7792_v30 = vstv %s19759_s26  ;;  %v7798_v62 = vstv %s19761_s7  ;;  %v9803_v28 = vstv %s19764_s28  ;;  %v19822_v48 = vadd.s32 4294967295, %v19805_v1  ;;  %s20133_s21 = sld [smem:[#allocation6 + $0x43]]  ;;  %s20135_s23 = sld [smem:[#allocation6 + $0x44]] }
 0x21f   : > { %v21366_v0 = vmov 0.0   ;;  %v19831_v44 = vadd.s32 4294967295, %v19808_v4  ;;  %vm276_vm6 = vcmp.ge.s32.totalorder %v19805_v1, %v19402_v16  ;;  %vm280_vm7 = vcmp.lt.s32.totalorder %v19805_v1, %v19413_v33  ;;  %s20137_s26 = sld [smem:[#allocation6 + $0x22]]  ;;  %s20147_s7 = sld [smem:[#allocation6 + $0x23]] }
 0x220   : > { %v19828_v22 = vsel %vm253_vm12, 1.0, %v21366_v0  ;;  %vm245_vm13 = vcmp.ge.s32.totalorder %v19822_v48, %v19402_v16  ;;  %vm250_vm14 = vcmp.lt.s32.totalorder %v19822_v48, %v19413_v33  ;;  %vm277_vm10 = vcmp.ge.s32.totalorder %v19808_v4, %v19402_v16  ;;  %vm20055_vm12 = vmand %vm274_vm2, %vm278_vm3  ;;  %s20152_s28 = sld [smem:[#allocation6 + $0x46]] }
 0x221   : > { %vm246_vm15 = vcmp.ge.s32.totalorder %v19831_v44, %v19402_v16  ;;  %vm251_vm1 = vcmp.lt.s32.totalorder %v19831_v44, %v19413_v33  ;;  %vm20011_vm8 = vmand %vm245_vm13, %vm250_vm14  ;;  %vm281_vm11 = vcmp.lt.s32.totalorder %v19808_v4, %v19413_v33 }
 0x222   : > { %vm255_vm9 = vmand %vm246_vm15, %vm251_vm1 }
 0x223   : > { %vm283_vm13 = vmand %vm275_vm4, %vm279_vm5 }
 0x224   : > { %vm284_vm14 = vmand %vm276_vm6, %vm280_vm7 }
 0x225   : > { %vm285_vm15 = vmand %vm277_vm10, %vm281_vm11 }
 0x229   : > { %v19835_v42 = vpop.f32.mrb[8].mxu0 }
 0x22a   : > { %v19841_v50 = vpop.f32.mrb[9].mxu0  ;;  %v6442_v57 = vmul.f32 %v19835_v42, %v6440_v14  ;;  %v8477_v15 = vmul.f32 %v19835_v42, %v8475_v45  ;;  %v7118_v25 = vmul.f32 %v19835_v42, %v7116_v60  ;;  %v9141_v7 = vmul.f32 %v19835_v42, %v9139_v27 }
 0x22b   : > { %v19847_v46 = vpop.f32.mrb[8].mxu1  ;;  %v6441_v47 = vmul.f32 %v6440_v14, %v19841_v50  ;;  %v8476_v53 = vmul.f32 %v8475_v45, %v19841_v50  ;;  %v7117_v11 = vmul.f32 %v7116_v60, %v19841_v50  ;;  %v9140_v8 = vmul.f32 %v9139_v27, %v19841_v50 }
 0x22c   : > { %v19853_v23 = vpop.f32.mrb[9].mxu1  ;;  %v6444_v29 = vadd.f32 %v6442_v57, %v19604_v6  ;;  %v6448_v56 = vmul.f32 %v19847_v46, %v6446_v18  ;;  %v8479_v20 = vadd.f32 %v8477_v15, %v19606_v39  ;;  %v8483_v43 = vmul.f32 %v19847_v46, %v8481_v38 }
 0x22d   : > { %v6443_v36 = vadd.f32 %v6441_v47, %v19610_v10  ;;  %v6447_v14 = vmul.f32 %v6446_v18, %v19853_v23  ;;  %v8478_v45 = vadd.f32 %v8476_v53, %v19612_v3  ;;  %v8482_v60 = vmul.f32 %v8481_v38, %v19853_v23 }
 0x22e   : > { %v19863_v2 = vadd.f32 %v6448_v56, %v6444_v29  ;;  %v19865_v27 = vadd.f32 %v8483_v43, %v8479_v20  ;;  %v7119_v6 = vadd.f32 %v7117_v11, %v19620_v51  ;;  %v7120_v57 = vadd.f32 %v7118_v25, %v19622_v55 }
 0x22f   : > { %v19869_v32 = vadd.f32 %v6447_v14, %v6443_v36  ;;  %v19871_v39 = vadd.f32 %v8482_v60, %v8478_v45  ;;  %v7123_v10 = vmul.f32 %v7122_v54, %v19853_v23  ;;  %v7124_v18 = vmul.f32 %v19847_v46, %v7122_v54 }
 0x230   : > { %v9142_v3 = vadd.f32 %v9140_v8, %v19626_v19  ;;  %v9143_v38 = vadd.f32 %v9141_v7, %v19628_v63  ;;  %v9146_v56 = vmul.f32 %v9145_v13, %v19853_v23  ;;  %v9147_v43 = vmul.f32 %v19847_v46, %v9145_v13 }
 0x231   : > { %v19879_v20 = vadd.f32 %v7123_v10, %v7119_v6  ;;  %v19881_v51 = vadd.f32 %v7124_v18, %v7120_v57  ;;  %v7793_v36 = vmul.f32 %v7792_v30, %v19841_v50  ;;  %v7794_v55 = vmul.f32 %v19835_v42, %v7792_v30 }
 0x232   : > { %v19885_v54 = vadd.f32 %v9146_v56, %v9142_v3  ;;  %v19887_v19 = vadd.f32 %v9147_v43, %v9143_v38  ;;  %v7799_v63 = vmul.f32 %v7798_v62, %v19853_v23  ;;  %v7800_v13 = vmul.f32 %v19847_v46, %v7798_v62 }
 0x233   : > { %v7795_v7 = vadd.f32 %v7793_v36, %v19640_v37  ;;  %v7796_v25 = vadd.f32 %v7794_v55, %v19642_v61  ;;  %v9804_v30 = vmul.f32 %v9803_v28, %v19841_v50  ;;  %v9805_v15 = vmul.f32 %v19835_v42, %v9803_v28 }
 0x234   : > { %v21367_v62 = vstv %s19766_s4  ;;  %v21369_v61 = vstv %s19769_s30  ;;  %v21371_v10 = vstv %s19771_s11  ;;  %s20154_s4 = sld [smem:[#allocation6 + $0x47]]  ;;  %s20162_s30 = sld [smem:[#allocation6 + $0x64]] }
 0x235   : > { %v9810_v53 = vmul.f32 %v21367_v62, %v19853_v23  ;;  %v21368_v47 = vmov %v21367_v62  ;;  %v10475_v29 = vmul.f32 %v21369_v61, %v19841_v50  ;;  %v21370_v11 = vmov %v21369_v61  ;;  %s20164_s11 = sld [smem:[#allocation6 + $0x65]] }
 0x236   : > { %v9811_v37 = vmul.f32 %v19847_v46, %v21368_v47  ;;  %v10476_v28 = vmul.f32 %v19835_v42, %v21370_v11  ;;  %v19915_v8 = vadd.f32 %v7799_v63, %v7795_v7  ;;  %v19917_v14 = vadd.f32 %v7800_v13, %v7796_v25 }
 0x237   : > { %v9806_v45 = vadd.f32 %v9804_v30, %v19656_v41  ;;  %v9807_v60 = vadd.f32 %v9805_v15, %v19658_v12  ;;  %v10477_v6 = vadd.f32 %v10475_v29, %v19668_v24  ;;  %v10481_v18 = vmul.f32 %v21371_v10, %v19853_v23 }
 0x238   : > { %v10478_v57 = vadd.f32 %v10476_v28, %v19670_v35  ;;  %v21372_v3 = vmov %v21371_v10  ;;  %v21373_v35 = vstv %s19775_s17  ;;  %v21375_v63 = vstv %s19777_s10  ;;  %s20246_s17 = sld [smem:[#allocation6 + $0x88]]  ;;  %s20264_s10 = sld [smem:[#allocation6 + $0x89]] }
 0x239   : > { %v10482_v41 = vmul.f32 %v19847_v46, %v21372_v3  ;;  %v19937_v12 = vadd.f32 %v9810_v53, %v9806_v45  ;;  %v19939_v24 = vadd.f32 %v9811_v37, %v9807_v60  ;;  %v12474_v38 = vmul.f32 %v21373_v35, %v19841_v50 }
 0x23a   : > { %v21374_v56 = vmov %v21373_v35  ;;  %v19951_v36 = vadd.f32 %v10481_v18, %v10477_v6  ;;  %v12480_v13 = vmul.f32 %v21375_v63, %v19853_v23  ;;  %v21376_v7 = vmov %v21375_v63 }
 0x23b   : > { %v12475_v43 = vmul.f32 %v19835_v42, %v21374_v56  ;;  %v19953_v55 = vadd.f32 %v10482_v41, %v10478_v57  ;;  %v12481_v25 = vmul.f32 %v19847_v46, %v21376_v7  ;;  %v12476_v30 = vadd.f32 %v12474_v38, %v19698_v21 }
 0x23c   : > { %v21377_v62 = vstv %s19782_s19  ;;  %v21379_v61 = vstv %s19784_s20  ;;  %v21381_v45 = vstv %s19786_s22  ;;  %v21383_v35 = vstv %s19788_s27  ;;  %s20275_s19 = sld [smem:[#allocation6 + $0x67]]  ;;  %s20279_s20 = sld [smem:[#allocation6 + $0x68]] }
 0x23d   : > { %v12477_v15 = vadd.f32 %v12475_v43, %v19700_v59  ;;  %v11139_v53 = vmul.f32 %v21377_v62, %v19841_v50  ;;  %v21378_v47 = vmov %v21377_v62  ;;  %v11145_v29 = vmul.f32 %v21379_v61, %v19853_v23  ;;  %s20293_s22 = sld [smem:[#allocation6 + $0x8b]]  ;;  %s20303_s27 = sld [smem:[#allocation6 + $0x8c]] }
 0x23e   : > { %v11140_v37 = vmul.f32 %v19835_v42, %v21378_v47  ;;  %v21380_v11 = vmov %v21379_v61  ;;  %v13138_v60 = vmul.f32 %v21381_v45, %v19841_v50  ;;  %v21382_v21 = vmov %v21381_v45 }
 0x23f   : > { %v11146_v28 = vmul.f32 %v19847_v46, %v21380_v11  ;;  %v13139_v59 = vmul.f32 %v19835_v42, %v21382_v21  ;;  %v19981_v6 = vadd.f32 %v12480_v13, %v12476_v30  ;;  %v19983_v57 = vadd.f32 %v12481_v25, %v12477_v15 }
 0x240   : > { %v11141_v10 = vadd.f32 %v11139_v53, %v19714_v31  ;;  %v11142_v18 = vadd.f32 %v11140_v37, %v19716_v17  ;;  %v13140_v3 = vadd.f32 %v13138_v60, %v19718_v34  ;;  %v13144_v38 = vmul.f32 %v21383_v35, %v19853_v23 }
 0x241   : > { %v13141_v41 = vadd.f32 %v13139_v59, %v19720_v52  ;;  %v21384_v56 = vmov %v21383_v35  ;;  %v21385_v31 = vstv %s19790_s29  ;;  %v21389_v15 = vstv %s19792_s6  ;;  %s20334_s29 = sld [smem:[#allocation6 + $0x6a]]  ;;  %s20369_s6 = sld [smem:[#allocation6 + $0x6b]] }
 0x242   : > { %v13145_v43 = vmul.f32 %v19847_v46, %v21384_v56  ;;  %v19995_v63 = vadd.f32 %v11145_v29, %v11141_v10  ;;  %v19997_v13 = vadd.f32 %v11146_v28, %v11142_v18  ;;  %v11803_v17 = vmul.f32 %v21385_v31, %v19841_v50 }
 0x243   : > { %v21386_v34 = vmov %v21385_v31  ;;  %v20015_v25 = vadd.f32 %v13144_v38, %v13140_v3  ;;  %v11809_v62 = vmul.f32 %v21389_v15, %v19853_v23  ;;  %v21390_v53 = vmov %v21389_v15 }
 0x244   : > { %v11804_v7 = vmul.f32 %v19835_v42, %v21386_v34  ;;  %v20017_v30 = vadd.f32 %v13145_v43, %v13141_v41  ;;  %v11810_v47 = vmul.f32 %v19847_v46, %v21390_v53  ;;  %v11805_v48 = vadd.f32 %v11803_v17, %v19743_v40 }
 0x245   : > { %v21391_v61 = vstv %s19794_s8  ;;  %v21393_v45 = vstv %s19796_s9  ;;  %v20071_v59 = vsel %vm255_vm9, 1.0, %v21366_v0  ;;  %v20116_v35 = vsel %vm20055_vm12, 1.0, %v21366_v0  ;;  %s20376_s8 = sld [smem:[#allocation6 + $0x8e]]  ;;  %s20444_s9 = sld [smem:[#allocation6 + $0x8f]] }
 0x246   : > { %v11806_v37 = vadd.f32 %v11804_v7, %v19745_v26  ;;  %v13802_v29 = vmul.f32 %v21391_v61, %v19841_v50  ;;  %v21392_v11 = vmov %v21391_v61  ;;  %v13808_v44 = vmul.f32 %v21393_v45, %v19853_v23  ;;  %21402 = vst [vmem:[#allocation33_spill] sm:$0xff] %v20116_v35 }
 0x247   : > { %v13803_v28 = vmul.f32 %v19835_v42, %v21392_v11  ;;  %v21394_v60 = vmov %v21393_v45  ;;  %v20059_v42 = vadd.f32 %v11809_v62, %v11805_v48  ;;  %v6473_v3 = vsel %vm331_vm0, %v20071_v59, 0 }
 0x248   : > { %v13809_v40 = vmul.f32 %v19847_v46, %v21394_v60  ;;  %v20061_v50 = vadd.f32 %v11810_v47, %v11806_v37  ;;  %v13804_v21 = vadd.f32 %v13802_v29, %v19773_v58  ;;  %v20068_v46 = vsel %vm20011_vm8, 1.0, %v21366_v0 }
 0x249   : > { %21397 = vst [vmem:[#allocation28_spill] sm:$0xff] %v20059_v42  ;;  %v13805_v23 = vadd.f32 %v13803_v28, %v19779_v49  ;;  %v6467_v58 = vsel %vm331_vm0, %v19828_v22, 0  ;;  %v6470_v18 = vsel %vm331_vm0, %v20068_v46, 0  ;;  %v20119_v38 = vsel %vm283_vm13, 1.0, %v21366_v0 }
 0x24a   : > { %21398 = vst [vmem:[#allocation29_spill] sm:$0xff] %v20061_v50  ;;  %v20087_v49 = vadd.f32 %v13808_v44, %v13804_v21  ;;  %v20109_v41 = vsub.f32 %v6467_v58, %v6467_v58  ;;  %21403 = vst [vmem:[#allocation34_spill] sm:$0xff] %v20119_v38  ;;  %v20122_v56 = vsel %vm284_vm14, 1.0, %v21366_v0  ;;  %v20125_v43 = vsel %vm285_vm15, 1.0, %v21366_v0 }
 0x24b   : > { %v20089_v10 = vadd.f32 %v13809_v40, %v13805_v23  ;;  %21404 = vst [vmem:[#allocation35_spill] sm:$0xff] %v20122_v56  ;;  %21405 = vst [vmem:[#allocation36_spill] sm:$0xff] %v20125_v43  ;;  %v20127_v31 = vsub.f32 %v6470_v18, %v6470_v18  ;;  %v20129_v17 = vsub.f32 %v6473_v3, %v6473_v3  ;;  %v7140_v34 = vsel %vm331_vm0, %v20116_v35, 0 }
 0x24c   : > { %21399 = vst [vmem:[#allocation30_spill] sm:$0xff] %v20087_v49  ;;  %21401 = vst [vmem:[#allocation32_spill] sm:$0xff] %v20109_v41  ;;  %v7143_v7 = vsel %vm331_vm0, %v20119_v38, 0  ;;  %v7146_v52 = vsel %vm331_vm0, %v20122_v56, 0  ;;  %v7149_v15 = vsel %vm331_vm0, %v20125_v43, 0  ;;  %v20150_v62 = vand.u32 4294901760, %v20109_v41 }
 0x24d   : > { %21400 = vst [vmem:[#allocation31_spill] sm:$0xff] %v20089_v10  ;;  %21406 = vst [vmem:[#allocation37_spill] sm:$0xff] %v20127_v31  ;;  %v20157_v53 = vand.u32 4294901760, %v20127_v31  ;;  %v20160_v47 = vand.u32 4294901760, %v20129_v17  ;;  %v20166_v48 = vsub.f32 %v7140_v34, %v7140_v34  ;;  %v20168_v37 = vsub.f32 %v7143_v7, %v7143_v7 }
 0x24e   : > { %21407 = vst [vmem:[#allocation38_spill] sm:$0xff] %v20129_v17  ;;  %21408 = vst [vmem:[#allocation39_spill] sm:$0xff] %v20150_v62  ;;  %v20170_v61 = vsub.f32 %v7146_v52, %v7146_v52  ;;  %v20172_v29 = vsub.f32 %v7149_v15, %v7149_v15  ;;  %v6452_v11 = vstv %s20097_s0  ;;  %v6458_v28 = vstv %s20099_s1  ;;  %s6389_s0 = sld [smem:[#allocation7]]  ;;  %s14710_s1 = sld [smem:[#allocation7 + $0x1]] }
 0x24f   : > { %21409 = vst [vmem:[#allocation40_spill] sm:$0xff] %v20157_v53  ;;  %21410 = vst [vmem:[#allocation41_spill] sm:$0xff] %v20160_v47  ;;  %v8487_v45 = vstv %s20105_s2  ;;  %v6555_v44 = vsub.f32 %v20109_v41, %v20150_v62  ;;  %v8493_v60 = vstv %s20107_s13  ;;  %v6565_v40 = vsub.f32 %v20127_v31, %v20157_v53  ;;  %s14542_s2 = sshll.u32 %s18253_s5, 7 }
 0x250   : > { %21411 = vst [vmem:[#allocation42_spill] sm:$0xff] %v20170_v61  ;;  %21412 = vst [vmem:[#allocation43_spill] sm:$0xff] %v20172_v29  ;;  %v6575_v26 = vsub.f32 %v20129_v17, %v20160_v47  ;;  %v7128_v21 = vstv %s20111_s14  ;;  %v20186_v23 = vand.u32 4294901760, %v20166_v48  ;;  %v20189_v58 = vand.u32 4294901760, %v20168_v37  ;;  %s21145_s13 = scalar_lea.vmem [#allocation9], %s14542_s2  ;;  %s14787_s14 = sld [smem:[#allocation7 + $0x2]] }
 0x251   : > { %v20192_v18 = vand.u32 4294901760, %v20170_v61  ;;  %v20195_v3 = vand.u32 4294901760, %v20172_v29  ;;  %v7134_v34 = vstv %s20131_s18  ;;  %v9151_v7 = vstv %s20133_s21  ;;  %s14864_s18 = sld [smem:[#allocation7 + $0x3]]  ;;  %s14947_s21 = sshll.u32 %s18136_s16, 11 }
 0x252   : > { %v9157_v52 = vstv %s20135_s23  ;;  %v20201_v0 = vand.u32 4294901760, %v6555_v44  ;;  %v20206_v16 = vand.u32 4294901760, %v6565_v40  ;;  %v20208_v9 = vand.u32 4294901760, %v6575_v26  ;;  %s14435_s23 = sshll.u32 %s21145_s13, 4  ;;  %s21178_s23 = int_to_ptr.vmem [resolvable:$true] %s14435_s23 }
 0x253   : > { %21413 = vst [vmem:[#allocation44_spill] sm:$0xff] %v20192_v18  ;;  %21414 = vst [vmem:[#allocation45_spill] sm:$0xff] %v20195_v3  ;;  %vm8419_vm13 = vcmask 261120  }
 0x254   : > { %21415 = vst [vmem:[#allocation46_spill] sm:$0xff] %v20208_v9 }
 0x255   : > { %v20212_v56 = vpop.f32.mrb[10].mxu0 }
 0x256   : > { %v20222_v40 = vpop.f32.mrb[11].mxu0  ;;  %v6454_v26 = vmul.f32 %v20212_v56, %v6452_v11  ;;  %v8489_v43 = vmul.f32 %v20212_v56, %v8487_v45  ;;  %v7130_v5 = vmul.f32 %v20212_v56, %v7128_v21  ;;  %v9153_v1 = vmul.f32 %v20212_v56, %v9151_v7 }
 0x257   : > { %v20228_v38 = vpop.f32.mrb[10].mxu1  ;;  %v6453_v35 = vmul.f32 %v6452_v11, %v20222_v40  ;;  %v8488_v4 = vmul.f32 %v8487_v45, %v20222_v40  ;;  %v7129_v44 = vmul.f32 %v7128_v21, %v20222_v40  ;;  %v9152_v33 = vmul.f32 %v9151_v7, %v20222_v40 }
 0x258   : > { %v20234_v15 = vpop.f32.mrb[11].mxu1  ;;  %v6456_v3 = vadd.f32 %v6454_v26, %v19863_v2  ;;  %v6460_v29 = vmul.f32 %v20228_v38, %v6458_v28  ;;  %v8491_v18 = vadd.f32 %v8489_v43, %v19865_v27  ;;  %v8495_v61 = vmul.f32 %v20228_v38, %v8493_v60 }
 0x259   : > { %v6455_v10 = vadd.f32 %v6453_v35, %v19869_v32  ;;  %v6459_v11 = vmul.f32 %v6458_v28, %v20234_v15  ;;  %v8490_v45 = vadd.f32 %v8488_v4, %v19871_v39  ;;  %v8494_v21 = vmul.f32 %v8493_v60, %v20234_v15 }
 0x25a   : > { %v6462_v49 = vadd.f32 %v6460_v29, %v6456_v3  ;;  %v8497_v7 = vadd.f32 %v8495_v61, %v8491_v18  ;;  %v7131_v50 = vadd.f32 %v7129_v44, %v19879_v20  ;;  %v7132_v2 = vadd.f32 %v7130_v5, %v19881_v51 }
 0x25b   : > { %v6461_v26 = vadd.f32 %v6459_v11, %v6455_v10  ;;  %v8496_v27 = vadd.f32 %v8494_v21, %v8490_v45  ;;  %v7135_v43 = vmul.f32 %v7134_v34, %v20234_v15  ;;  %v7136_v32 = vmul.f32 %v20228_v38, %v7134_v34 }
 0x25c   : > { %v6479_v35 = vand.u32 4294901760, %v6462_v49  ;;  %v8502_v28 = vand.u32 4294901760, %v8497_v7  ;;  %v9154_v4 = vadd.f32 %v9152_v33, %v19885_v54  ;;  %v9155_v39 = vadd.f32 %v9153_v1, %v19887_v19 }
 0x25d   : > { %v6476_v29 = vand.u32 4294901760, %v6461_v26  ;;  %v8499_v61 = vand.u32 4294901760, %v8496_v27  ;;  %v7137_v60 = vadd.f32 %v7135_v43, %v7131_v50  ;;  %v7138_v20 = vadd.f32 %v7136_v32, %v7132_v2 }
 0x25e   : > { %v6591_v18 = vsub.f32 %v6462_v49, %v6479_v35  ;;  %v8614_v5 = vsub.f32 %v8497_v7, %v8502_v28  ;;  %v9158_v51 = vmul.f32 %v9157_v52, %v20234_v15  ;;  %v9159_v10 = vmul.f32 %v20228_v38, %v9157_v52 }
 0x25f   : > { %v20254_v3 = vpack.c.bf16 %v6479_v35, %v6476_v29  ;;  %v20256_v44 = vpack.c.bf16 %v8502_v28, %v8499_v61  ;;  %v6584_v34 = vsub.f32 %v6461_v26, %v6476_v29  ;;  %v8607_v11 = vsub.f32 %v8496_v27, %v8499_v61 }
 0x260   : > { %v6592_v45 = vand.u32 4294901760, %v6591_v18  ;;  %v8615_v33 = vand.u32 4294901760, %v8614_v5  ;;  %v7152_v1 = vand.u32 4294901760, %v7137_v60  ;;  %v7155_v54 = vand.u32 4294901760, %v7138_v20 }
 0x261   : > { %17181 = vmatprep.subr.bf16.mxu0 %v20254_v3  ;;  %17253 = vmatprep.subr.bf16.mxu1 %v20256_v44  ;;  %v6585_v19 = vand.u32 4294901760, %v6584_v34  ;;  %v8608_v50 = vand.u32 4294901760, %v8607_v11  ;;  %v20260_v49 = vpack.c.bf16 %v6591_v18, %v6584_v34  ;;  %v20262_v52 = vpack.c.bf16 %v8614_v5, %v8607_v11 }
 0x262   : > { %17183 = vmatpush3.bf16.msra.mxu0 %v20254_v3  ;;  %17255 = vmatpush3.bf16.msra.mxu1 %v20256_v44  ;;  %v6593_v21 = vsub.f32 %v6591_v18, %v6592_v45  ;;  %v8616_v7 = vsub.f32 %v8614_v5, %v8615_v33  ;;  %v20268_v2 = vpack.c.bf16 %v7155_v54, %v7152_v1  ;;  %v12485_v26 = vstv %s20246_s17 }
 0x263   : > { %v6586_v27 = vsub.f32 %v6584_v34, %v6585_v19  ;;  %v8609_v43 = vsub.f32 %v8607_v11, %v8608_v50  ;;  %v20271_v32 = vpack.c.bf16 %v6592_v45, %v6585_v19  ;;  %v20273_v35 = vpack.c.bf16 %v8615_v33, %v8608_v50 }
 0x264   : > { %v6594_v28 = vand.u32 4294901760, %v6593_v21  ;;  %v8617_v29 = vand.u32 4294901760, %v8616_v7  ;;  %v9160_v61 = vadd.f32 %v9158_v51, %v9154_v4  ;;  %v9161_v42 = vadd.f32 %v9159_v10, %v9155_v39 }
 0x265   : > { %16177 = vmatmul.mubr.f32.vlgmr.msra.gmra.mrb[12].mxu0 %v20201_v0  ;;  %16357 = vmatmul.mubr.f32.vlgmr.msra.gmra.mrb[12].mxu1 %v20201_v0  ;;  %v6587_v18 = vand.u32 4294901760, %v6586_v27  ;;  %v8610_v5 = vand.u32 4294901760, %v8609_v43  ;;  %v7260_v34 = vsub.f32 %v7137_v60, %v7152_v1  ;;  %v7267_v11 = vsub.f32 %v7138_v20, %v7155_v54 }
 0x266   : > { %16179 = vmatprep.mubr.f32.mxu0 %v20206_v16  ;;  %16359 = vmatprep.mubr.f32.mxu1 %v20206_v16  ;;  %v9163_v45 = vand.u32 4294901760, %v9160_v61  ;;  %v9166_v33 = vand.u32 4294901760, %v9161_v42  ;;  %v21416_v4 = vstv %s20137_s26 }
 0x267   : > { %v7805_v39 = vmul.f32 %v21416_v4, %v20222_v40  ;;  %v21417_v51 = vmov %v21416_v4  ;;  %v17184_v19 = vpack.c.bf16 %v6594_v28, %v6587_v18  ;;  %v17256_v50 = vpack.c.bf16 %v8617_v29, %v8610_v5 }
 0x268   : > { %v7806_v10 = vmul.f32 %v20212_v56, %v21417_v51  ;;  %v7261_v21 = vand.u32 4294901760, %v7260_v34  ;;  %v7268_v60 = vand.u32 4294901760, %v7267_v11  ;;  %v20289_v20 = vpack.c.bf16 %v9166_v33, %v9163_v45 }
 0x269   : > { %v9271_v1 = vsub.f32 %v9160_v61, %v9163_v45  ;;  %v9278_v54 = vsub.f32 %v9161_v42, %v9166_v33  ;;  %v20291_v7 = vpack.c.bf16 %v7267_v11, %v7260_v34  ;;  %16180 = vmatmul.mubr.f32.gmra.mrb[14].mxu0 %v20208_v9  ;;  %17185 = vmatprep.subr.bf16.mxu0 %v17184_v19  ;;  %v21418_v45 = vstv %s20147_s7  ;;  %s21176_s7 = scalar_lea.hbm %s21233_s3, %s14947_s21 }
 0x26a   : > { %v7262_v27 = vsub.f32 %v7260_v34, %v7261_v21  ;;  %v7269_v43 = vsub.f32 %v7267_v11, %v7268_v60  ;;  %v20296_v4 = vpack.c.bf16 %v7268_v60, %v7261_v21  ;;  %16360 = vmatmul.mubr.f32.gmra.mrb[14].mxu1 %v20208_v9  ;;  %17257 = vmatprep.subr.bf16.mxu1 %v17256_v50 }
 0x26b   : > { %v9272_v29 = vand.u32 4294901760, %v9271_v1  ;;  %v9279_v61 = vand.u32 4294901760, %v9278_v54  ;;  %v20300_v42 = vpack.c.bf16 %v9278_v54, %v9271_v1  ;;  %v7807_v18 = vadd.f32 %v7805_v39, %v19915_v8  ;;  %17187 = vmatpush3.bf16.msra.mxu0 %v17184_v19  ;;  %17259 = vmatpush3.bf16.msra.mxu1 %v17256_v50  ;;  %v21419_v50 = vld [vmem:[#allocation22_spill] sm:$0xff] }
 0x26c   : > { %v7263_v5 = vand.u32 4294901760, %v7262_v27  ;;  %v7270_v34 = vand.u32 4294901760, %v7269_v43  ;;  %v7808_v11 = vadd.f32 %v7806_v10, %v19917_v14  ;;  %v7811_v33 = vmul.f32 %v21418_v45, %v20234_v15  ;;  %17189 = vmatprep.subr.bf16.mxu0 %v20260_v49  ;;  %17261 = vmatprep.subr.bf16.mxu1 %v20262_v52 }
 0x26d   : > { %v9273_v8 = vsub.f32 %v9271_v1, %v9272_v29  ;;  %v9280_v39 = vsub.f32 %v9278_v54, %v9279_v61  ;;  %v20311_v51 = vpack.c.bf16 %v9279_v61, %v9272_v29  ;;  %16186 = vmatprep.mubr.msk.f32.mxu0 %vm331_vm0, %v21419_v50  ;;  %16366 = vmatprep.mubr.msk.f32.mxu1 %vm331_vm0, %v21419_v50  ;;  %v21421_v43 = vstv %s20152_s28  ;;  %s14422_s28 = scalar_lea.sflag [#allocation4], %s18253_s5 }
 0x26e   : > { %v20318_v14 = vpack.c.bf16 %v7270_v34, %v7263_v5  ;;  %v21420_v10 = vmov %v21418_v45  ;;  %v7813_v60 = vadd.f32 %v7811_v33, %v7807_v18  ;;  %16187 = vmatmul.mubr.msk.f32.vlgmr.msra.gmra.mrb[12].mxu0 %vm331_vm0, %v19828_v22  ;;  %16367 = vmatmul.mubr.msk.f32.vlgmr.msra.gmra.mrb[12].mxu1 %vm331_vm0, %v19828_v22  ;;  %v9816_v29 = vmul.f32 %v21421_v43, %v20222_v40 }
 0x26f   : > { %v7812_v21 = vmul.f32 %v20228_v38, %v21420_v10  ;;  %v9274_v1 = vand.u32 4294901760, %v9273_v8  ;;  %v9281_v54 = vand.u32 4294901760, %v9280_v39  ;;  %v21422_v61 = vmov %v21421_v43  ;;  %17191 = vmatpush3.bf16.msra.mxu0 %v20260_v49  ;;  %17263 = vmatpush3.bf16.msra.mxu1 %v20262_v52 }
 0x270   : > { %v9817_v5 = vmul.f32 %v20212_v56, %v21422_v61  ;;  %v7828_v34 = vand.u32 4294901760, %v7813_v60  ;;  %v21423_v45 = vstv %s20154_s4  ;;  %17193 = vmatprep.subr.bf16.mxu0 %v20254_v3  ;;  %17265 = vmatprep.subr.bf16.mxu1 %v20256_v44  ;;  %v9818_v49 = vadd.f32 %v9816_v29, %v19937_v12  ;;  %s18009_s4 = scalar_lea.vmem %s21178_s23, 2048 }
 0x271   : > { %v7814_v18 = vadd.f32 %v7812_v21, %v7808_v11  ;;  %v9822_v33 = vmul.f32 %v21423_v45, %v20234_v15  ;;  %v21424_v8 = vmov %v21423_v45  ;;  %v20346_v10 = vpack.c.bf16 %v9281_v54, %v9274_v1  ;;  %16189 = vmatprep.mubr.msk.f32.mxu0 %vm331_vm0, %v20068_v46  ;;  %16369 = vmatprep.mubr.msk.f32.mxu1 %vm331_vm0, %v20068_v46  ;;  %p18010_p5 = scmp.ne.s32.totalorder %s21178_s23, %s18009_s4 }
 0x272   : > { %v9823_v39 = vmul.f32 %v20228_v38, %v21424_v8  ;;  %v9819_v52 = vadd.f32 %v9817_v5, %v19939_v24  ;;  %v7936_v43 = vsub.f32 %v7813_v60, %v7828_v34  ;;  %v21425_v61 = vstv %s20162_s30  ;;  %16190 = vmatmul.mubr.msk.f32.gmra.mrb[14].mxu0 %vm331_vm0, %v20071_v59  ;;  %16370 = vmatmul.mubr.msk.f32.gmra.mrb[14].mxu1 %vm331_vm0, %v20071_v59  ;;  %v21428_v60 = vld [vmem:[#allocation23_spill] sm:$0xff]  ;;  %s18092_s30 = smov [#allocation9]  }
 0x273   : > { %v7831_v21 = vand.u32 4294901760, %v7814_v18  ;;  %v10487_v45 = vmul.f32 %v21425_v61, %v20222_v40  ;;  %v21426_v8 = vmov %v21425_v61  ;;  %v9824_v12 = vadd.f32 %v9822_v33, %v9818_v49  ;;  %16196 = vmatprep.mubr.f32.mxu0 %v21428_v60  ;;  %16376 = vmatprep.mubr.f32.mxu1 %v21428_v60  ;;  %p18011_p8 = pnand %p18010_p5, %p21500_p2 }
 0x274   : > { %v10488_v1 = vmul.f32 %v20212_v56, %v21426_v8  ;;  %v9825_v24 = vadd.f32 %v9823_v39, %v9819_v52  ;;  %v21427_v54 = vstv %s20164_s11  ;;  %v7937_v8 = vand.u32 4294901760, %v7936_v43  ;;  %s18013_s11 = sshll.u32 %s18092_s30, 4  ;;  %s18014_s11 = int_to_ptr.vmem [resolvable:$false] %s18013_s11 }
 0x275   : > { %v10493_v29 = vmul.f32 %v21427_v54, %v20234_v15  ;;  %v20373_v61 = vpack.c.bf16 %v7831_v21, %v7828_v34  ;;  %v7943_v11 = vsub.f32 %v7814_v18, %v7831_v21  ;;  %v10489_v27 = vadd.f32 %v10487_v45, %v19951_v36  ;;  %p18012_p10 = pneg %p18011_p8  ;;  %s18015_s17 = scalar_lea.vmem %s18014_s11, 4096 }
 0x276   : > { %v9827_v33 = vand.u32 4294901760, %v9824_v12  ;;  %v9830_v39 = vand.u32 4294901760, %v9825_v24  ;;  %v10490_v49 = vadd.f32 %v10488_v1, %v19953_v55  ;;  %v21429_v52 = vmov %v21427_v54  ;;  %16197 = vmatmul.mubr.f32.vlgmr.msra.gmra.mrb[12].mxu0 %v20109_v41  ;;  %16377 = vmatmul.mubr.f32.vlgmr.msra.gmra.mrb[12].mxu1 %v20109_v41  ;;  %p18016_p4 = scmp.lt.s32.totalorder %s21178_s23, %s18014_s11  ;;  %p18017_p12 = scmp.lt.s32.totalorder %s18015_s17, %s18009_s4 }
 0x277   : > { %v10494_v54 = vmul.f32 %v20228_v38, %v21429_v52  ;;  %v7938_v5 = vsub.f32 %v7936_v43, %v7937_v8  ;;  %v7944_v19 = vand.u32 4294901760, %v7943_v11  ;;  %v20382_v28 = vpack.c.bf16 %v7943_v11, %v7936_v43  ;;  %17195 = vmatpush3.bf16.msra.mxu0 %v20254_v3  ;;  %17267 = vmatpush3.bf16.msra.mxu1 %v20256_v44 }
 0x278   : > { %v10495_v34 = vadd.f32 %v10493_v29, %v10489_v27  ;;  %v20386_v18 = vpack.c.bf16 %v9830_v39, %v9827_v33  ;;  %v9935_v36 = vsub.f32 %v9824_v12, %v9827_v33  ;;  %v9942_v21 = vsub.f32 %v9825_v24, %v9830_v39  ;;  %17197 = vmatprep.subr.bf16.mxu0 %v20271_v32  ;;  %p18018_p0 = por %p18017_p12, %p18016_p4 }
 0x279   : > { %v7939_v55 = vand.u32 4294901760, %v7938_v5  ;;  %v7945_v1 = vsub.f32 %v7943_v11, %v7944_v19  ;;  %v20391_v43 = vpack.c.bf16 %v7944_v19, %v7937_v8  ;;  %v10496_v27 = vadd.f32 %v10494_v54, %v10490_v49  ;;  %17269 = vmatprep.subr.bf16.mxu1 %v20273_v35  ;;  %16199 = vmatprep.mubr.f32.mxu0 %v20127_v31 }
 0x27a   : > { %v9936_v29 = vand.u32 4294901760, %v9935_v36  ;;  %v9943_v12 = vand.u32 4294901760, %v9942_v21  ;;  %v20395_v24 = vpack.c.bf16 %v9942_v21, %v9935_v36  ;;  %v10498_v33 = vand.u32 4294901760, %v10495_v34  ;;  %16379 = vmatprep.mubr.f32.mxu1 %v20127_v31  ;;  %16200 = vmatmul.mubr.f32.gmra.mrb[14].mxu0 %v20129_v17  ;;  %p18019_p7 = pnand %p18018_p0, %p18012_p10 }
 0x27b   : > { %v7946_v5 = vand.u32 4294901760, %v7945_v1  ;;  %v10501_v11 = vand.u32 4294901760, %v10496_v27  ;;  %v12486_v19 = vmul.f32 %v12485_v26, %v20222_v40  ;;  %v12487_v8 = vmul.f32 %v20212_v56, %v12485_v26  ;;  %16380 = vmatmul.mubr.f32.gmra.mrb[14].mxu1 %v20129_v17  ;;  %v21430_v1 = vld [vmem:[#allocation24_spill] sm:$0xff] }
 0x27c   : > { %v9937_v39 = vsub.f32 %v9935_v36, %v9936_v29  ;;  %v9944_v49 = vsub.f32 %v9942_v21, %v9943_v12  ;;  %v20407_v52 = vpack.c.bf16 %v9943_v12, %v9936_v29  ;;  %16206 = vmatprep.mubr.f32.mxu0 %v21430_v1  ;;  %16386 = vmatprep.mubr.f32.mxu1 %v21430_v1  ;;  %v21431_v21 = vstv %s20264_s10 }
 0x27d   : > { %v20412_v45 = vpack.c.bf16 %v7946_v5, %v7939_v55  ;;  %v20414_v31 = vpack.c.bf16 %v10501_v11, %v10498_v33  ;;  %v12488_v26 = vadd.f32 %v12486_v19, %v19981_v6  ;;  %v12489_v36 = vadd.f32 %v12487_v8, %v19983_v57 }
 0x27e   : > { %v9938_v60 = vand.u32 4294901760, %v9937_v39  ;;  %v9945_v17 = vand.u32 4294901760, %v9944_v49  ;;  %v12492_v29 = vmul.f32 %v21431_v21, %v20234_v15  ;;  %v21432_v12 = vmov %v21431_v21  ;;  %16207 = vmatmul.mubr.f32.vlgmr.msra.gmra.mrb[12].mxu0 %v20150_v62 }
 0x27f   : > { %v12493_v54 = vmul.f32 %v20228_v38, %v21432_v12  ;;  %v10606_v9 = vsub.f32 %v10495_v34, %v10498_v33  ;;  %v10613_v1 = vsub.f32 %v10496_v27, %v10501_v11  ;;  %v21433_v55 = vstv %s20275_s19  ;;  %16387 = vmatmul.mubr.f32.vlgmr.msra.gmra.mrb[12].mxu1 %v20150_v62  ;;  %17199 = vmatpush3.bf16.msra.mxu0 %v20271_v32 }
 0x280   : > { %v11151_v5 = vmul.f32 %v21433_v55, %v20222_v40  ;;  %v21434_v6 = vsub.f32 %v20166_v48, %v20186_v23  ;;  %v20435_v57 = vpack.c.bf16 %v9945_v17, %v9938_v60  ;;  %v12494_v8 = vadd.f32 %v12492_v29, %v12488_v26  ;;  %17271 = vmatpush3.bf16.msra.mxu1 %v20273_v35 }
 0x281   : > { %v21436_v39 = vmov %v21433_v55  ;;  %v12495_v27 = vadd.f32 %v12493_v54, %v12489_v36  ;;  %v10607_v33 = vand.u32 4294901760, %v10606_v9  ;;  %v10614_v11 = vand.u32 4294901760, %v10613_v1  ;;  %17201 = vmatprep.subr.bf16.mxu0 %v20254_v3  ;;  %17273 = vmatprep.subr.bf16.mxu1 %v20256_v44 }
 0x282   : > { %v20433_v19 = vand.u32 4294901760, %v21434_v6  ;;  %v11152_v34 = vmul.f32 %v20212_v56, %v21436_v39  ;;  %v20442_v49 = vpack.c.bf16 %v10613_v1, %v10606_v9  ;;  %v12497_v17 = vand.u32 4294901760, %v12494_v8  ;;  %16209 = vmatprep.mubr.f32.mxu0 %v20157_v53  ;;  %16389 = vmatprep.mubr.f32.mxu1 %v20157_v53 }
 0x283   : > { %v11153_v60 = vadd.f32 %v11151_v5, %v19995_v63  ;;  %v21437_v32 = vstv %s20279_s20  ;;  %v12500_v54 = vand.u32 4294901760, %v12495_v27  ;;  %v10608_v36 = vsub.f32 %v10606_v9, %v10607_v33  ;;  %16210 = vmatmul.mubr.f32.gmra.mrb[14].mxu0 %v20160_v47  ;;  %16390 = vmatmul.mubr.f32.gmra.mrb[14].mxu1 %v20160_v47 }
 0x284   : > { %21435 = vst [vmem:[#allocation22_spill] sm:$0xff] %v20433_v19  ;;  %v11154_v26 = vadd.f32 %v11152_v34, %v19997_v13  ;;  %v11157_v35 = vmul.f32 %v21437_v32, %v20234_v15  ;;  %v10615_v21 = vsub.f32 %v10613_v1, %v10614_v11  ;;  %v20455_v29 = vpack.c.bf16 %v10614_v11, %v10607_v33 }
 0x285   : > { %v21438_v63 = vsub.f32 %v20168_v37, %v20189_v58  ;;  %v12605_v12 = vsub.f32 %v12494_v8, %v12497_v17  ;;  %v21439_v55 = vmov %v21437_v32  ;;  %16216 = vmatprep.mubr.msk.f32.mxu0 %vm331_vm0, %v21419_v50  ;;  %16396 = vmatprep.mubr.msk.f32.mxu1 %vm331_vm0, %v21419_v50  ;;  %v20471_v9 = vpack.c.bf16 %v12500_v54, %v12497_v17 }
 0x286   : > { %v11158_v5 = vmul.f32 %v20228_v38, %v21439_v55  ;;  %v11159_v6 = vadd.f32 %v11157_v35, %v11153_v60  ;;  %v10609_v1 = vand.u32 4294901760, %v10608_v36  ;;  %v10616_v39 = vand.u32 4294901760, %v10615_v21 }
 0x287   : > { %v20462_v13 = vand.u32 4294901760, %v21438_v63  ;;  %v12612_v34 = vsub.f32 %v12495_v27, %v12500_v54  ;;  %v12606_v33 = vand.u32 4294901760, %v12605_v12  ;;  %v21440_v32 = vstv %s20293_s22  ;;  %16217 = vmatmul.mubr.msk.f32.vlgmr.msra.gmra.mrb[12].mxu0 %vm331_vm0, %v19828_v22  ;;  %16397 = vmatmul.mubr.msk.f32.vlgmr.msra.gmra.mrb[12].mxu1 %vm331_vm0, %v19828_v22 }
 0x288   : > { %v11160_v11 = vadd.f32 %v11158_v5, %v11154_v26  ;;  %v11162_v8 = vand.u32 4294901760, %v11159_v6  ;;  %v13150_v63 = vmul.f32 %v21440_v32, %v20222_v40  ;;  %v20476_v60 = vpack.c.bf16 %v10616_v39, %v10609_v1  ;;  %17203 = vmatpush3.bf16.msra.mxu0 %v20254_v3  ;;  %17275 = vmatpush3.bf16.msra.mxu1 %v20256_v44 }
 0x289   : > { %v12613_v35 = vand.u32 4294901760, %v12612_v34  ;;  %v20478_v55 = vpack.c.bf16 %v12612_v34, %v12605_v12  ;;  %v21441_v41 = vmov %v21440_v32  ;;  %v12607_v27 = vsub.f32 %v12605_v12, %v12606_v33  ;;  %17205 = vmatprep.subr.bf16.mxu0 %v20268_v2  ;;  %17277 = vmatprep.subr.bf16.mxu1 %v20289_v20 }
 0x28a   : > { %v13151_v17 = vmul.f32 %v20212_v56, %v21441_v41  ;;  %v11165_v26 = vand.u32 4294901760, %v11160_v11  ;;  %v13152_v54 = vadd.f32 %v13150_v63, %v20015_v25  ;;  %v21442_v36 = vstv %s20303_s27  ;;  %16219 = vmatprep.mubr.msk.f32.mxu0 %vm331_vm0, %v20068_v46  ;;  %16399 = vmatprep.mubr.msk.f32.mxu1 %vm331_vm0, %v20068_v46 }
 0x28b   : > { %v13156_v21 = vmul.f32 %v21442_v36, %v20234_v15  ;;  %v12614_v41 = vsub.f32 %v12612_v34, %v12613_v35  ;;  %v20493_v5 = vpack.c.bf16 %v12613_v35, %v12606_v33  ;;  %v12608_v25 = vand.u32 4294901760, %v12607_v27  ;;  %16220 = vmatmul.mubr.msk.f32.gmra.mrb[14].mxu0 %vm331_vm0, %v20071_v59  ;;  %16400 = vmatmul.mubr.msk.f32.gmra.mrb[14].mxu1 %vm331_vm0, %v20071_v59 }
 0x28c   : > { %v13153_v1 = vadd.f32 %v13151_v17, %v20017_v30  ;;  %v20499_v12 = vpack.c.bf16 %v11165_v26, %v11162_v8  ;;  %v21444_v32 = vmov %v21442_v36  ;;  %v11270_v34 = vsub.f32 %v11159_v6, %v11162_v8  ;;  %16226 = vmatprep.mubr.msk.f32.mxu0 %vm331_vm0, %v21419_v50  ;;  %16406 = vmatprep.mubr.msk.f32.mxu1 %vm331_vm0, %v21419_v50 }
 0x28d   : > { %v13157_v3 = vmul.f32 %v20228_v38, %v21444_v32  ;;  %v13158_v44 = vadd.f32 %v13156_v21, %v13152_v54  ;;  %v12615_v30 = vand.u32 4294901760, %v12614_v41  ;;  %v11277_v33 = vsub.f32 %v11160_v11, %v11165_v26 }
 0x28e   : > { %21443 = vst [vmem:[#allocation47_spill] sm:$0xff] %v20499_v12  ;;  %v21445_v63 = vstv %s20334_s29  ;;  %v21447_v21 = vstv %s20369_s6  ;;  %v11271_v11 = vand.u32 4294901760, %v11270_v34  ;;  %v21452_v53 = vstv %s20369_s6 }
 0x28f   : > { %v11815_v35 = vmul.f32 %v21445_v63, %v20222_v40  ;;  %v13159_v17 = vadd.f32 %v13157_v3, %v13153_v1  ;;  %v13161_v27 = vand.u32 4294901760, %v13158_v44  ;;  %v21446_v54 = vmov %v21445_v63  ;;  %v21449_v3 = vld [vmem:[#allocation28_spill] sm:$0xff]  ;;  %16227 = vmatmul.mubr.msk.f32.vlgmr.msra.gmra.mrb[12].mxu0 %vm331_vm0, %v19828_v22  ;;  %16407 = vmatmul.mubr.msk.f32.vlgmr.msra.gmra.mrb[12].mxu1 %vm331_vm0, %v19828_v22 }
 0x290   : > { %v11816_v36 = vmul.f32 %v20212_v56, %v21446_v54  ;;  %v11821_v41 = vmul.f32 %v21447_v21, %v20234_v15  ;;  %v20525_v6 = vpack.c.bf16 %v12615_v30, %v12608_v25  ;;  %v11278_v8 = vand.u32 4294901760, %v11277_v33  ;;  %v21450_v54 = vld [vmem:[#allocation29_spill] sm:$0xff]  ;;  %17207 = vmatpush3.bf16.msra.mxu0 %v20268_v2  ;;  %17279 = vmatpush3.bf16.msra.mxu1 %v20289_v20 }
 0x291   : > { %v20527_v26 = vpack.c.bf16 %v11277_v33, %v11270_v34  ;;  %v13164_v1 = vand.u32 4294901760, %v13159_v17  ;;  %v13269_v32 = vsub.f32 %v13158_v44, %v13161_v27  ;;  %v11817_v63 = vadd.f32 %v11815_v35, %v21449_v3  ;;  %17209 = vmatprep.subr.bf16.mxu0 %v20318_v14  ;;  %17281 = vmatprep.subr.bf16.mxu1 %v20346_v10 }
 0x292   : > { %v11818_v39 = vadd.f32 %v11816_v36, %v21450_v54  ;;  %v11272_v21 = vsub.f32 %v11270_v34, %v11271_v11  ;;  %v11279_v12 = vsub.f32 %v11277_v33, %v11278_v8  ;;  %v20531_v47 = vpack.c.bf16 %v11278_v8, %v11271_v11  ;;  %16229 = vmatprep.mubr.msk.f32.mxu0 %vm331_vm0, %v20068_v46 }
 0x293   : > { %21448 = vst [vmem:[#allocation48_spill] sm:$0xff] %v20527_v26  ;;  %v11822_v62 = vmul.f32 %v20228_v38, %v21452_v53  ;;  %v20540_v25 = vpack.c.bf16 %v13164_v1, %v13161_v27  ;;  %v13270_v44 = vand.u32 4294901760, %v13269_v32  ;;  %v13276_v30 = vsub.f32 %v13159_v17, %v13164_v1  ;;  %16409 = vmatprep.mubr.msk.f32.mxu1 %vm331_vm0, %v20068_v46  ;;  %v21456_v1 = vld [vmem:[#allocation30_spill] sm:$0xff] }
 0x294   : > { %21451 = vst [vmem:[#allocation28_spill] sm:$0xff] %v20531_v47  ;;  %v11823_v35 = vadd.f32 %v11821_v41, %v11817_v63  ;;  %v11273_v34 = vand.u32 4294901760, %v11272_v21  ;;  %v11280_v33 = vand.u32 4294901760, %v11279_v12  ;;  %v21453_v53 = vstv %s20376_s8  ;;  %16230 = vmatmul.mubr.msk.f32.gmra.mrb[14].mxu0 %vm331_vm0, %v20071_v59  ;;  %16410 = vmatmul.mubr.msk.f32.gmra.mrb[14].mxu1 %vm331_vm0, %v20071_v59 }
 0x295   : > { %v11824_v36 = vadd.f32 %v11822_v62, %v11818_v39  ;;  %v13814_v11 = vmul.f32 %v21453_v53, %v20222_v40  ;;  %v13271_v27 = vsub.f32 %v13269_v32, %v13270_v44  ;;  %v13277_v8 = vand.u32 4294901760, %v13276_v30  ;;  %16236 = vmatprep.mubr.f32.mxu0 %v20433_v19  ;;  %16416 = vmatprep.mubr.f32.mxu1 %v20433_v19 }
 0x296   : > { %v20549_v17 = vpack.c.bf16 %v13276_v30, %v13269_v32  ;;  %v11826_v41 = vand.u32 4294901760, %v11823_v35  ;;  %v20555_v62 = vpack.c.bf16 %v11280_v33, %v11273_v34  ;;  %v21455_v39 = vmov %v21453_v53  ;;  %v21460_v33 = vld [vmem:[#allocation31_spill] sm:$0xff] }
 0x297   : > { %v11829_v40 = vand.u32 4294901760, %v11824_v36  ;;  %v13815_v12 = vmul.f32 %v20212_v56, %v21455_v39  ;;  %v13816_v3 = vadd.f32 %v13814_v11, %v21456_v1  ;;  %v13272_v32 = vand.u32 4294901760, %v13271_v27 }
 0x298   : > { %21454 = vst [vmem:[#allocation29_spill] sm:$0xff] %v20549_v17  ;;  %v13278_v63 = vsub.f32 %v13276_v30, %v13277_v8  ;;  %v20565_v54 = vpack.c.bf16 %v13277_v8, %v13270_v44  ;;  %v21458_v21 = vstv %s20444_s9  ;;  %v11934_v27 = vsub.f32 %v11823_v35, %v11826_v41  ;;  %v21462_v44 = vld [vmem:[#allocation42_spill] sm:$0xff]  ;;  %v21463_v8 = vld [vmem:[#allocation44_spill] sm:$0xff]  ;;  %16237 = vmatmul.mubr.f32.vlgmr.msra.gmra.mrb[12].mxu0 %v20462_v13 }
 0x299   : > { %v13820_v34 = vmul.f32 %v21458_v21, %v20234_v15  ;;  %v20572_v56 = vpack.c.bf16 %v11829_v40, %v11826_v41  ;;  %v13817_v53 = vadd.f32 %v13815_v12, %v21460_v33  ;;  %v21461_v11 = vmov %v21458_v21  ;;  %v21465_v15 = vld [vmem:[#allocation43_spill] sm:$0xff]  ;;  %v21466_v21 = vld [vmem:[#allocation45_spill] sm:$0xff]  ;;  %16417 = vmatmul.mubr.f32.vlgmr.msra.gmra.mrb[12].mxu1 %v20462_v13 }
 0x29a   : > { %21457 = vst [vmem:[#allocation30_spill] sm:$0xff] %v20565_v54  ;;  %v13821_v39 = vmul.f32 %v20228_v38, %v21461_v11  ;;  %v13279_v1 = vand.u32 4294901760, %v13278_v63  ;;  %v11941_v30 = vsub.f32 %v11824_v36, %v11829_v40  ;;  %v21464_v54 = vsub.f32 %v21462_v44, %v21463_v8  ;;  %17211 = vmatpush3.bf16.msra.mxu0 %v20318_v14 }
 0x29b   : > { %21459 = vst [vmem:[#allocation49_spill] sm:$0xff] %v20572_v56  ;;  %v13822_v47 = vadd.f32 %v13820_v34, %v13816_v3  ;;  %v21467_v26 = vsub.f32 %v21465_v15, %v21466_v21  ;;  %v11935_v35 = vand.u32 4294901760, %v11934_v27  ;;  %17283 = vmatpush3.bf16.msra.mxu1 %v20346_v10  ;;  %17213 = vmatprep.subr.bf16.mxu0 %v20291_v7 }
 0x29c   : > { %v20581_v17 = vand.u32 4294901760, %v21464_v54  ;;  %v13823_v56 = vadd.f32 %v13821_v39, %v13817_v53  ;;  %v20590_v38 = vpack.c.bf16 %v13279_v1, %v13272_v32  ;;  %v11942_v36 = vand.u32 4294901760, %v11941_v30  ;;  %17285 = vmatprep.subr.bf16.mxu1 %v20300_v42  ;;  %v21469_v53 = vld [vmem:[#allocation33_spill] sm:$0xff] }
 0x29d   : > { %v20586_v19 = vand.u32 4294901760, %v21467_v26  ;;  %v13825_v12 = vand.u32 4294901760, %v13822_v47  ;;  %v20594_v40 = vpack.c.bf16 %v11941_v30, %v11934_v27  ;;  %v11936_v26 = vsub.f32 %v11934_v27, %v11935_v35 }
 0x29e   : > { %v13828_v41 = vand.u32 4294901760, %v13823_v56  ;;  %v11943_v3 = vsub.f32 %v11941_v30, %v11942_v36  ;;  %16239 = vmatprep.mubr.f32.mxu0 %v20581_v17  ;;  %16419 = vmatprep.mubr.f32.mxu1 %v20581_v17  ;;  %v20602_v14 = vpack.c.bf16 %v11942_v36, %v11935_v35  ;;  %v21471_v30 = vld [vmem:[#allocation34_spill] sm:$0xff]  ;;  %v21472_v36 = vld [vmem:[#allocation35_spill] sm:$0xff] }
 0x29f   : > { %v13933_v63 = vsub.f32 %v13822_v47, %v13825_v12  ;;  %16240 = vmatmul.mubr.f32.gmra.mrb[14].mxu0 %v20586_v19  ;;  %16420 = vmatmul.mubr.f32.gmra.mrb[14].mxu1 %v20586_v19  ;;  %v11937_v10 = vand.u32 4294901760, %v11936_v26  ;;  %v21473_v26 = vld [vmem:[#allocation36_spill] sm:$0xff] }
 0x2a0   : > { %v20600_v32 = vpack.c.bf16 %v13828_v41, %v13825_v12  ;;  %v13940_v54 = vsub.f32 %v13823_v56, %v13828_v41  ;;  %21468 = vst [vmem:[#allocation31_spill] sm:$0xff] %v20602_v14  ;;  %v11944_v34 = vand.u32 4294901760, %v11943_v3  ;;  %16246 = vmatprep.mubr.msk.f32.mxu0 %vm331_vm0, %v21469_v53  ;;  %16426 = vmatprep.mubr.msk.f32.mxu1 %vm331_vm0, %v21469_v53  ;;  %v21475_v3 = vld [vmem:[#allocation19_spill] sm:$0xff] }
 0x2a1   : > { %v13934_v33 = vand.u32 4294901760, %v13933_v63 }
 0x2a2   : > { %v13941_v47 = vand.u32 4294901760, %v13940_v54  ;;  %v20610_v11 = vpack.c.bf16 %v13940_v54, %v13933_v63  ;;  %v20612_v39 = vpack.c.bf16 %v11944_v34, %v11937_v10  ;;  %v21477_v10 = vld [vmem:[#allocation21_spill] sm:$0xff]  ;;  %v21478_v34 = vld [vmem:[#allocation26_spill] sm:$0xff] }
 0x2a3   : > { %v13935_v56 = vsub.f32 %v13933_v63, %v13934_v33  ;;  %16247 = vmatmul.mubr.msk.f32.vlgmr.msra.gmra.mrb[12].mxu0 %vm331_vm0, %v21471_v30  ;;  %16427 = vmatmul.mubr.msk.f32.vlgmr.msra.gmra.mrb[12].mxu1 %vm331_vm0, %v21471_v30  ;;  %v306_v63 = vadd.s32 1, %v21475_v3 }
 0x2a4   : > { %v13942_v1 = vsub.f32 %v13940_v54, %v13941_v47  ;;  %v20614_v27 = vpack.c.bf16 %v13941_v47, %v13934_v33  ;;  %17215 = vmatpush3.bf16.msra.mxu0 %v20291_v7  ;;  %17287 = vmatpush3.bf16.msra.mxu1 %v20300_v42  ;;  %v21474_v7 = vld [vmem:[#allocation18_spill] sm:$0xff]  ;;  %v21476_v54 = vld [vmem:[#allocation20_spill] sm:$0xff]  ;;  %v307_v33 = vadd.s32 1, %v21478_v34  ;;  %v21479_v47 = vld [vmem:[#allocation27_spill] sm:$0xff] }
 0x2a5   : > { %v13936_v12 = vand.u32 4294901760, %v13935_v56  ;;  %17217 = vmatprep.subr.bf16.mxu0 %v20268_v2  ;;  %17289 = vmatprep.subr.bf16.mxu1 %v20289_v20  ;;  %v305_v42 = vadd.s32 1, %v21474_v7  ;;  %vm310_vm4 = vcmp.ge.s32.totalorder %v306_v63, %v21476_v54  ;;  %vm314_vm5 = vcmp.lt.s32.totalorder %v306_v63, %v21477_v10 }
 0x2a6   : > { %21470 = vst [vmem:[#allocation42_spill] sm:$0xff] %v20614_v27  ;;  %v13943_v35 = vand.u32 4294901760, %v13942_v1  ;;  %16249 = vmatprep.mubr.msk.f32.mxu0 %vm331_vm0, %v21472_v36  ;;  %16429 = vmatprep.mubr.msk.f32.mxu1 %vm331_vm0, %v21472_v36  ;;  %v308_v56 = vadd.s32 1, %v21479_v47  ;;  %v21480_v1 = vmov 0.0   ;;  %vm318_vm6 = vmand %vm310_vm4, %vm314_vm5  ;;  %vm311_vm7 = vcmp.ge.s32.totalorder %v307_v33, %v21476_v54 }
 0x2a7   : > { %16250 = vmatmul.mubr.msk.f32.gmra.mrb[14].mxu0 %vm331_vm0, %v21473_v26  ;;  %16430 = vmatmul.mubr.msk.f32.gmra.mrb[14].mxu1 %vm331_vm0, %v21473_v26  ;;  %vm309_vm1 = vcmp.ge.s32.totalorder %v305_v42, %v21476_v54  ;;  %vm313_vm2 = vcmp.lt.s32.totalorder %v305_v42, %v21477_v10  ;;  %vm315_vm8 = vcmp.lt.s32.totalorder %v307_v33, %v21477_v10  ;;  %v20672_v7 = vsel %vm318_vm6, 1.0, %v21480_v1 }
 0x2a8   : > { %v20628_v41 = vpack.c.bf16 %v13943_v35, %v13936_v12  ;;  %16256 = vmatprep.mubr.f32.mxu0 %v20166_v48  ;;  %16436 = vmatprep.mubr.f32.mxu1 %v20166_v48  ;;  %vm317_vm3 = vmand %vm309_vm1, %vm313_vm2  ;;  %vm312_vm9 = vcmp.ge.s32.totalorder %v308_v56, %v21476_v54  ;;  %vm316_vm10 = vcmp.lt.s32.totalorder %v308_v56, %v21477_v10 }
 0x2a9   : > { %v20657_v12 = vsel %vm317_vm3, 1.0, %v21480_v1  ;;  %vm319_vm11 = vmand %vm311_vm7, %vm315_vm8 }
 0x2aa   : > { %v7816_v35 = vsel %vm331_vm0, %v20657_v12, 0  ;;  %vm320_vm12 = vmand %vm312_vm9, %vm316_vm10  ;;  %v20687_v42 = vsel %vm319_vm11, 1.0, %v21480_v1 }
 0x2ab   : > { %16257 = vmatmul.mubr.f32.vlgmr.msra.gmra.mrb[12].mxu0 %v20168_v37  ;;  %16437 = vmatmul.mubr.f32.vlgmr.msra.gmra.mrb[12].mxu1 %v20168_v37  ;;  %v20690_v3 = vsel %vm320_vm12, 1.0, %v21480_v1  ;;  %v7822_v54 = vsel %vm331_vm0, %v20687_v42, 0 }
 0x2ac   : > { %17219 = vmatpush3.bf16.msra.mxu0 %v20268_v2  ;;  %17291 = vmatpush3.bf16.msra.mxu1 %v20289_v20  ;;  %v7825_v34 = vsel %vm331_vm0, %v20690_v3, 0  ;;  %v20713_v33 = vsub.f32 %v7822_v54, %v7822_v54 }
 0x2ad   : > { %17221 = vmatprep.subr.bf16.mxu0 %v20296_v4  ;;  %17293 = vmatprep.subr.bf16.mxu1 %v20311_v51 }
 0x2ae   : > { %16259 = vmatprep.mubr.f32.mxu0 %v21462_v44  ;;  %16439 = vmatprep.mubr.f32.mxu1 %v21462_v44  ;;  %v20731_v56 = vand.u32 4294901760, %v20713_v33 }
 0x2af   : > { %16260 = vmatmul.mubr.f32.gmra.mrb[14].mxu0 %v21465_v15  ;;  %16440 = vmatmul.mubr.f32.gmra.mrb[14].mxu1 %v21465_v15 }
 0x2b0   : > { %16266 = vmatprep.mubr.f32.mxu0 %v20186_v23  ;;  %16446 = vmatprep.mubr.f32.mxu1 %v20186_v23  ;;  %v7917_v54 = vsub.f32 %v20713_v33, %v20731_v56 }
 0x2b2   : > { %v20764_v27 = vand.u32 4294901760, %v7917_v54 }
 0x2b3   : > { %16267 = vmatmul.mubr.f32.vlgmr.msra.gmra.mrb[12].mxu0 %v20189_v58  ;;  %16447 = vmatmul.mubr.f32.vlgmr.msra.gmra.mrb[12].mxu1 %v20189_v58 }
 0x2b4   : > { %17223 = vmatpush3.bf16.msra.mxu0 %v20296_v4  ;;  %17295 = vmatpush3.bf16.msra.mxu1 %v20311_v51  ;;  %v20682_v4 = vsub.f32 %v7816_v35, %v7816_v35  ;;  %v7819_v51 = vsel %vm331_vm0, %v20672_v7, 0 }
 0x2b5   : > { %17225 = vmatprep.subr.bf16.mxu0 %v20268_v2  ;;  %17297 = vmatprep.subr.bf16.mxu1 %v20289_v20  ;;  %v20696_v63 = vsub.f32 %v7819_v51, %v7819_v51 }
 0x2b6   : > { %16269 = vmatprep.mubr.f32.mxu0 %v21463_v8  ;;  %16449 = vmatprep.mubr.f32.mxu1 %v21463_v8  ;;  %v20703_v10 = vand.u32 4294901760, %v20682_v4 }
 0x2b7   : > { %16270 = vmatmul.mubr.f32.gmra.mrb[14].mxu0 %v21466_v21  ;;  %16450 = vmatmul.mubr.f32.gmra.mrb[14].mxu1 %v21466_v21 }
 0x2b8   : > { %16276 = vmatprep.mubr.msk.f32.mxu0 %vm331_vm0, %v21469_v53  ;;  %16456 = vmatprep.mubr.msk.f32.mxu1 %vm331_vm0, %v21469_v53  ;;  %v7897_v47 = vsub.f32 %v20682_v4, %v20703_v10 }
 0x2ba   : > { %v20744_v51 = vand.u32 4294901760, %v7897_v47 }
 0x2bb   : > { %16277 = vmatmul.mubr.msk.f32.vlgmr.msra.gmra.mrb[12].mxu0 %vm331_vm0, %v21471_v30  ;;  %16457 = vmatmul.mubr.msk.f32.vlgmr.msra.gmra.mrb[12].mxu1 %vm331_vm0, %v21471_v30 }
 0x2bc   : > { %17227 = vmatpush3.bf16.msra.mxu0 %v20268_v2  ;;  %17299 = vmatpush3.bf16.msra.mxu1 %v20289_v20  ;;  %v20720_v2 = vand.u32 4294901760, %v20696_v63  ;;  %v20722_v20 = vsub.f32 %v7825_v34, %v7825_v34 }
 0x2bd   : > { %17229 = vmatprep.subr.bf16.mxu0 %v20373_v61  ;;  %17301 = vmatprep.subr.bf16.mxu1 %v20386_v18 }
 0x2be   : > { %16279 = vmatprep.mubr.msk.f32.mxu0 %vm331_vm0, %v21472_v36  ;;  %16459 = vmatprep.mubr.msk.f32.mxu1 %vm331_vm0, %v21472_v36  ;;  %v7907_v1 = vsub.f32 %v20696_v63, %v20720_v2  ;;  %v20740_v35 = vand.u32 4294901760, %v20722_v20 }
 0x2bf   : > { %16280 = vmatmul.mubr.msk.f32.gmra.mrb[14].mxu0 %vm331_vm0, %v21473_v26  ;;  %16460 = vmatmul.mubr.msk.f32.gmra.mrb[14].mxu1 %vm331_vm0, %v21473_v26 }
 0x2c0   : > { %16286 = vmatprep.mubr.msk.f32.mxu0 %vm331_vm0, %v21469_v53  ;;  %16466 = vmatprep.mubr.msk.f32.mxu1 %vm331_vm0, %v21469_v53  ;;  %v20758_v34 = vand.u32 4294901760, %v7907_v1  ;;  %v7927_v47 = vsub.f32 %v20722_v20, %v20740_v35 }
 0x2c2   : > { %v20768_v14 = vand.u32 4294901760, %v7927_v47 }
 0x2c3   : > { %16287 = vmatmul.mubr.msk.f32.vlgmr.msra.gmra.mrb[12].mxu0 %vm331_vm0, %v21471_v30  ;;  %16467 = vmatmul.mubr.msk.f32.vlgmr.msra.gmra.mrb[12].mxu1 %vm331_vm0, %v21471_v30 }
 0x2c4   : > { %17231 = vmatpush3.bf16.msra.mxu0 %v20373_v61  ;;  %17303 = vmatpush3.bf16.msra.mxu1 %v20386_v18 }
 0x2c5   : > { %17233 = vmatprep.subr.bf16.mxu0 %v20412_v45  ;;  %17305 = vmatprep.subr.bf16.mxu1 %v20435_v57 }
 0x2c6   : > { %16289 = vmatprep.mubr.msk.f32.mxu0 %vm331_vm0, %v21472_v36  ;;  %16469 = vmatprep.mubr.msk.f32.mxu1 %vm331_vm0, %v21472_v36 }
 0x2c7   : > { %16290 = vmatmul.mubr.msk.f32.gmra.mrb[14].mxu0 %vm331_vm0, %v21473_v26  ;;  %16470 = vmatmul.mubr.msk.f32.gmra.mrb[14].mxu1 %vm331_vm0, %v21473_v26 }
 0x2c8   : > { %16296 = vmatprep.mubr.f32.mxu0 %v20744_v51  ;;  %16476 = vmatprep.mubr.f32.mxu1 %v20744_v51 }
 0x2cb   : > { %16297 = vmatmul.mubr.f32.vlgmr.msra.gmra.mrb[12].mxu0 %v20758_v34  ;;  %16477 = vmatmul.mubr.f32.vlgmr.msra.gmra.mrb[12].mxu1 %v20758_v34 }
 0x2cc   : > { %17235 = vmatpush3.bf16.msra.mxu0 %v20412_v45  ;;  %17307 = vmatpush3.bf16.msra.mxu1 %v20435_v57  ;;  %v21486_v45 = vld [vmem:[#allocation38_spill] sm:$0xff]  ;;  %v21490_v57 = vld [vmem:[#allocation41_spill] sm:$0xff] }
 0x2cd   : > { %17237 = vmatprep.subr.bf16.mxu0 %v20382_v28  ;;  %17309 = vmatprep.subr.bf16.mxu1 %v20395_v24 }
 0x2ce   : > { %16299 = vmatprep.mubr.f32.mxu0 %v20764_v27  ;;  %16479 = vmatprep.mubr.f32.mxu1 %v20764_v27 }
 0x2cf   : > { %16300 = vmatmul.mubr.f32.gmra.mrb[14].mxu0 %v20768_v14  ;;  %16480 = vmatmul.mubr.f32.gmra.mrb[14].mxu1 %v20768_v14 }
 0x2d0   : > { %16306 = vmatprep.mubr.msk.f32.mxu0 %vm331_vm0, %v20657_v12  ;;  %16486 = vmatprep.mubr.msk.f32.mxu1 %vm331_vm0, %v20657_v12 }
 0x2d3   : > { %16307 = vmatmul.mubr.msk.f32.vlgmr.msra.gmra.mrb[12].mxu0 %vm331_vm0, %v20672_v7  ;;  %16487 = vmatmul.mubr.msk.f32.vlgmr.msra.gmra.mrb[12].mxu1 %vm331_vm0, %v20672_v7 }
 0x2d4   : > { %17239 = vmatpush3.bf16.msra.mxu0 %v20382_v28  ;;  %17311 = vmatpush3.bf16.msra.mxu1 %v20395_v24  ;;  %v21481_v28 = vld [vmem:[#allocation25_spill] sm:$0xff]  ;;  %v21488_v24 = vld [vmem:[#allocation39_spill] sm:$0xff] }
 0x2d5   : > { %17241 = vmatprep.subr.bf16.mxu0 %v20373_v61  ;;  %17313 = vmatprep.subr.bf16.mxu1 %v20386_v18 }
 0x2d6   : > { %16309 = vmatprep.mubr.msk.f32.mxu0 %vm331_vm0, %v20687_v42  ;;  %16489 = vmatprep.mubr.msk.f32.mxu1 %vm331_vm0, %v20687_v42 }
 0x2d7   : > { %16310 = vmatmul.mubr.msk.f32.gmra.mrb[14].mxu0 %vm331_vm0, %v20690_v3  ;;  %16490 = vmatmul.mubr.msk.f32.gmra.mrb[14].mxu1 %vm331_vm0, %v20690_v3 }
 0x2d8   : > { %16316 = vmatprep.mubr.f32.mxu0 %v20682_v4  ;;  %16496 = vmatprep.mubr.f32.mxu1 %v20682_v4 }
 0x2db   : > { %16317 = vmatmul.mubr.f32.vlgmr.msra.gmra.mrb[12].mxu0 %v20696_v63  ;;  %16497 = vmatmul.mubr.f32.vlgmr.msra.gmra.mrb[12].mxu1 %v20696_v63 }
 0x2dc   : > { %17243 = vmatpush3.bf16.msra.mxu0 %v20373_v61  ;;  %17315 = vmatpush3.bf16.msra.mxu1 %v20386_v18 }
 0x2dd   : > { %17245 = vmatprep.subr.bf16.mxu0 %v20391_v43  ;;  %17317 = vmatprep.subr.bf16.mxu1 %v20407_v52 }
 0x2de   : > { %16319 = vmatprep.mubr.f32.mxu0 %v20713_v33  ;;  %16499 = vmatprep.mubr.f32.mxu1 %v20713_v33 }
 0x2df   : > { %16320 = vmatmul.mubr.f32.gmra.mrb[14].mxu0 %v20722_v20  ;;  %16500 = vmatmul.mubr.f32.gmra.mrb[14].mxu1 %v20722_v20 }
 0x2e0   : > { %16326 = vmatprep.mubr.f32.mxu0 %v20703_v10  ;;  %16506 = vmatprep.mubr.f32.mxu1 %v20703_v10 }
 0x2e3   : > { %16327 = vmatmul.mubr.f32.vlgmr.msra.gmra.mrb[12].mxu0 %v20720_v2  ;;  %16507 = vmatmul.mubr.f32.vlgmr.msra.gmra.mrb[12].mxu1 %v20720_v2 }
 0x2e4   : > { %17247 = vmatpush3.bf16.msra.mxu0 %v20391_v43  ;;  %17319 = vmatpush3.bf16.msra.mxu1 %v20407_v52  ;;  %v21487_v43 = vld [vmem:[#allocation24_spill] sm:$0xff] }
 0x2e5   : > { %17249 = vmatprep.subr.bf16.mxu0 %v20373_v61  ;;  %17321 = vmatprep.subr.bf16.mxu1 %v20386_v18  ;;  %v21489_v52 = vld [vmem:[#allocation40_spill] sm:$0xff] }
 0x2e6   : > { %16329 = vmatprep.mubr.f32.mxu0 %v20731_v56  ;;  %16509 = vmatprep.mubr.f32.mxu1 %v20731_v56 }
 0x2e7   : > { %16330 = vmatmul.mubr.f32.gmra.mrb[14].mxu0 %v20740_v35  ;;  %16510 = vmatmul.mubr.f32.gmra.mrb[14].mxu1 %v20740_v35 }
 0x2e8   : > { %16336 = vmatprep.mubr.msk.f32.mxu0 %vm331_vm0, %v20657_v12  ;;  %16516 = vmatprep.mubr.msk.f32.mxu1 %vm331_vm0, %v20657_v12 }
 0x2eb   : > { %16337 = vmatmul.mubr.msk.f32.vlgmr.msra.gmra.mrb[12].mxu0 %vm331_vm0, %v20672_v7  ;;  %16517 = vmatmul.mubr.msk.f32.vlgmr.msra.gmra.mrb[12].mxu1 %vm331_vm0, %v20672_v7 }
 0x2ec   : > { %17251 = vmatpush3.bf16.msra.mxu0 %v20373_v61  ;;  %17323 = vmatpush3.bf16.msra.mxu1 %v20386_v18  ;;  %v21482_v61 = vld [vmem:[#allocation46_spill] sm:$0xff]  ;;  %v21485_v18 = vld [vmem:[#allocation37_spill] sm:$0xff] }
 0x2ed   : > { %17325 = vmatprep.subr.bf16.mxu0 %v20414_v31  ;;  %17397 = vmatprep.subr.bf16.mxu1 %v20471_v9 }
 0x2ee   : > { %16339 = vmatprep.mubr.msk.f32.mxu0 %vm331_vm0, %v20687_v42  ;;  %16519 = vmatprep.mubr.msk.f32.mxu1 %vm331_vm0, %v20687_v42 }
 0x2ef   : > { %16340 = vmatmul.mubr.msk.f32.gmra.mrb[14].mxu0 %vm331_vm0, %v20690_v3  ;;  %16520 = vmatmul.mubr.msk.f32.gmra.mrb[14].mxu1 %vm331_vm0, %v20690_v3 }
 0x2f0   : > { %16346 = vmatprep.mubr.msk.f32.mxu0 %vm331_vm0, %v20657_v12  ;;  %16526 = vmatprep.mubr.msk.f32.mxu1 %vm331_vm0, %v20657_v12 }
 0x2f3   : > { %16347 = vmatmul.mubr.msk.f32.vlgmr.msra.gmra.mrb[12].mxu0 %vm331_vm0, %v20672_v7  ;;  %16527 = vmatmul.mubr.msk.f32.vlgmr.msra.gmra.mrb[12].mxu1 %vm331_vm0, %v20672_v7 }
 0x2f4   : > { %17327 = vmatpush3.bf16.msra.mxu0 %v20414_v31  ;;  %17399 = vmatpush3.bf16.msra.mxu1 %v20471_v9 }
 0x2f5   : > { %17329 = vmatprep.subr.bf16.mxu0 %v20476_v60  ;;  %17401 = vmatprep.subr.bf16.mxu1 %v20525_v6 }
 0x2f6   : > { %16349 = vmatprep.mubr.msk.f32.mxu0 %vm331_vm0, %v20687_v42  ;;  %16529 = vmatprep.mubr.msk.f32.mxu1 %vm331_vm0, %v20687_v42 }
 0x2f7   : > { %16350 = vmatmul.mubr.msk.f32.gmra.mrb[14].mxu0 %vm331_vm0, %v20690_v3  ;;  %16530 = vmatmul.mubr.msk.f32.gmra.mrb[14].mxu1 %vm331_vm0, %v20690_v3 }
 0x2f8   : > { %16536 = vmatprep.mubr.f32.mxu0 %v21481_v28  ;;  %16716 = vmatprep.mubr.f32.mxu1 %v21481_v28 }
 0x2fb   : > { %16537 = vmatmul.mubr.f32.vlgmr.msra.gmra.mrb[16].mxu0 %v20201_v0  ;;  %16717 = vmatmul.mubr.f32.vlgmr.msra.gmra.mrb[16].mxu1 %v20201_v0  ;;  %v21484_v0 = vld [vmem:[#allocation32_spill] sm:$0xff] }
 0x2fc   : > { %17331 = vmatpush3.bf16.msra.mxu0 %v20476_v60  ;;  %17403 = vmatpush3.bf16.msra.mxu1 %v20525_v6 }
 0x2fd   : > { %17333 = vmatprep.subr.bf16.mxu0 %v20442_v49  ;;  %17405 = vmatprep.subr.bf16.mxu1 %v20478_v55 }
 0x2fe   : > { %16539 = vmatprep.mubr.f32.mxu0 %v20206_v16  ;;  %16719 = vmatprep.mubr.f32.mxu1 %v20206_v16  ;;  %v21483_v16 = vld [vmem:[#allocation23_spill] sm:$0xff] }
 0x2ff   : > { %16540 = vmatmul.mubr.f32.gmra.mrb[18].mxu0 %v21482_v61  ;;  %16720 = vmatmul.mubr.f32.gmra.mrb[18].mxu1 %v21482_v61 }
 0x300   : > { %16546 = vmatprep.mubr.msk.f32.mxu0 %vm331_vm0, %v21419_v50  ;;  %16726 = vmatprep.mubr.msk.f32.mxu1 %vm331_vm0, %v21419_v50 }
 0x303   : > { %16547 = vmatmul.mubr.msk.f32.vlgmr.msra.gmra.mrb[16].mxu0 %vm331_vm0, %v19828_v22  ;;  %16727 = vmatmul.mubr.msk.f32.vlgmr.msra.gmra.mrb[16].mxu1 %vm331_vm0, %v19828_v22 }
 0x304   : > { %17335 = vmatpush3.bf16.msra.mxu0 %v20442_v49  ;;  %17407 = vmatpush3.bf16.msra.mxu1 %v20478_v55  ;;  %v21491_v49 = vld [vmem:[#allocation47_spill] sm:$0xff] }
 0x305   : > { %17337 = vmatprep.subr.bf16.mxu0 %v20414_v31  ;;  %17409 = vmatprep.subr.bf16.mxu1 %v20471_v9 }
 0x306   : > { %16549 = vmatprep.mubr.msk.f32.mxu0 %vm331_vm0, %v20068_v46  ;;  %16729 = vmatprep.mubr.msk.f32.mxu1 %vm331_vm0, %v20068_v46 }
 0x307   : > { %16550 = vmatmul.mubr.msk.f32.gmra.mrb[18].mxu0 %vm331_vm0, %v20071_v59  ;;  %16730 = vmatmul.mubr.msk.f32.gmra.mrb[18].mxu1 %vm331_vm0, %v20071_v59 }
 0x308   : > { %16556 = vmatprep.mubr.f32.mxu0 %v21483_v16  ;;  %16736 = vmatprep.mubr.f32.mxu1 %v21483_v16 }
 0x30b   : > { %16557 = vmatmul.mubr.f32.vlgmr.msra.gmra.mrb[16].mxu0 %v21484_v0  ;;  %16737 = vmatmul.mubr.f32.vlgmr.msra.gmra.mrb[16].mxu1 %v21484_v0 }
 0x30c   : > { %17339 = vmatpush3.bf16.msra.mxu0 %v20414_v31  ;;  %17411 = vmatpush3.bf16.msra.mxu1 %v20471_v9 }
 0x30d   : > { %17341 = vmatprep.subr.bf16.mxu0 %v20455_v29  ;;  %17413 = vmatprep.subr.bf16.mxu1 %v20493_v5 }
 0x30e   : > { %16559 = vmatprep.mubr.f32.mxu0 %v21485_v18  ;;  %16739 = vmatprep.mubr.f32.mxu1 %v21485_v18 }
 0x30f   : > { %16560 = vmatmul.mubr.f32.gmra.mrb[18].mxu0 %v21486_v45  ;;  %16740 = vmatmul.mubr.f32.gmra.mrb[18].mxu1 %v21486_v45 }
 0x310   : > { %16566 = vmatprep.mubr.f32.mxu0 %v21487_v43  ;;  %16746 = vmatprep.mubr.f32.mxu1 %v21487_v43 }
 0x313   : > { %16567 = vmatmul.mubr.f32.vlgmr.msra.gmra.mrb[16].mxu0 %v21488_v24  ;;  %16747 = vmatmul.mubr.f32.vlgmr.msra.gmra.mrb[16].mxu1 %v21488_v24 }
 0x314   : > { %17343 = vmatpush3.bf16.msra.mxu0 %v20455_v29  ;;  %17415 = vmatpush3.bf16.msra.mxu1 %v20493_v5 }
 0x315   : > { %17345 = vmatprep.subr.bf16.mxu0 %v20414_v31  ;;  %17417 = vmatprep.subr.bf16.mxu1 %v20471_v9 }
 0x316   : > { %16569 = vmatprep.mubr.f32.mxu0 %v21489_v52  ;;  %16749 = vmatprep.mubr.f32.mxu1 %v21489_v52 }
 0x317   : > { %16570 = vmatmul.mubr.f32.gmra.mrb[18].mxu0 %v21490_v57  ;;  %16750 = vmatmul.mubr.f32.gmra.mrb[18].mxu1 %v21490_v57 }
 0x318   : > { %16576 = vmatprep.mubr.msk.f32.mxu0 %vm331_vm0, %v21419_v50  ;;  %16756 = vmatprep.mubr.msk.f32.mxu1 %vm331_vm0, %v21419_v50 }
 0x31b   : > { %16577 = vmatmul.mubr.msk.f32.vlgmr.msra.gmra.mrb[16].mxu0 %vm331_vm0, %v19828_v22  ;;  %16757 = vmatmul.mubr.msk.f32.vlgmr.msra.gmra.mrb[16].mxu1 %vm331_vm0, %v19828_v22 }
 0x31c   : > { %17347 = vmatpush3.bf16.msra.mxu0 %v20414_v31  ;;  %17419 = vmatpush3.bf16.msra.mxu1 %v20471_v9  ;;  %v21493_v31 = vld [vmem:[#allocation48_spill] sm:$0xff] }
 0x31d   : > { %17349 = vmatprep.subr.bf16.mxu0 %v21491_v49  ;;  %17421 = vmatprep.subr.bf16.mxu1 %v20540_v25 }
 0x31e   : > { %16579 = vmatprep.mubr.msk.f32.mxu0 %vm331_vm0, %v20068_v46  ;;  %16759 = vmatprep.mubr.msk.f32.mxu1 %vm331_vm0, %v20068_v46 }
 0x31f   : > { %16580 = vmatmul.mubr.msk.f32.gmra.mrb[18].mxu0 %vm331_vm0, %v20071_v59  ;;  %16760 = vmatmul.mubr.msk.f32.gmra.mrb[18].mxu1 %vm331_vm0, %v20071_v59 }
 0x320   : > { %16586 = vmatprep.mubr.msk.f32.mxu0 %vm331_vm0, %v21419_v50  ;;  %16766 = vmatprep.mubr.msk.f32.mxu1 %vm331_vm0, %v21419_v50  ;;  %v21496_v50 = vld [vmem:[#allocation30_spill] sm:$0xff] }
 0x323   : > { %16587 = vmatmul.mubr.msk.f32.vlgmr.msra.gmra.mrb[16].mxu0 %vm331_vm0, %v19828_v22  ;;  %16767 = vmatmul.mubr.msk.f32.vlgmr.msra.gmra.mrb[16].mxu1 %vm331_vm0, %v19828_v22  ;;  %v21492_v22 = vld [vmem:[#allocation22_spill] sm:$0xff] }
 0x324   : > { %17351 = vmatpush3.bf16.msra.mxu0 %v21491_v49  ;;  %17423 = vmatpush3.bf16.msra.mxu1 %v20540_v25 }
 0x325   : > { %17353 = vmatprep.subr.bf16.mxu0 %v20555_v62  ;;  %17425 = vmatprep.subr.bf16.mxu1 %v20590_v38 }
 0x326   : > { %16589 = vmatprep.mubr.msk.f32.mxu0 %vm331_vm0, %v20068_v46  ;;  %16769 = vmatprep.mubr.msk.f32.mxu1 %vm331_vm0, %v20068_v46  ;;  %v21494_v46 = vld [vmem:[#allocation29_spill] sm:$0xff] }
 0x327   : > { %16590 = vmatmul.mubr.msk.f32.gmra.mrb[18].mxu0 %vm331_vm0, %v20071_v59  ;;  %16770 = vmatmul.mubr.msk.f32.gmra.mrb[18].mxu1 %vm331_vm0, %v20071_v59  ;;  %v21495_v59 = vld [vmem:[#allocation28_spill] sm:$0xff] }
 0x328   : > { %16596 = vmatprep.mubr.f32.mxu0 %v21492_v22  ;;  %16776 = vmatprep.mubr.f32.mxu1 %v21492_v22 }
 0x32b   : > { %16597 = vmatmul.mubr.f32.vlgmr.msra.gmra.mrb[16].mxu0 %v20462_v13  ;;  %16777 = vmatmul.mubr.f32.vlgmr.msra.gmra.mrb[16].mxu1 %v20462_v13 }
 0x32c   : > { %17355 = vmatpush3.bf16.msra.mxu0 %v20555_v62  ;;  %17427 = vmatpush3.bf16.msra.mxu1 %v20590_v38 }
 0x32d   : > { %17357 = vmatprep.subr.bf16.mxu0 %v21493_v31  ;;  %17429 = vmatprep.subr.bf16.mxu1 %v21494_v46 }
 0x32e   : > { %16599 = vmatprep.mubr.f32.mxu0 %v20581_v17  ;;  %16779 = vmatprep.mubr.f32.mxu1 %v20581_v17 }
 0x32f   : > { %16600 = vmatmul.mubr.f32.gmra.mrb[18].mxu0 %v20586_v19  ;;  %16780 = vmatmul.mubr.f32.gmra.mrb[18].mxu1 %v20586_v19  ;;  %v8425_v19 = vstv %s14710_s1 }
 0x330   : > { %16606 = vmatprep.mubr.msk.f32.mxu0 %vm331_vm0, %v21469_v53  ;;  %16786 = vmatprep.mubr.msk.f32.mxu1 %vm331_vm0, %v21469_v53 }
 0x333   : > { %16607 = vmatmul.mubr.msk.f32.vlgmr.msra.gmra.mrb[16].mxu0 %vm331_vm0, %v21471_v30  ;;  %16787 = vmatmul.mubr.msk.f32.vlgmr.msra.gmra.mrb[16].mxu1 %vm331_vm0, %v21471_v30 }
 0x334   : > { %17359 = vmatpush3.bf16.msra.mxu0 %v21493_v31  ;;  %17431 = vmatpush3.bf16.msra.mxu1 %v21494_v46 }
 0x335   : > { %17361 = vmatprep.subr.bf16.mxu0 %v21491_v49  ;;  %17433 = vmatprep.subr.bf16.mxu1 %v20540_v25 }
 0x336   : > { %16609 = vmatprep.mubr.msk.f32.mxu0 %vm331_vm0, %v21472_v36  ;;  %16789 = vmatprep.mubr.msk.f32.mxu1 %vm331_vm0, %v21472_v36 }
 0x337   : > { %16610 = vmatmul.mubr.msk.f32.gmra.mrb[18].mxu0 %vm331_vm0, %v21473_v26  ;;  %16790 = vmatmul.mubr.msk.f32.gmra.mrb[18].mxu1 %vm331_vm0, %v21473_v26 }
 0x338   : > { %16616 = vmatprep.mubr.f32.mxu0 %v20166_v48  ;;  %16796 = vmatprep.mubr.f32.mxu1 %v20166_v48  ;;  %v21497_v48 = vld [vmem:[#allocation49_spill] sm:$0xff] }
 0x33b   : > { %16617 = vmatmul.mubr.f32.vlgmr.msra.gmra.mrb[16].mxu0 %v20168_v37  ;;  %16797 = vmatmul.mubr.f32.vlgmr.msra.gmra.mrb[16].mxu1 %v20168_v37  ;;  %v21498_v37 = vld [vmem:[#allocation31_spill] sm:$0xff] }
 0x33c   : > { %17363 = vmatpush3.bf16.msra.mxu0 %v21491_v49  ;;  %17435 = vmatpush3.bf16.msra.mxu1 %v20540_v25 }
 0x33d   : > { %17365 = vmatprep.subr.bf16.mxu0 %v21495_v59  ;;  %17437 = vmatprep.subr.bf16.mxu1 %v21496_v50 }
 0x33e   : > { %16619 = vmatprep.mubr.f32.mxu0 %v21462_v44  ;;  %16799 = vmatprep.mubr.f32.mxu1 %v21462_v44 }
 0x33f   : > { %16620 = vmatmul.mubr.f32.gmra.mrb[18].mxu0 %v21465_v15  ;;  %16800 = vmatmul.mubr.f32.gmra.mrb[18].mxu1 %v21465_v15 }
 0x340   : > { %16626 = vmatprep.mubr.f32.mxu0 %v20186_v23  ;;  %16806 = vmatprep.mubr.f32.mxu1 %v20186_v23  ;;  %v21499_v23 = vld [vmem:[#allocation42_spill] sm:$0xff] }
 0x343   : > { %16627 = vmatmul.mubr.f32.vlgmr.msra.gmra.mrb[16].mxu0 %v20189_v58  ;;  %16807 = vmatmul.mubr.f32.vlgmr.msra.gmra.mrb[16].mxu1 %v20189_v58  ;;  %v6390_v58 = vstv %s6389_s0 }
 0x344   : > { %17367 = vmatpush3.bf16.msra.mxu0 %v21495_v59  ;;  %17439 = vmatpush3.bf16.msra.mxu1 %v21496_v50 }
 0x345   : > { %17369 = vmatprep.subr.bf16.mxu0 %v21491_v49  ;;  %17441 = vmatprep.subr.bf16.mxu1 %v20540_v25 }
 0x346   : > { %16629 = vmatprep.mubr.f32.mxu0 %v21463_v8  ;;  %16809 = vmatprep.mubr.f32.mxu1 %v21463_v8 }
 0x347   : > { %16630 = vmatmul.mubr.f32.gmra.mrb[18].mxu0 %v21466_v21  ;;  %16810 = vmatmul.mubr.f32.gmra.mrb[18].mxu1 %v21466_v21 }
 0x348   : > { %16636 = vmatprep.mubr.msk.f32.mxu0 %vm331_vm0, %v21469_v53  ;;  %16816 = vmatprep.mubr.msk.f32.mxu1 %vm331_vm0, %v21469_v53 }
 0x34b   : > { %16637 = vmatmul.mubr.msk.f32.vlgmr.msra.gmra.mrb[16].mxu0 %vm331_vm0, %v21471_v30  ;;  %16817 = vmatmul.mubr.msk.f32.vlgmr.msra.gmra.mrb[16].mxu1 %vm331_vm0, %v21471_v30 }
 0x34c   : > { %17371 = vmatpush3.bf16.msra.mxu0 %v21491_v49  ;;  %17443 = vmatpush3.bf16.msra.mxu1 %v20540_v25 }
 0x34d   : > { %17373 = vmatprep.subr.bf16.mxu0 %v21497_v48  ;;  %17445 = vmatprep.subr.bf16.mxu1 %v20600_v32 }
 0x34e   : > { %16639 = vmatprep.mubr.msk.f32.mxu0 %vm331_vm0, %v21472_v36  ;;  %16819 = vmatprep.mubr.msk.f32.mxu1 %vm331_vm0, %v21472_v36 }
 0x34f   : > { %16640 = vmatmul.mubr.msk.f32.gmra.mrb[18].mxu0 %vm331_vm0, %v21473_v26  ;;  %16820 = vmatmul.mubr.msk.f32.gmra.mrb[18].mxu1 %vm331_vm0, %v21473_v26 }
 0x350   : > { %16646 = vmatprep.mubr.msk.f32.mxu0 %vm331_vm0, %v21469_v53  ;;  %16826 = vmatprep.mubr.msk.f32.mxu1 %vm331_vm0, %v21469_v53 }
 0x353   : > { %16647 = vmatmul.mubr.msk.f32.vlgmr.msra.gmra.mrb[16].mxu0 %vm331_vm0, %v21471_v30  ;;  %16827 = vmatmul.mubr.msk.f32.vlgmr.msra.gmra.mrb[16].mxu1 %vm331_vm0, %v21471_v30 }
 0x354   : > { %17375 = vmatpush3.bf16.msra.mxu0 %v21497_v48  ;;  %17447 = vmatpush3.bf16.msra.mxu1 %v20600_v32 }
 0x355   : > { %17377 = vmatprep.subr.bf16.mxu0 %v20612_v39  ;;  %17449 = vmatprep.subr.bf16.mxu1 %v20628_v41 }
 0x356   : > { %16649 = vmatprep.mubr.msk.f32.mxu0 %vm331_vm0, %v21472_v36  ;;  %16829 = vmatprep.mubr.msk.f32.mxu1 %vm331_vm0, %v21472_v36 }
 0x357   : > { %16650 = vmatmul.mubr.msk.f32.gmra.mrb[18].mxu0 %vm331_vm0, %v21473_v26  ;;  %16830 = vmatmul.mubr.msk.f32.gmra.mrb[18].mxu1 %vm331_vm0, %v21473_v26 }
 0x358   : > { %16656 = vmatprep.mubr.f32.mxu0 %v20744_v51  ;;  %16836 = vmatprep.mubr.f32.mxu1 %v20744_v51 }
 0x35b   : > { %16657 = vmatmul.mubr.f32.vlgmr.msra.gmra.mrb[16].mxu0 %v20758_v34  ;;  %16837 = vmatmul.mubr.f32.vlgmr.msra.gmra.mrb[16].mxu1 %v20758_v34 }
 0x35c   : > { %17379 = vmatpush3.bf16.msra.mxu0 %v20612_v39  ;;  %17451 = vmatpush3.bf16.msra.mxu1 %v20628_v41 }
 0x35d   : > { %17381 = vmatprep.subr.bf16.mxu0 %v20594_v40  ;;  %17453 = vmatprep.subr.bf16.mxu1 %v20610_v11 }
 0x35e   : > { %16659 = vmatprep.mubr.f32.mxu0 %v20764_v27  ;;  %16839 = vmatprep.mubr.f32.mxu1 %v20764_v27 }
 0x35f   : > { %16660 = vmatmul.mubr.f32.gmra.mrb[18].mxu0 %v20768_v14  ;;  %16840 = vmatmul.mubr.f32.gmra.mrb[18].mxu1 %v20768_v14  ;;  %v12423_v14 = vstv %s14864_s18 }
 0x360   : > { %16666 = vmatprep.mubr.msk.f32.mxu0 %vm331_vm0, %v20657_v12  ;;  %16846 = vmatprep.mubr.msk.f32.mxu1 %vm331_vm0, %v20657_v12 }
 0x363   : > { %16667 = vmatmul.mubr.msk.f32.vlgmr.msra.gmra.mrb[16].mxu0 %vm331_vm0, %v20672_v7  ;;  %16847 = vmatmul.mubr.msk.f32.vlgmr.msra.gmra.mrb[16].mxu1 %vm331_vm0, %v20672_v7 }
 0x364   : > { %17383 = vmatpush3.bf16.msra.mxu0 %v20594_v40  ;;  %17455 = vmatpush3.bf16.msra.mxu1 %v20610_v11 }
 0x365   : > { %17385 = vmatprep.subr.bf16.mxu0 %v21497_v48  ;;  %17457 = vmatprep.subr.bf16.mxu1 %v20600_v32 }
 0x366   : > { %16669 = vmatprep.mubr.msk.f32.mxu0 %vm331_vm0, %v20687_v42  ;;  %16849 = vmatprep.mubr.msk.f32.mxu1 %vm331_vm0, %v20687_v42 }
 0x367   : > { %16670 = vmatmul.mubr.msk.f32.gmra.mrb[18].mxu0 %vm331_vm0, %v20690_v3  ;;  %16850 = vmatmul.mubr.msk.f32.gmra.mrb[18].mxu1 %vm331_vm0, %v20690_v3 }
 0x368   : > { %16676 = vmatprep.mubr.f32.mxu0 %v20682_v4  ;;  %16856 = vmatprep.mubr.f32.mxu1 %v20682_v4 }
 0x36b   : > { %16677 = vmatmul.mubr.f32.vlgmr.msra.gmra.mrb[16].mxu0 %v20696_v63  ;;  %16857 = vmatmul.mubr.f32.vlgmr.msra.gmra.mrb[16].mxu1 %v20696_v63 }
 0x36c   : > { %17387 = vmatpush3.bf16.msra.mxu0 %v21497_v48  ;;  %17459 = vmatpush3.bf16.msra.mxu1 %v20600_v32 }
 0x36d   : > { %17389 = vmatprep.subr.bf16.mxu0 %v21498_v37  ;;  %17461 = vmatprep.subr.bf16.mxu1 %v21499_v23 }
 0x36e   : > { %16679 = vmatprep.mubr.f32.mxu0 %v20713_v33  ;;  %16859 = vmatprep.mubr.f32.mxu1 %v20713_v33 }
 0x36f   : > { %16680 = vmatmul.mubr.f32.gmra.mrb[18].mxu0 %v20722_v20  ;;  %16860 = vmatmul.mubr.f32.gmra.mrb[18].mxu1 %v20722_v20 }
 0x370   : > { %16686 = vmatprep.mubr.f32.mxu0 %v20703_v10  ;;  %16866 = vmatprep.mubr.f32.mxu1 %v20703_v10 }
 0x373   : > { %16687 = vmatmul.mubr.f32.vlgmr.msra.gmra.mrb[16].mxu0 %v20720_v2  ;;  %16867 = vmatmul.mubr.f32.vlgmr.msra.gmra.mrb[16].mxu1 %v20720_v2 }
 0x374   : > { %17391 = vmatpush3.bf16.msra.mxu0 %v21498_v37  ;;  %17463 = vmatpush3.bf16.msra.mxu1 %v21499_v23 }
 0x375   : > { %17393 = vmatprep.subr.bf16.mxu0 %v21497_v48  ;;  %17465 = vmatprep.subr.bf16.mxu1 %v20600_v32 }
 0x376   : > { %16689 = vmatprep.mubr.f32.mxu0 %v20731_v56  ;;  %16869 = vmatprep.mubr.f32.mxu1 %v20731_v56 }
 0x377   : > { %16690 = vmatmul.mubr.f32.gmra.mrb[18].mxu0 %v20740_v35  ;;  %16870 = vmatmul.mubr.f32.gmra.mrb[18].mxu1 %v20740_v35 }
 0x378   : > { %16696 = vmatprep.mubr.msk.f32.mxu0 %vm331_vm0, %v20657_v12  ;;  %16876 = vmatprep.mubr.msk.f32.mxu1 %vm331_vm0, %v20657_v12 }
 0x37b   : > { %16697 = vmatmul.mubr.msk.f32.vlgmr.msra.gmra.mrb[16].mxu0 %vm331_vm0, %v20672_v7  ;;  %16877 = vmatmul.mubr.msk.f32.vlgmr.msra.gmra.mrb[16].mxu1 %vm331_vm0, %v20672_v7 }
 0x37c   : > { %17395 = vmatpush3.bf16.msra.mxu0 %v21497_v48  ;;  %17467 = vmatpush3.bf16.msra.mxu1 %v20600_v32  ;;  %v10424_v32 = vstv %s14787_s14 }
 0x37d   : > { %16699 = vmatprep.mubr.msk.f32.mxu0 %vm331_vm0, %v20687_v42  ;;  %16879 = vmatprep.mubr.msk.f32.mxu1 %vm331_vm0, %v20687_v42 }
 0x37f   : > { %16700 = vmatmul.mubr.msk.f32.gmra.mrb[18].mxu0 %vm331_vm0, %v20690_v3  ;;  %16880 = vmatmul.mubr.msk.f32.gmra.mrb[18].mxu1 %vm331_vm0, %v20690_v3 }
 0x380   : > { %16706 = vmatprep.mubr.msk.f32.mxu0 %vm331_vm0, %v20657_v12  ;;  %16886 = vmatprep.mubr.msk.f32.mxu1 %vm331_vm0, %v20657_v12 }
 0x383   : > { %16707 = vmatmul.mubr.msk.f32.vlgmr.msra.gmra.mrb[16].mxu0 %vm331_vm0, %v20672_v7  ;;  %16887 = vmatmul.mubr.msk.f32.vlgmr.msra.gmra.mrb[16].mxu1 %vm331_vm0, %v20672_v7 }
 0x384   : > { %16709 = vmatprep.mubr.msk.f32.mxu0 %vm331_vm0, %v20687_v42  ;;  %16889 = vmatprep.mubr.msk.f32.mxu1 %vm331_vm0, %v20687_v42 }
 0x387   : > { %16710 = vmatmul.mubr.msk.f32.gmra.mrb[18].mxu0 %vm331_vm0, %v20690_v3  ;;  %16890 = vmatmul.mubr.msk.f32.gmra.mrb[18].mxu1 %vm331_vm0, %v20690_v3 }
 0x3c6   : > { %v16348_v29 = vpop.f32.mrb[12].mxu0  ;;  %v16528_v13 = vpop.f32.mrb[12].mxu1 }
 0x3c7   : > { %v17468_v9 = vadd.f32 %v16348_v29, %v6390_v58  ;;  %v17472_v60 = vadd.f32 %v16528_v13, %v8425_v19  ;;  %v8393_v55 = vpop.f32.mrb[13].mxu0  ;;  %v10392_v5 = vpop.f32.mrb[13].mxu1 }
 0x3c8   : > { %v17469_v6 = vadd.f32 %v8393_v55, %v6390_v58  ;;  %v17473_v25 = vadd.f32 %v10392_v5, %v8425_v19 }
 0x3c9   : > { %8421 = vst.msk [vmem:[%s21145_s13 + $0x8] sm:$0xff] %vm8419_vm13, %v17468_v9  ;;  %14784 = vst.msk [vmem:[%s21145_s13 + $0x28] sm:$0xff] %vm8419_vm13, %v17472_v60 }
 0x3ca   : > { %8420 = vst.msk [vmem:[%s21145_s13] sm:$0xff] %vm8419_vm13, %v17469_v6  ;;  %14783 = vst.msk [vmem:[%s21145_s13 + $0x20] sm:$0xff] %vm8419_vm13, %v17473_v25  ;;  %v16351_v17 = vpop.f32.mrb[14].mxu0  ;;  %v16531_v62 = vpop.f32.mrb[14].mxu1 }
 0x3cb   : > { %v17470_v44 = vadd.f32 %v16351_v17, %v6390_v58  ;;  %v17474_v8 = vadd.f32 %v16531_v62, %v8425_v19  ;;  %v8405_v15 = vpop.f32.mrb[15].mxu0  ;;  %v10404_v21 = vpop.f32.mrb[15].mxu1 }
 0x3cc   : > { %v17471_v38 = vadd.f32 %v8405_v15, %v6390_v58  ;;  %v17475_v40 = vadd.f32 %v10404_v21, %v8425_v19 }
 0x3cd   : > { %8423 = vst.msk [vmem:[%s21145_s13 + $0x18] sm:$0xff] %vm8419_vm13, %v17470_v44  ;;  %14786 = vst.msk [vmem:[%s21145_s13 + $0x38] sm:$0xff] %vm8419_vm13, %v17474_v8 }
 0x3ce   : > { %8422 = vst.msk [vmem:[%s21145_s13 + $0x10] sm:$0xff] %vm8419_vm13, %v17471_v38  ;;  %14785 = vst.msk [vmem:[%s21145_s13 + $0x30] sm:$0xff] %vm8419_vm13, %v17475_v40 }
 0x456   : > { %v16708_v53 = vpop.f32.mrb[16].mxu0  ;;  %v16888_v11 = vpop.f32.mrb[16].mxu1 }
 0x457   : > { %v17476_v39 = vadd.f32 %v16708_v53, %v10424_v32  ;;  %v17480_v27 = vadd.f32 %v16888_v11, %v12423_v14  ;;  %v12391_v30 = vpop.f32.mrb[17].mxu0  ;;  %v14390_v36 = vpop.f32.mrb[17].mxu1 }
 0x458   : > { %v17477_v41 = vadd.f32 %v12391_v30, %v10424_v32  ;;  %v17481_v26 = vadd.f32 %v14390_v36, %v12423_v14 }
 0x459   : > { %14861 = vst.msk [vmem:[%s21145_s13 + $0x48] sm:$0xff] %vm8419_vm13, %v17476_v39  ;;  %14938 = vst.msk [vmem:[%s21145_s13 + $0x68] sm:$0xff] %vm8419_vm13, %v17480_v27 }
 0x45a   : > { %14860 = vst.msk [vmem:[%s21145_s13 + $0x40] sm:$0xff] %vm8419_vm13, %v17477_v41  ;;  %14937 = vst.msk [vmem:[%s21145_s13 + $0x60] sm:$0xff] %vm8419_vm13, %v17481_v26  ;;  %v16711_v12 = vpop.f32.mrb[18].mxu0  ;;  %v16891_v7 = vpop.f32.mrb[18].mxu1 }
 0x45b   : > { %v17478_v4 = vadd.f32 %v16711_v12, %v10424_v32  ;;  %v17482_v42 = vadd.f32 %v16891_v7, %v12423_v14  ;;  %v12403_v3 = vpop.f32.mrb[19].mxu0  ;;  %v14402_v63 = vpop.f32.mrb[19].mxu1 }
 0x45c   : > { %v17479_v10 = vadd.f32 %v12403_v3, %v10424_v32  ;;  %v17483_v33 = vadd.f32 %v14402_v63, %v12423_v14 }
 0x45d   : > { %14863 = vst.msk [vmem:[%s21145_s13 + $0x58] sm:$0xff] %vm8419_vm13, %v17478_v4  ;;  %14940 = vst.msk [vmem:[%s21145_s13 + $0x78] sm:$0xff] %vm8419_vm13, %v17482_v42 }
 0x45e   : > { %14862 = vst.msk [vmem:[%s21145_s13 + $0x50] sm:$0xff] %vm8419_vm13, %v17479_v10  ;;  %14939 = vst.msk [vmem:[%s21145_s13 + $0x70] sm:$0xff] %vm8419_vm13, %v17483_v33 }
 0x45f   : > { %18022 = shalt.err (!%p18019_p7)
}
 0x460   : > { %s18023_s10 = scalar_lea.hbm %s21176_s7, 2048  ;;  %s18027_s22 = scalar_lea.hbm %s21233_s3, 4096 }
 0x461   : > { %p18024_p11 = scmp.ne.s32.totalorder %s21176_s7, %s18023_s10  ;;  %p18028_p3 = scmp.lt.u32.totalorder %s21176_s7, %s21233_s3 }
 0x462   : > { %p18029_p9 = scmp.lt.u32.totalorder %s18027_s22, %s18023_s10  ;;  %p18031_p5 = scmp.lt.u32.totalorder %s18023_s10, %s21176_s7 }
 0x463   : > { %p18025_p13 = pnand %p18024_p11, %p21500_p2 }
 0x464   : > { %p18030_p1 = por %p18029_p9, %p18028_p3 }
 0x465   : > { %p18026_p6 = pneg %p18025_p13 }
 0x466   : > { %p18032_p8 = por %p18031_p5, %p18030_p1 }
 0x468   : > { %p18033_p10 = pnand %p18032_p8, %p18026_p6 }
 0x46a   : > { %18036 = shalt.err (!%p18033_p10)
}
 0x46b   : > { %s18093_s6 = smov 128   ;;  %s18094_s8 = smov 8  }
 0x46c   : > { %17886 = dma.vmem_to_hbm [thread:$0]  (%p21500_p2), %s21178_s23, 2048, %s21176_s7, %s14422_s28, %s18093_s6, %s18093_s6, %s18094_s8  }
 0x46d PF: > { %s14450_s9 = sand.u32 1, %s18071_s12   ;;  %p21501_p4 = scmp.ne.s32.totalorder %s21314_s25, 0 }
 0x46e   : > { %p21502_p12 = scmp.ge.s32.totalorder %s18083_s15, 2  ;;  %s14451_s0 = scalar_lea.sflag [#allocation4], %s14450_s9 }
 0x470   : > { %p17900_p0 = pnand %p21502_p12, %p21501_p4 }
 0x472   : > { %18066 = dma.done.wait (!%p17900_p0), %s14451_s0, 2048  }
 0x473   : > { %18068 = vsyncadd (!%p17900_p0), %s14451_s0, 4294965248  ;;  %s21503_s15 = sld [smem:[#allocation16_spill]]  ;;  %s21504_s12 = sld [smem:[#allocation14_spill]] }
 0x474   : > { %s21505_s13 = sld [smem:[#allocation15_spill]]  ;;  %s21506_s14 = sld [smem:[#allocation17_spill]] }
 0x479   : > { %p18_p7 = scmp.ge.s32.totalorder %s21503_s15, 4  }
 0x47b   :  { %20 = sbr.rel (!%p18_p7) target bundleno = 11 (0xb), region = 92 }
 0x482   :  { %14456 = vsyncpa [#allocation3], 1 }
 0x483   :  { %14458 = vsyncpa [#allocation3 + $0x1], 1 }
 0x484   :  { %14459 = vsyncpa [#allocation4], 1 }
 0x485   :  { %14461 = vsyncpa [#allocation4 + $0x1], 1 }
 0x486   :  { %14462 = vsyncpa [#allocation5], 1 }
 0x487   :  { %14464 = vsyncpa [#allocation5 + $0x1], 1 }
 0x488   :  { %14465 = vsyncpa [#allocation8], 1 }

</bundles_post_ra>
